<compile_context>
chip_gen: v5e
topology: v5e:2x2
jax: 0.10.0
libtpu: 0.0.40
codegen_flags: <defaults>
</compile_context>

<pallas_src>
from functools import partial

import jax
import jax.numpy as jnp
from jax.experimental import pallas as pl
from jax.experimental.pallas import tpu as pltpu


# ----------------------------- shared math helpers -----------------------------

def _layernorm(x, g, b, eps=1e-5):
    mu = jnp.mean(x, axis=-1, keepdims=True)
    xc = x - mu
    var = jnp.mean(xc * xc, axis=-1, keepdims=True)
    return xc * jax.lax.rsqrt(var + eps) * g + b


def _gelu(x):
    # TODO(synk): torch F.gelu defaults to the exact erf form; erf has no guaranteed
    # Mosaic lowering, so the tanh approximation is used in the kernel AND the reference.
    c = 0.7978845608028654  # sqrt(2/pi)
    return 0.5 * x * (1.0 + jnp.tanh(c * (x + 0.044715 * x * x * x)))


def _softmax(x):
    m = jnp.max(x, axis=-1, keepdims=True)
    e = jnp.exp(x - m)
    return e / jnp.sum(e, axis=-1, keepdims=True)


# --------------------------------- Pallas kernel --------------------------------

def _transformer_kernel(x_ref, wemb_ref, bemb_ref,
                        ln1g_ref, ln1b_ref, wqkv_ref, wo_ref, bo_ref,
                        ln2g_ref, ln2b_ref, w1_ref, b1_ref, w2_ref, b2_ref,
                        o_ref, *, heads, dim_head, num_tokens, batch_tile):
    """Grid = (batch_tiles, depth); activation (TB, S, dim) carried in o_ref across depth."""
    l = pl.program_id(1)
    inner = heads * dim_head
    f32 = jnp.float32

    # ---- Embeddings: only on the first layer step; result stays resident in o_ref ----
    @pl.when(l == 0)
    def _():
        for b in range(batch_tile):
            emb = x_ref[b] * wemb_ref[...] + bemb_ref[...]              # (T, dim)
            cls = jnp.sum(emb, axis=0, keepdims=True) * (1.0 / num_tokens)  # AdaptiveAvgPool
            o_ref[b] = jnp.concatenate([cls, emb], axis=0)              # (S, dim)

    # ---- per-layer weights: upcast ONCE per grid step (streamed bf16 -> f32 math) ----
    wqkv = wqkv_ref[0].astype(f32)      # (dim, 3*inner), Wq already scaled by dh**-0.5
    wo = wo_ref[0].astype(f32)          # (inner, dim)
    w1 = w1_ref[0].astype(f32)          # (dim, 2*dm)   [value | gate]
    w2 = w2_ref[0].astype(f32)          # (dm, dim)
    ln1g, ln1b = ln1g_ref[0], ln1b_ref[0]
    ln2g, ln2b = ln2g_ref[0], ln2b_ref[0]
    bo, b1, b2 = bo_ref[0], b1_ref[0], b2_ref[0]

    def mm(a, b):
        return jnp.dot(a, b, preferred_element_type=jnp.float32)

    # Weights stay VMEM-resident across this static, small batch-tile loop.
    for b in range(batch_tile):
        x = o_ref[b]                                                    # (S, dim), f32

        # ---- Residual(PreNorm(Attention)) ----
        h = _layernorm(x, ln1g, ln1b)
        qkv = mm(h, wqkv)                                               # (S, 3*inner), one fused dot
        ctx = []
        for hd in range(heads):                                         # static unroll (small H)
            o0 = hd * dim_head
            q = qkv[:, o0:o0 + dim_head]
            k = qkv[:, inner + o0:inner + o0 + dim_head]
            v = qkv[:, 2 * inner + o0:2 * inner + o0 + dim_head]
            sim = jax.lax.dot_general(q, k, (((1,), (1,)), ((), ())),   # q @ k.T w/o transpose
                                      preferred_element_type=jnp.float32)
            ctx.append(mm(_softmax(sim), v))                            # (S, dim_head)
        ctx = jnp.concatenate(ctx, axis=-1)                             # (S, inner)
        x = x + mm(ctx, wo) + bo                                        # fused out-projection

        # ---- Residual(PreNorm(GEGLU FeedForward)) ----
        h2 = _layernorm(x, ln2g, ln2b)
        y = mm(h2, w1) + b1                                             # (S, 2*dm), one fused dot
        dm = y.shape[-1] // 2
        ff = y[:, :dm] * _gelu(y[:, dm:])
        o_ref[b] = x + mm(ff, w2) + b2


# --------------------------- one-time parameter prep -----------------------------

def prepare_params(params, *, heads, dim_head, weight_dtype=jnp.bfloat16):
    """Host-side one-time prep: fold embeddings, fuse QKV/out/GEGLU weights, fold the
    attention scale into Wq, stack per-layer weights on a leading depth axis, cast the
    large matmul weights to `weight_dtype` (bf16 halves HBM->VMEM streaming)."""
    emb1 = params['embeds1']
    apoe, dim = emb1.shape
    T = apoe + 3
    layers = params['layers']
    inner = heads * dim_head
    dm = layers[0]['w1a'].shape[1]
    scale = dim_head ** -0.5

    # Embeddings folded into elementwise (T, dim) weight / bias tables.
    w_emb = jnp.concatenate([emb1, jnp.broadcast_to(params['emb_w'], (3, dim))], axis=0)
    b_emb = jnp.concatenate([jnp.zeros((apoe, dim), jnp.float32),
                             jnp.broadcast_to(params['emb_b'], (3, dim))], axis=0)

    def per_head_to_full(w):  # (heads, dim, dh) -> (dim, inner)
        return jnp.transpose(w, (1, 0, 2)).reshape(dim, inner)

    def stack(fn, dtype=jnp.float32):
        return jnp.stack([fn(lay) for lay in layers], axis=0).astype(dtype)

    wqkv = stack(lambda l: jnp.concatenate(
        [per_head_to_full(l['wq']) * scale,          # fold attention scale into Wq
         per_head_to_full(l['wk']),
         per_head_to_full(l['wv'])], axis=-1), weight_dtype)             # (D, dim, 3*inner)
    wo = stack(lambda l: l['wo'].reshape(inner, dim), weight_dtype)       # (D, inner, dim)
    w1 = stack(lambda l: jnp.concatenate([l['w1a'], l['w1g']], axis=-1), weight_dtype)
    w2 = stack(lambda l: l['w2'], weight_dtype)                           # (D, dm, dim)

    return dict(
        T=T, S=T + 1, dim=dim, dm=dm, depth=len(layers),
        heads=heads, dim_head=dim_head,
        w_emb=w_emb, b_emb=b_emb,
        ln1_g=stack(lambda l: l['ln1_g']), ln1_b=stack(lambda l: l['ln1_b']),
        wqkv=wqkv, wo=wo, bo=stack(lambda l: l['bo']),
        ln2_g=stack(lambda l: l['ln2_g']), ln2_b=stack(lambda l: l['ln2_b']),
        w1=w1, b1=stack(lambda l: jnp.concatenate([l['b1a'], l['b1g']], axis=-1)),
        w2=w2, b2=stack(lambda l: l['b2']),
    )


# ---------------------------------- wrapper --------------------------------------

def transformer_forward(x, prepped, *, batch_tile=None):
    """x: (B, num_tokens, 1) -> (B, num_tokens + 1, dim)."""
    B, T, one = x.shape
    assert one == 1 and T == prepped['T']
    S, dim, dm, depth = prepped['S'], prepped['dim'], prepped['dm'], prepped['depth']
    heads, dim_head = prepped['heads'], prepped['dim_head']
    inner = heads * dim_head
    tb = B if batch_tile is None else batch_tile
    assert B % tb == 0, "batch must be divisible by batch_tile"

    def lspec(shape):  # per-layer stacked weight: pick layer l, full tile otherwise
        return pl.BlockSpec((1,) + shape, lambda b, l, _n=len(shape): (l,) + (0,) * _n)

    in_specs = [
        pl.BlockSpec((tb, T, 1), lambda b, l: (b, 0, 0)),     # x (per batch tile)
        pl.BlockSpec((T, dim), lambda b, l: (0, 0)),          # folded embedding weight
        pl.BlockSpec((T, dim), lambda b, l: (0, 0)),          # folded embedding bias
        lspec((1, dim)), lspec((1, dim)),                     # ln1 gamma / beta
        lspec((dim, 3 * inner)),                              # fused Wqkv   (bf16 stream)
        lspec((inner, dim)),                                  # fused Wout   (bf16 stream)
        lspec((1, dim)),                                      # bo
        lspec((1, dim)), lspec((1, dim)),                     # ln2 gamma / beta
        lspec((dim, 2 * dm)), lspec((1, 2 * dm)),             # fused W1 [value|gate], b1
        lspec((dm, dim)), lspec((1, dim)),                    # W2, b2
    ]
    # Output block index is independent of the depth axis -> the activation stays VMEM
    # resident across the inner "arbitrary" depth loop.  Grid order must stay (batch, depth).
    out_specs = pl.BlockSpec((tb, S, dim), lambda b, l: (b, 0, 0))

    return pl.pallas_call(
        partial(_transformer_kernel, heads=heads, dim_head=dim_head,
                num_tokens=T, batch_tile=tb),
        out_shape=jax.ShapeDtypeStruct((B, S, dim), jnp.float32),
        grid_spec=pltpu.PrefetchScalarGridSpec(
            num_scalar_prefetch=0,
            grid=(B // tb, depth),
            in_specs=in_specs,
            out_specs=out_specs),
        compiler_params=pltpu.CompilerParams(
            dimension_semantics=("parallel", "arbitrary"),
            vmem_limit_bytes=32 * 1024 * 1024),
    )(x, prepped['w_emb'], prepped['b_emb'],
      prepped['ln1_g'], prepped['ln1_b'], prepped['wqkv'], prepped['wo'], prepped['bo'],
      prepped['ln2_g'], prepped['ln2_b'], prepped['w1'], prepped['b1'],
      prepped['w2'], prepped['b2'])


# ----------------------------- plain-JAX reference -------------------------------

def transformer_ref(x, params, *, heads, dim_head):
    prec = jax.lax.Precision.HIGHEST
    emb1 = params['embeds1']
    apoe, dim = emb1.shape
    x1 = x[:, :apoe, :] * emb1
    x2 = x[:, apoe:, :] * params['emb_w'] + params['emb_b']
    h = jnp.concatenate([x1, x2], axis=1)
    cls = jnp.mean(h, axis=1, keepdims=True)
    h = jnp.concatenate([cls, h], axis=1)
    scale = dim_head ** -0.5
    for lay in params['layers']:
        hn = _layernorm(h, lay['ln1_g'], lay['ln1_b'])
        att = 0.0
        for hd in range(heads):
            q = jnp.einsum('bsd,de->bse', hn, lay['wq'][hd], precision=prec)
            k = jnp.einsum('bsd,de->bse', hn, lay['wk'][hd], precision=prec)
            v = jnp.einsum('bsd,de->bse', hn, lay['wv'][hd], precision=prec)
            sim = jnp.einsum('bie,bje->bij', q, k, precision=prec) * scale
            o = jnp.einsum('bij,bje->bie', _softmax(sim), v, precision=prec)
            att = att + jnp.einsum('bie,ed->bid', o, lay['wo'][hd], precision=prec)
        h = h + att + lay['bo']
        hn2 = _layernorm(h, lay['ln2_g'], lay['ln2_b'])
        a = jnp.einsum('bsd,df->bsf', hn2, lay['w1a'], precision=prec) + lay['b1a']
        g = jnp.einsum('bsd,df->bsf', hn2, lay['w1g'], precision=prec) + lay['b1g']
        ff = a * _gelu(g)
        h = h + jnp.einsum('bsf,fd->bsd', ff, lay['w2'], precision=prec) + lay['b2']
    return h


def _round_matmul_weights_to_bf16(params):
    """Round only the large matmul weights to bf16 (and back to f32) — mirrors exactly
    what the bf16-streamed kernel computes, enabling a tight-tolerance check."""
    def r(w):
        return w.astype(jnp.bfloat16).astype(jnp.float32)
    out = dict(params)
    out['layers'] = [dict(lay, **{k: r(lay[k])
                                  for k in ('wq', 'wk', 'wv', 'wo', 'w1a', 'w1g', 'w2')})
                     for lay in params['layers']]
    return out


# ----------------------------------- init ----------------------------------------

def init_transformer_params(key, *, num_tokens, dim, depth, heads, dim_head, mult=4):
    apoe = num_tokens - 3
    inner = heads * dim_head
    dm = dim * mult
    keys = jax.random.split(key, 3 + depth)
    params = {
        'embeds1': jax.random.normal(keys[0], (apoe, dim), jnp.float32),
        'emb_w': jax.random.normal(keys[1], (dim,), jnp.float32) * 0.5,  # Linear(1,dim).weight
        'emb_b': jax.random.normal(keys[2], (dim,), jnp.float32) * 0.5,  # Linear(1,dim).bias
        'layers': [],
    }
    for li in range(depth):
        k = jax.random.split(keys[3 + li], 11)
        s_in = 1.0 / (dim ** 0.5)
        params['layers'].append({
            'ln1_g': jnp.ones((1, dim), jnp.float32),
            'ln1_b': jnp.zeros((1, dim), jnp.float32),
            'wq': jax.random.normal(k[0], (heads, dim, dim_head), jnp.float32) * s_in,
            'wk': jax.random.normal(k[1], (heads, dim, dim_head), jnp.float32) * s_in,
            'wv': jax.random.normal(k[2], (heads, dim, dim_head), jnp.float32) * s_in,
            'wo': jax.random.normal(k[3], (heads, dim_head, dim), jnp.float32) * (1.0 / inner ** 0.5),
            'bo': jax.random.normal(k[4], (1, dim), jnp.float32) * 0.02,
            'ln2_g': jnp.ones((1, dim), jnp.float32),
            'ln2_b': jnp.zeros((1, dim), jnp.float32),
            'w1a': jax.random.normal(k[5], (dim, dm), jnp.float32) * s_in,
            'b1a': jax.random.normal(k[6], (1, dm), jnp.float32) * 0.02,
            'w1g': jax.random.normal(k[7], (dim, dm), jnp.float32) * s_in,
            'b1g': jax.random.normal(k[8], (1, dm), jnp.float32) * 0.02,
            'w2': jax.random.normal(k[9], (dm, dim), jnp.float32) * (1.0 / dm ** 0.5),
            'b2': jax.random.normal(k[10], (1, dim), jnp.float32) * 0.02,
        })
    return params


# ----------------------------------- demo ----------------------------------------

if __name__ == "__main__":
    # Lane-dense config: dim, heads*dim_head and dim*mult*2 are multiples of 128.
    num_tokens, dim, depth, heads, dim_head = 8, 128, 2, 8, 16
    batch, batch_tile = 4, 2   # grid = (2, depth): >=2 parallel batch-tile steps,
                               # and weights are streamed per *tile*, not per element.

    key = jax.random.PRNGKey(0)
    kx, kp = jax.random.split(key)
    x = jax.random.normal(kx, (batch, num_tokens, 1), dtype=jnp.float32)
    params = init_transformer_params(kp, num_tokens=num_tokens, dim=dim, depth=depth,
                                     heads=heads, dim_head=dim_head)
    ref = transformer_ref(x, params, heads=heads, dim_head=dim_head)

    # f32-weight path: tight check against the plain-JAX reference.
    prep_f32 = prepare_params(params, heads=heads, dim_head=dim_head,
                              weight_dtype=jnp.float32)
    out_f32 = jax.block_until_ready(transformer_forward(x, prep_f32, batch_tile=batch_tile))
    assert out_f32.shape == (batch, num_tokens + 1, dim)
    assert jnp.allclose(out_f32, ref, atol=2e-3, rtol=2e-3), \
        float(jnp.max(jnp.abs(out_f32 - ref)))

    # bf16-streamed weights (production default): tight check against a reference run on
    # the SAME bf16-rounded weights (no loose 1e-1 tolerance hiding bugs).
    prep_bf16 = prepare_params(params, heads=heads, dim_head=dim_head,
                               weight_dtype=jnp.bfloat16)
    out_bf16 = jax.block_until_ready(transformer_forward(x, prep_bf16, batch_tile=batch_tile))
    ref_bf16 = transformer_ref(x, _round_matmul_weights_to_bf16(params),
                               heads=heads, dim_head=dim_head)
    assert jnp.allclose(out_bf16, ref_bf16, atol=2e-3, rtol=2e-3), \
        float(jnp.max(jnp.abs(out_bf16 - ref_bf16)))

    print("KERNEL_OK")
</pallas_src>

<mosaic_0001>
module attributes {stable_mosaic.version = 11 : i64} {
  func.func @_transformer_kernel(%arg0: i32, %arg1: i32, %arg2: memref<2x8x1xf32, #tpu.memory_space<vmem>>, %arg3: memref<8x128xf32, #tpu.memory_space<vmem>>, %arg4: memref<8x128xf32, #tpu.memory_space<vmem>>, %arg5: memref<1x1x128xf32, #tpu.memory_space<vmem>>, %arg6: memref<1x1x128xf32, #tpu.memory_space<vmem>>, %arg7: memref<1x128x384xf32, #tpu.memory_space<vmem>>, %arg8: memref<1x128x128xf32, #tpu.memory_space<vmem>>, %arg9: memref<1x1x128xf32, #tpu.memory_space<vmem>>, %arg10: memref<1x1x128xf32, #tpu.memory_space<vmem>>, %arg11: memref<1x1x128xf32, #tpu.memory_space<vmem>>, %arg12: memref<1x128x1024xf32, #tpu.memory_space<vmem>>, %arg13: memref<1x1x1024xf32, #tpu.memory_space<vmem>>, %arg14: memref<1x512x128xf32, #tpu.memory_space<vmem>>, %arg15: memref<1x1x128xf32, #tpu.memory_space<vmem>>, %arg16: memref<2x9x128xf32, #tpu.memory_space<vmem>>) attributes {dimension_semantics = [#tpu.dimension_semantics<parallel>, #tpu.dimension_semantics<arbitrary>], iteration_bounds = array<i64: 2, 2>, scalar_prefetch = 0 : i64, scratch_operands = 0 : i64, tpu.core_type = #tpu.core_type<tc>, window_params = [{transform_indices = @transform_0, window_bounds = array<i64: 2, 8, 1>}, {pipeline_mode = #tpu.pipeline_mode<synchronous>, transform_indices = @transform_1, window_bounds = array<i64: 8, 128>}, {pipeline_mode = #tpu.pipeline_mode<synchronous>, transform_indices = @transform_2, window_bounds = array<i64: 8, 128>}, {transform_indices = @transform_3, window_bounds = array<i64: 1, 1, 128>}, {transform_indices = @transform_4, window_bounds = array<i64: 1, 1, 128>}, {transform_indices = @transform_5, window_bounds = array<i64: 1, 128, 384>}, {transform_indices = @transform_6, window_bounds = array<i64: 1, 128, 128>}, {transform_indices = @transform_7, window_bounds = array<i64: 1, 1, 128>}, {transform_indices = @transform_8, window_bounds = array<i64: 1, 1, 128>}, {transform_indices = @transform_9, window_bounds = array<i64: 1, 1, 128>}, {transform_indices = @transform_10, window_bounds = array<i64: 1, 128, 1024>}, {transform_indices = @transform_11, window_bounds = array<i64: 1, 1, 1024>}, {transform_indices = @transform_12, window_bounds = array<i64: 1, 512, 128>}, {transform_indices = @transform_13, window_bounds = array<i64: 1, 1, 128>}, {transform_indices = @transform_14, window_bounds = array<i64: 2, 9, 128>}]} {
    %c0_i32 = arith.constant 0 : i32
    %0 = arith.cmpi eq, %arg1, %c0_i32 : i32
    %1 = arith.extui %0 : i1 to i32
    %c0_i32_0 = arith.constant 0 : i32
    %2 = arith.cmpi ne, %1, %c0_i32_0 : i32
    scf.if %2 {
      %c0_143 = arith.constant 0 : index
      %c0_144 = arith.constant 0 : index
      %c0_145 = arith.constant 0 : index
      %397 = vector.load %arg2[%c0_143, %c0_144, %c0_145] : memref<2x8x1xf32, #tpu.memory_space<vmem>>, vector<1x8x1xf32>
      %398 = vector.shape_cast %397 : vector<1x8x1xf32> to vector<8x1xf32>
      %c0_146 = arith.constant 0 : index
      %c0_147 = arith.constant 0 : index
      %399 = vector.load %arg3[%c0_146, %c0_147] : memref<8x128xf32, #tpu.memory_space<vmem>>, vector<8x128xf32>
      %400 = vector.broadcast %398 : vector<8x1xf32> to vector<8x128xf32>
      %401 = arith.mulf %400, %399 : vector<8x128xf32>
      %c0_148 = arith.constant 0 : index
      %c0_149 = arith.constant 0 : index
      %402 = vector.load %arg4[%c0_148, %c0_149] : memref<8x128xf32, #tpu.memory_space<vmem>>, vector<8x128xf32>
      %403 = arith.addf %401, %402 : vector<8x128xf32>
      %cst_150 = arith.constant dense<0.000000e+00> : vector<128xf32>
      %404 = vector.multi_reduction <add>, %403, %cst_150 [0] : vector<8x128xf32> to vector<128xf32>
      %405 = vector.shape_cast %404 : vector<128xf32> to vector<1x128xf32>
      %cst_151 = arith.constant 1.250000e-01 : f32
      %406 = vector.broadcast %cst_151 : f32 to vector<1x128xf32>
      %407 = arith.mulf %405, %406 : vector<1x128xf32>
      %408 = tpu.concatenate %407, %403 in 0 : vector<1x128xf32>, vector<8x128xf32> -> vector<9x128xf32>
      %c0_152 = arith.constant 0 : index
      %c0_153 = arith.constant 0 : index
      %c0_154 = arith.constant 0 : index
      %409 = vector.load %arg16[%c0_152, %c0_153, %c0_154] : memref<2x9x128xf32, #tpu.memory_space<vmem>>, vector<1x9x128xf32>
      %410 = vector.shape_cast %409 : vector<1x9x128xf32> to vector<9x128xf32>
      %411 = vector.shape_cast %408 : vector<9x128xf32> to vector<1x9x128xf32>
      tpu.vector_store %arg16[%c0_152, %c0_153, %c0_154], %411 {strides = array<i32>} : memref<2x9x128xf32, #tpu.memory_space<vmem>>, vector<1x9x128xf32>,
      %c1_155 = arith.constant 1 : index
      %c0_156 = arith.constant 0 : index
      %c0_157 = arith.constant 0 : index
      %412 = vector.load %arg2[%c1_155, %c0_156, %c0_157] : memref<2x8x1xf32, #tpu.memory_space<vmem>>, vector<1x8x1xf32>
      %413 = vector.shape_cast %412 : vector<1x8x1xf32> to vector<8x1xf32>
      %c0_158 = arith.constant 0 : index
      %c0_159 = arith.constant 0 : index
      %414 = vector.load %arg3[%c0_158, %c0_159] : memref<8x128xf32, #tpu.memory_space<vmem>>, vector<8x128xf32>
      %415 = vector.broadcast %413 : vector<8x1xf32> to vector<8x128xf32>
      %416 = arith.mulf %415, %414 : vector<8x128xf32>
      %c0_160 = arith.constant 0 : index
      %c0_161 = arith.constant 0 : index
      %417 = vector.load %arg4[%c0_160, %c0_161] : memref<8x128xf32, #tpu.memory_space<vmem>>, vector<8x128xf32>
      %418 = arith.addf %416, %417 : vector<8x128xf32>
      %cst_162 = arith.constant dense<0.000000e+00> : vector<128xf32>
      %419 = vector.multi_reduction <add>, %418, %cst_162 [0] : vector<8x128xf32> to vector<128xf32>
      %420 = vector.shape_cast %419 : vector<128xf32> to vector<1x128xf32>
      %cst_163 = arith.constant 1.250000e-01 : f32
      %421 = vector.broadcast %cst_163 : f32 to vector<1x128xf32>
      %422 = arith.mulf %420, %421 : vector<1x128xf32>
      %423 = tpu.concatenate %422, %418 in 0 : vector<1x128xf32>, vector<8x128xf32> -> vector<9x128xf32>
      %c1_164 = arith.constant 1 : index
      %c0_165 = arith.constant 0 : index
      %c0_166 = arith.constant 0 : index
      %424 = vector.load %arg16[%c1_164, %c0_165, %c0_166] : memref<2x9x128xf32, #tpu.memory_space<vmem>>, vector<1x9x128xf32>
      %425 = vector.shape_cast %424 : vector<1x9x128xf32> to vector<9x128xf32>
      %426 = vector.shape_cast %423 : vector<9x128xf32> to vector<1x9x128xf32>
      tpu.vector_store %arg16[%c1_164, %c0_165, %c0_166], %426 {strides = array<i32>} : memref<2x9x128xf32, #tpu.memory_space<vmem>>, vector<1x9x128xf32>,
    } else {
    }
    %c0 = arith.constant 0 : index
    %c0_1 = arith.constant 0 : index
    %c0_2 = arith.constant 0 : index
    %3 = vector.load %arg7[%c0, %c0_1, %c0_2] : memref<1x128x384xf32, #tpu.memory_space<vmem>>, vector<1x128x384xf32>
    %4 = vector.shape_cast %3 : vector<1x128x384xf32> to vector<128x384xf32>
    %c0_3 = arith.constant 0 : index
    %c0_4 = arith.constant 0 : index
    %c0_5 = arith.constant 0 : index
    %5 = vector.load %arg8[%c0_3, %c0_4, %c0_5] : memref<1x128x128xf32, #tpu.memory_space<vmem>>, vector<1x128x128xf32>
    %6 = vector.shape_cast %5 : vector<1x128x128xf32> to vector<128x128xf32>
    %c0_6 = arith.constant 0 : index
    %c0_7 = arith.constant 0 : index
    %c0_8 = arith.constant 0 : index
    %7 = vector.load %arg12[%c0_6, %c0_7, %c0_8] : memref<1x128x1024xf32, #tpu.memory_space<vmem>>, vector<1x128x1024xf32>
    %8 = vector.shape_cast %7 : vector<1x128x1024xf32> to vector<128x1024xf32>
    %c0_9 = arith.constant 0 : index
    %c0_10 = arith.constant 0 : index
    %c0_11 = arith.constant 0 : index
    %9 = vector.load %arg14[%c0_9, %c0_10, %c0_11] : memref<1x512x128xf32, #tpu.memory_space<vmem>>, vector<1x512x128xf32>
    %10 = vector.shape_cast %9 : vector<1x512x128xf32> to vector<512x128xf32>
    %c0_12 = arith.constant 0 : index
    %c0_13 = arith.constant 0 : index
    %c0_14 = arith.constant 0 : index
    %11 = vector.load %arg5[%c0_12, %c0_13, %c0_14] : memref<1x1x128xf32, #tpu.memory_space<vmem>>, vector<1x1x128xf32>
    %12 = vector.shape_cast %11 : vector<1x1x128xf32> to vector<1x128xf32>
    %c0_15 = arith.constant 0 : index
    %c0_16 = arith.constant 0 : index
    %c0_17 = arith.constant 0 : index
    %13 = vector.load %arg6[%c0_15, %c0_16, %c0_17] : memref<1x1x128xf32, #tpu.memory_space<vmem>>, vector<1x1x128xf32>
    %14 = vector.shape_cast %13 : vector<1x1x128xf32> to vector<1x128xf32>
    %c0_18 = arith.constant 0 : index
    %c0_19 = arith.constant 0 : index
    %c0_20 = arith.constant 0 : index
    %15 = vector.load %arg10[%c0_18, %c0_19, %c0_20] : memref<1x1x128xf32, #tpu.memory_space<vmem>>, vector<1x1x128xf32>
    %16 = vector.shape_cast %15 : vector<1x1x128xf32> to vector<1x128xf32>
    %c0_21 = arith.constant 0 : index
    %c0_22 = arith.constant 0 : index
    %c0_23 = arith.constant 0 : index
    %17 = vector.load %arg11[%c0_21, %c0_22, %c0_23] : memref<1x1x128xf32, #tpu.memory_space<vmem>>, vector<1x1x128xf32>
    %18 = vector.shape_cast %17 : vector<1x1x128xf32> to vector<1x128xf32>
    %c0_24 = arith.constant 0 : index
    %c0_25 = arith.constant 0 : index
    %c0_26 = arith.constant 0 : index
    %19 = vector.load %arg9[%c0_24, %c0_25, %c0_26] : memref<1x1x128xf32, #tpu.memory_space<vmem>>, vector<1x1x128xf32>
    %20 = vector.shape_cast %19 : vector<1x1x128xf32> to vector<1x128xf32>
    %c0_27 = arith.constant 0 : index
    %c0_28 = arith.constant 0 : index
    %c0_29 = arith.constant 0 : index
    %21 = vector.load %arg13[%c0_27, %c0_28, %c0_29] : memref<1x1x1024xf32, #tpu.memory_space<vmem>>, vector<1x1x1024xf32>
    %22 = vector.shape_cast %21 : vector<1x1x1024xf32> to vector<1x1024xf32>
    %c0_30 = arith.constant 0 : index
    %c0_31 = arith.constant 0 : index
    %c0_32 = arith.constant 0 : index
    %23 = vector.load %arg15[%c0_30, %c0_31, %c0_32] : memref<1x1x128xf32, #tpu.memory_space<vmem>>, vector<1x1x128xf32>
    %24 = vector.shape_cast %23 : vector<1x1x128xf32> to vector<1x128xf32>
    %c0_33 = arith.constant 0 : index
    %c0_34 = arith.constant 0 : index
    %c0_35 = arith.constant 0 : index
    %25 = vector.load %arg16[%c0_33, %c0_34, %c0_35] : memref<2x9x128xf32, #tpu.memory_space<vmem>>, vector<1x9x128xf32>
    %26 = vector.shape_cast %25 : vector<1x9x128xf32> to vector<9x128xf32>
    %cst = arith.constant dense<0.000000e+00> : vector<9xf32>
    %27 = vector.multi_reduction <add>, %26, %cst [1] : vector<9x128xf32> to vector<9xf32>
    %28 = vector.shape_cast %27 : vector<9xf32> to vector<9x1xf32>
    %cst_36 = arith.constant 1.280000e+02 : f32
    %29 = vector.broadcast %cst_36 : f32 to vector<9x1xf32>
    %30 = arith.divf %28, %29 : vector<9x1xf32>
    %31 = vector.broadcast %30 : vector<9x1xf32> to vector<9x128xf32>
    %32 = arith.subf %26, %31 : vector<9x128xf32>
    %33 = arith.mulf %32, %32 : vector<9x128xf32>
    %cst_37 = arith.constant dense<0.000000e+00> : vector<9xf32>
    %34 = vector.multi_reduction <add>, %33, %cst_37 [1] : vector<9x128xf32> to vector<9xf32>
    %35 = vector.shape_cast %34 : vector<9xf32> to vector<9x1xf32>
    %cst_38 = arith.constant 1.280000e+02 : f32
    %36 = vector.broadcast %cst_38 : f32 to vector<9x1xf32>
    %37 = arith.divf %35, %36 : vector<9x1xf32>
    %cst_39 = arith.constant 9.99999974E-6 : f32
    %38 = vector.broadcast %cst_39 : f32 to vector<9x1xf32>
    %39 = arith.addf %37, %38 : vector<9x1xf32>
    %40 = math.rsqrt %39 : vector<9x1xf32>
    %41 = vector.broadcast %40 : vector<9x1xf32> to vector<9x128xf32>
    %42 = arith.mulf %32, %41 : vector<9x128xf32>
    %43 = vector.broadcast %12 : vector<1x128xf32> to vector<9x128xf32>
    %44 = arith.mulf %42, %43 : vector<9x128xf32>
    %45 = vector.broadcast %14 : vector<1x128xf32> to vector<9x128xf32>
    %46 = arith.addf %44, %45 : vector<9x128xf32>
    %cst_40 = arith.constant dense<0.000000e+00> : vector<9x384xf32>
    %47 = tpu.matmul %46, %4, %cst_40 {dimension_numbers = #tpu.dot_dimension_numbers<[1], [0], [0], [1], [0, 0, 1, 1], [], []>} : vector<9x128xf32>, vector<128x384xf32>, vector<9x384xf32> -> vector<9x384xf32>
    %48 = vector.extract_strided_slice %47 {offsets = [0, 0], sizes = [9, 16], strides = [1, 1]} : vector<9x384xf32> to vector<9x16xf32>
    %49 = vector.extract_strided_slice %47 {offsets = [0, 128], sizes = [9, 16], strides = [1, 1]} : vector<9x384xf32> to vector<9x16xf32>
    %50 = vector.extract_strided_slice %47 {offsets = [0, 256], sizes = [9, 16], strides = [1, 1]} : vector<9x384xf32> to vector<9x16xf32>
    %cst_41 = arith.constant dense<0.000000e+00> : vector<9x9xf32>
    %51 = tpu.matmul %48, %49, %cst_41 {dimension_numbers = #tpu.dot_dimension_numbers<[1], [1], [0], [0], [0, 0, 1, 0], [], []>} : vector<9x16xf32>, vector<9x16xf32>, vector<9x9xf32> -> vector<9x9xf32>
    %cst_42 = arith.constant dense<0xFF800000> : vector<9xf32>
    %52 = vector.multi_reduction <maximumf>, %51, %cst_42 [1] : vector<9x9xf32> to vector<9xf32>
    %53 = vector.shape_cast %52 : vector<9xf32> to vector<9x1xf32>
    %54 = vector.broadcast %53 : vector<9x1xf32> to vector<9x9xf32>
    %55 = arith.subf %51, %54 : vector<9x9xf32>
    %56 = math.exp %55 : vector<9x9xf32>
    %cst_43 = arith.constant dense<0.000000e+00> : vector<9xf32>
    %57 = vector.multi_reduction <add>, %56, %cst_43 [1] : vector<9x9xf32> to vector<9xf32>
    %58 = vector.shape_cast %57 : vector<9xf32> to vector<9x1xf32>
    %59 = vector.broadcast %58 : vector<9x1xf32> to vector<9x9xf32>
    %60 = arith.divf %56, %59 : vector<9x9xf32>
    %cst_44 = arith.constant dense<0.000000e+00> : vector<9x16xf32>
    %61 = tpu.matmul %60, %50, %cst_44 {dimension_numbers = #tpu.dot_dimension_numbers<[1], [0], [0], [1], [0, 0, 1, 1], [], []>} : vector<9x9xf32>, vector<9x16xf32>, vector<9x16xf32> -> vector<9x16xf32>
    %62 = vector.extract_strided_slice %47 {offsets = [0, 16], sizes = [9, 16], strides = [1, 1]} : vector<9x384xf32> to vector<9x16xf32>
    %63 = vector.extract_strided_slice %47 {offsets = [0, 144], sizes = [9, 16], strides = [1, 1]} : vector<9x384xf32> to vector<9x16xf32>
    %64 = vector.extract_strided_slice %47 {offsets = [0, 272], sizes = [9, 16], strides = [1, 1]} : vector<9x384xf32> to vector<9x16xf32>
    %cst_45 = arith.constant dense<0.000000e+00> : vector<9x9xf32>
    %65 = tpu.matmul %62, %63, %cst_45 {dimension_numbers = #tpu.dot_dimension_numbers<[1], [1], [0], [0], [0, 0, 1, 0], [], []>} : vector<9x16xf32>, vector<9x16xf32>, vector<9x9xf32> -> vector<9x9xf32>
    %cst_46 = arith.constant dense<0xFF800000> : vector<9xf32>
    %66 = vector.multi_reduction <maximumf>, %65, %cst_46 [1] : vector<9x9xf32> to vector<9xf32>
    %67 = vector.shape_cast %66 : vector<9xf32> to vector<9x1xf32>
    %68 = vector.broadcast %67 : vector<9x1xf32> to vector<9x9xf32>
    %69 = arith.subf %65, %68 : vector<9x9xf32>
    %70 = math.exp %69 : vector<9x9xf32>
    %cst_47 = arith.constant dense<0.000000e+00> : vector<9xf32>
    %71 = vector.multi_reduction <add>, %70, %cst_47 [1] : vector<9x9xf32> to vector<9xf32>
    %72 = vector.shape_cast %71 : vector<9xf32> to vector<9x1xf32>
    %73 = vector.broadcast %72 : vector<9x1xf32> to vector<9x9xf32>
    %74 = arith.divf %70, %73 : vector<9x9xf32>
    %cst_48 = arith.constant dense<0.000000e+00> : vector<9x16xf32>
    %75 = tpu.matmul %74, %64, %cst_48 {dimension_numbers = #tpu.dot_dimension_numbers<[1], [0], [0], [1], [0, 0, 1, 1], [], []>} : vector<9x9xf32>, vector<9x16xf32>, vector<9x16xf32> -> vector<9x16xf32>
    %76 = vector.extract_strided_slice %47 {offsets = [0, 32], sizes = [9, 16], strides = [1, 1]} : vector<9x384xf32> to vector<9x16xf32>
    %77 = vector.extract_strided_slice %47 {offsets = [0, 160], sizes = [9, 16], strides = [1, 1]} : vector<9x384xf32> to vector<9x16xf32>
    %78 = vector.extract_strided_slice %47 {offsets = [0, 288], sizes = [9, 16], strides = [1, 1]} : vector<9x384xf32> to vector<9x16xf32>
    %cst_49 = arith.constant dense<0.000000e+00> : vector<9x9xf32>
    %79 = tpu.matmul %76, %77, %cst_49 {dimension_numbers = #tpu.dot_dimension_numbers<[1], [1], [0], [0], [0, 0, 1, 0], [], []>} : vector<9x16xf32>, vector<9x16xf32>, vector<9x9xf32> -> vector<9x9xf32>
    %cst_50 = arith.constant dense<0xFF800000> : vector<9xf32>
    %80 = vector.multi_reduction <maximumf>, %79, %cst_50 [1] : vector<9x9xf32> to vector<9xf32>
    %81 = vector.shape_cast %80 : vector<9xf32> to vector<9x1xf32>
    %82 = vector.broadcast %81 : vector<9x1xf32> to vector<9x9xf32>
    %83 = arith.subf %79, %82 : vector<9x9xf32>
    %84 = math.exp %83 : vector<9x9xf32>
    %cst_51 = arith.constant dense<0.000000e+00> : vector<9xf32>
    %85 = vector.multi_reduction <add>, %84, %cst_51 [1] : vector<9x9xf32> to vector<9xf32>
    %86 = vector.shape_cast %85 : vector<9xf32> to vector<9x1xf32>
    %87 = vector.broadcast %86 : vector<9x1xf32> to vector<9x9xf32>
    %88 = arith.divf %84, %87 : vector<9x9xf32>
    %cst_52 = arith.constant dense<0.000000e+00> : vector<9x16xf32>
    %89 = tpu.matmul %88, %78, %cst_52 {dimension_numbers = #tpu.dot_dimension_numbers<[1], [0], [0], [1], [0, 0, 1, 1], [], []>} : vector<9x9xf32>, vector<9x16xf32>, vector<9x16xf32> -> vector<9x16xf32>
    %90 = vector.extract_strided_slice %47 {offsets = [0, 48], sizes = [9, 16], strides = [1, 1]} : vector<9x384xf32> to vector<9x16xf32>
    %91 = vector.extract_strided_slice %47 {offsets = [0, 176], sizes = [9, 16], strides = [1, 1]} : vector<9x384xf32> to vector<9x16xf32>
    %92 = vector.extract_strided_slice %47 {offsets = [0, 304], sizes = [9, 16], strides = [1, 1]} : vector<9x384xf32> to vector<9x16xf32>
    %cst_53 = arith.constant dense<0.000000e+00> : vector<9x9xf32>
    %93 = tpu.matmul %90, %91, %cst_53 {dimension_numbers = #tpu.dot_dimension_numbers<[1], [1], [0], [0], [0, 0, 1, 0], [], []>} : vector<9x16xf32>, vector<9x16xf32>, vector<9x9xf32> -> vector<9x9xf32>
    %cst_54 = arith.constant dense<0xFF800000> : vector<9xf32>
    %94 = vector.multi_reduction <maximumf>, %93, %cst_54 [1] : vector<9x9xf32> to vector<9xf32>
    %95 = vector.shape_cast %94 : vector<9xf32> to vector<9x1xf32>
    %96 = vector.broadcast %95 : vector<9x1xf32> to vector<9x9xf32>
    %97 = arith.subf %93, %96 : vector<9x9xf32>
    %98 = math.exp %97 : vector<9x9xf32>
    %cst_55 = arith.constant dense<0.000000e+00> : vector<9xf32>
    %99 = vector.multi_reduction <add>, %98, %cst_55 [1] : vector<9x9xf32> to vector<9xf32>
    %100 = vector.shape_cast %99 : vector<9xf32> to vector<9x1xf32>
    %101 = vector.broadcast %100 : vector<9x1xf32> to vector<9x9xf32>
    %102 = arith.divf %98, %101 : vector<9x9xf32>
    %cst_56 = arith.constant dense<0.000000e+00> : vector<9x16xf32>
    %103 = tpu.matmul %102, %92, %cst_56 {dimension_numbers = #tpu.dot_dimension_numbers<[1], [0], [0], [1], [0, 0, 1, 1], [], []>} : vector<9x9xf32>, vector<9x16xf32>, vector<9x16xf32> -> vector<9x16xf32>
    %104 = vector.extract_strided_slice %47 {offsets = [0, 64], sizes = [9, 16], strides = [1, 1]} : vector<9x384xf32> to vector<9x16xf32>
    %105 = vector.extract_strided_slice %47 {offsets = [0, 192], sizes = [9, 16], strides = [1, 1]} : vector<9x384xf32> to vector<9x16xf32>
    %106 = vector.extract_strided_slice %47 {offsets = [0, 320], sizes = [9, 16], strides = [1, 1]} : vector<9x384xf32> to vector<9x16xf32>
    %cst_57 = arith.constant dense<0.000000e+00> : vector<9x9xf32>
    %107 = tpu.matmul %104, %105, %cst_57 {dimension_numbers = #tpu.dot_dimension_numbers<[1], [1], [0], [0], [0, 0, 1, 0], [], []>} : vector<9x16xf32>, vector<9x16xf32>, vector<9x9xf32> -> vector<9x9xf32>
    %cst_58 = arith.constant dense<0xFF800000> : vector<9xf32>
    %108 = vector.multi_reduction <maximumf>, %107, %cst_58 [1] : vector<9x9xf32> to vector<9xf32>
    %109 = vector.shape_cast %108 : vector<9xf32> to vector<9x1xf32>
    %110 = vector.broadcast %109 : vector<9x1xf32> to vector<9x9xf32>
    %111 = arith.subf %107, %110 : vector<9x9xf32>
    %112 = math.exp %111 : vector<9x9xf32>
    %cst_59 = arith.constant dense<0.000000e+00> : vector<9xf32>
    %113 = vector.multi_reduction <add>, %112, %cst_59 [1] : vector<9x9xf32> to vector<9xf32>
    %114 = vector.shape_cast %113 : vector<9xf32> to vector<9x1xf32>
    %115 = vector.broadcast %114 : vector<9x1xf32> to vector<9x9xf32>
    %116 = arith.divf %112, %115 : vector<9x9xf32>
    %cst_60 = arith.constant dense<0.000000e+00> : vector<9x16xf32>
    %117 = tpu.matmul %116, %106, %cst_60 {dimension_numbers = #tpu.dot_dimension_numbers<[1], [0], [0], [1], [0, 0, 1, 1], [], []>} : vector<9x9xf32>, vector<9x16xf32>, vector<9x16xf32> -> vector<9x16xf32>
    %118 = vector.extract_strided_slice %47 {offsets = [0, 80], sizes = [9, 16], strides = [1, 1]} : vector<9x384xf32> to vector<9x16xf32>
    %119 = vector.extract_strided_slice %47 {offsets = [0, 208], sizes = [9, 16], strides = [1, 1]} : vector<9x384xf32> to vector<9x16xf32>
    %120 = vector.extract_strided_slice %47 {offsets = [0, 336], sizes = [9, 16], strides = [1, 1]} : vector<9x384xf32> to vector<9x16xf32>
    %cst_61 = arith.constant dense<0.000000e+00> : vector<9x9xf32>
    %121 = tpu.matmul %118, %119, %cst_61 {dimension_numbers = #tpu.dot_dimension_numbers<[1], [1], [0], [0], [0, 0, 1, 0], [], []>} : vector<9x16xf32>, vector<9x16xf32>, vector<9x9xf32> -> vector<9x9xf32>
    %cst_62 = arith.constant dense<0xFF800000> : vector<9xf32>
    %122 = vector.multi_reduction <maximumf>, %121, %cst_62 [1] : vector<9x9xf32> to vector<9xf32>
    %123 = vector.shape_cast %122 : vector<9xf32> to vector<9x1xf32>
    %124 = vector.broadcast %123 : vector<9x1xf32> to vector<9x9xf32>
    %125 = arith.subf %121, %124 : vector<9x9xf32>
    %126 = math.exp %125 : vector<9x9xf32>
    %cst_63 = arith.constant dense<0.000000e+00> : vector<9xf32>
    %127 = vector.multi_reduction <add>, %126, %cst_63 [1] : vector<9x9xf32> to vector<9xf32>
    %128 = vector.shape_cast %127 : vector<9xf32> to vector<9x1xf32>
    %129 = vector.broadcast %128 : vector<9x1xf32> to vector<9x9xf32>
    %130 = arith.divf %126, %129 : vector<9x9xf32>
    %cst_64 = arith.constant dense<0.000000e+00> : vector<9x16xf32>
    %131 = tpu.matmul %130, %120, %cst_64 {dimension_numbers = #tpu.dot_dimension_numbers<[1], [0], [0], [1], [0, 0, 1, 1], [], []>} : vector<9x9xf32>, vector<9x16xf32>, vector<9x16xf32> -> vector<9x16xf32>
    %132 = vector.extract_strided_slice %47 {offsets = [0, 96], sizes = [9, 16], strides = [1, 1]} : vector<9x384xf32> to vector<9x16xf32>
    %133 = vector.extract_strided_slice %47 {offsets = [0, 224], sizes = [9, 16], strides = [1, 1]} : vector<9x384xf32> to vector<9x16xf32>
    %134 = vector.extract_strided_slice %47 {offsets = [0, 352], sizes = [9, 16], strides = [1, 1]} : vector<9x384xf32> to vector<9x16xf32>
    %cst_65 = arith.constant dense<0.000000e+00> : vector<9x9xf32>
    %135 = tpu.matmul %132, %133, %cst_65 {dimension_numbers = #tpu.dot_dimension_numbers<[1], [1], [0], [0], [0, 0, 1, 0], [], []>} : vector<9x16xf32>, vector<9x16xf32>, vector<9x9xf32> -> vector<9x9xf32>
    %cst_66 = arith.constant dense<0xFF800000> : vector<9xf32>
    %136 = vector.multi_reduction <maximumf>, %135, %cst_66 [1] : vector<9x9xf32> to vector<9xf32>
    %137 = vector.shape_cast %136 : vector<9xf32> to vector<9x1xf32>
    %138 = vector.broadcast %137 : vector<9x1xf32> to vector<9x9xf32>
    %139 = arith.subf %135, %138 : vector<9x9xf32>
    %140 = math.exp %139 : vector<9x9xf32>
    %cst_67 = arith.constant dense<0.000000e+00> : vector<9xf32>
    %141 = vector.multi_reduction <add>, %140, %cst_67 [1] : vector<9x9xf32> to vector<9xf32>
    %142 = vector.shape_cast %141 : vector<9xf32> to vector<9x1xf32>
    %143 = vector.broadcast %142 : vector<9x1xf32> to vector<9x9xf32>
    %144 = arith.divf %140, %143 : vector<9x9xf32>
    %cst_68 = arith.constant dense<0.000000e+00> : vector<9x16xf32>
    %145 = tpu.matmul %144, %134, %cst_68 {dimension_numbers = #tpu.dot_dimension_numbers<[1], [0], [0], [1], [0, 0, 1, 1], [], []>} : vector<9x9xf32>, vector<9x16xf32>, vector<9x16xf32> -> vector<9x16xf32>
    %146 = vector.extract_strided_slice %47 {offsets = [0, 112], sizes = [9, 16], strides = [1, 1]} : vector<9x384xf32> to vector<9x16xf32>
    %147 = vector.extract_strided_slice %47 {offsets = [0, 240], sizes = [9, 16], strides = [1, 1]} : vector<9x384xf32> to vector<9x16xf32>
    %148 = vector.extract_strided_slice %47 {offsets = [0, 368], sizes = [9, 16], strides = [1, 1]} : vector<9x384xf32> to vector<9x16xf32>
    %cst_69 = arith.constant dense<0.000000e+00> : vector<9x9xf32>
    %149 = tpu.matmul %146, %147, %cst_69 {dimension_numbers = #tpu.dot_dimension_numbers<[1], [1], [0], [0], [0, 0, 1, 0], [], []>} : vector<9x16xf32>, vector<9x16xf32>, vector<9x9xf32> -> vector<9x9xf32>
    %cst_70 = arith.constant dense<0xFF800000> : vector<9xf32>
    %150 = vector.multi_reduction <maximumf>, %149, %cst_70 [1] : vector<9x9xf32> to vector<9xf32>
    %151 = vector.shape_cast %150 : vector<9xf32> to vector<9x1xf32>
    %152 = vector.broadcast %151 : vector<9x1xf32> to vector<9x9xf32>
    %153 = arith.subf %149, %152 : vector<9x9xf32>
    %154 = math.exp %153 : vector<9x9xf32>
    %cst_71 = arith.constant dense<0.000000e+00> : vector<9xf32>
    %155 = vector.multi_reduction <add>, %154, %cst_71 [1] : vector<9x9xf32> to vector<9xf32>
    %156 = vector.shape_cast %155 : vector<9xf32> to vector<9x1xf32>
    %157 = vector.broadcast %156 : vector<9x1xf32> to vector<9x9xf32>
    %158 = arith.divf %154, %157 : vector<9x9xf32>
    %cst_72 = arith.constant dense<0.000000e+00> : vector<9x16xf32>
    %159 = tpu.matmul %158, %148, %cst_72 {dimension_numbers = #tpu.dot_dimension_numbers<[1], [0], [0], [1], [0, 0, 1, 1], [], []>} : vector<9x9xf32>, vector<9x16xf32>, vector<9x16xf32> -> vector<9x16xf32>
    %160 = tpu.concatenate %61, %75, %89, %103, %117, %131, %145, %159 in 1 : vector<9x16xf32>, vector<9x16xf32>, vector<9x16xf32>, vector<9x16xf32>, vector<9x16xf32>, vector<9x16xf32>, vector<9x16xf32>, vector<9x16xf32> -> vector<9x128xf32>
    %cst_73 = arith.constant dense<0.000000e+00> : vector<9x128xf32>
    %161 = tpu.matmul %160, %6, %cst_73 {dimension_numbers = #tpu.dot_dimension_numbers<[1], [0], [0], [1], [0, 0, 1, 1], [], []>} : vector<9x128xf32>, vector<128x128xf32>, vector<9x128xf32> -> vector<9x128xf32>
    %162 = arith.addf %26, %161 : vector<9x128xf32>
    %163 = vector.broadcast %20 : vector<1x128xf32> to vector<9x128xf32>
    %164 = arith.addf %162, %163 : vector<9x128xf32>
    %cst_74 = arith.constant dense<0.000000e+00> : vector<9xf32>
    %165 = vector.multi_reduction <add>, %164, %cst_74 [1] : vector<9x128xf32> to vector<9xf32>
    %166 = vector.shape_cast %165 : vector<9xf32> to vector<9x1xf32>
    %cst_75 = arith.constant 1.280000e+02 : f32
    %167 = vector.broadcast %cst_75 : f32 to vector<9x1xf32>
    %168 = arith.divf %166, %167 : vector<9x1xf32>
    %169 = vector.broadcast %168 : vector<9x1xf32> to vector<9x128xf32>
    %170 = arith.subf %164, %169 : vector<9x128xf32>
    %171 = arith.mulf %170, %170 : vector<9x128xf32>
    %cst_76 = arith.constant dense<0.000000e+00> : vector<9xf32>
    %172 = vector.multi_reduction <add>, %171, %cst_76 [1] : vector<9x128xf32> to vector<9xf32>
    %173 = vector.shape_cast %172 : vector<9xf32> to vector<9x1xf32>
    %cst_77 = arith.constant 1.280000e+02 : f32
    %174 = vector.broadcast %cst_77 : f32 to vector<9x1xf32>
    %175 = arith.divf %173, %174 : vector<9x1xf32>
    %cst_78 = arith.constant 9.99999974E-6 : f32
    %176 = vector.broadcast %cst_78 : f32 to vector<9x1xf32>
    %177 = arith.addf %175, %176 : vector<9x1xf32>
    %178 = math.rsqrt %177 : vector<9x1xf32>
    %179 = vector.broadcast %178 : vector<9x1xf32> to vector<9x128xf32>
    %180 = arith.mulf %170, %179 : vector<9x128xf32>
    %181 = vector.broadcast %16 : vector<1x128xf32> to vector<9x128xf32>
    %182 = arith.mulf %180, %181 : vector<9x128xf32>
    %183 = vector.broadcast %18 : vector<1x128xf32> to vector<9x128xf32>
    %184 = arith.addf %182, %183 : vector<9x128xf32>
    %cst_79 = arith.constant dense<0.000000e+00> : vector<9x1024xf32>
    %185 = tpu.matmul %184, %8, %cst_79 {dimension_numbers = #tpu.dot_dimension_numbers<[1], [0], [0], [1], [0, 0, 1, 1], [], []>} : vector<9x128xf32>, vector<128x1024xf32>, vector<9x1024xf32> -> vector<9x1024xf32>
    %186 = vector.broadcast %22 : vector<1x1024xf32> to vector<9x1024xf32>
    %187 = arith.addf %185, %186 : vector<9x1024xf32>
    %188 = vector.extract_strided_slice %187 {offsets = [0, 0], sizes = [9, 512], strides = [1, 1]} : vector<9x1024xf32> to vector<9x512xf32>
    %189 = vector.extract_strided_slice %187 {offsets = [0, 512], sizes = [9, 512], strides = [1, 1]} : vector<9x1024xf32> to vector<9x512xf32>
    %cst_80 = arith.constant 5.000000e-01 : f32
    %190 = vector.broadcast %cst_80 : f32 to vector<9x512xf32>
    %191 = arith.mulf %190, %189 : vector<9x512xf32>
    %cst_81 = arith.constant 4.471500e-02 : f32
    %192 = vector.broadcast %cst_81 : f32 to vector<9x512xf32>
    %193 = arith.mulf %192, %189 : vector<9x512xf32>
    %194 = arith.mulf %193, %189 : vector<9x512xf32>
    %195 = arith.mulf %194, %189 : vector<9x512xf32>
    %196 = arith.addf %189, %195 : vector<9x512xf32>
    %cst_82 = arith.constant 0.797884583 : f32
    %197 = vector.broadcast %cst_82 : f32 to vector<9x512xf32>
    %198 = arith.mulf %197, %196 : vector<9x512xf32>
    %199 = math.tanh %198 : vector<9x512xf32>
    %cst_83 = arith.constant 1.000000e+00 : f32
    %200 = vector.broadcast %cst_83 : f32 to vector<9x512xf32>
    %201 = arith.addf %200, %199 : vector<9x512xf32>
    %202 = arith.mulf %191, %201 : vector<9x512xf32>
    %203 = arith.mulf %188, %202 : vector<9x512xf32>
    %cst_84 = arith.constant dense<0.000000e+00> : vector<9x128xf32>
    %204 = tpu.matmul %203, %10, %cst_84 {dimension_numbers = #tpu.dot_dimension_numbers<[1], [0], [0], [1], [0, 0, 1, 1], [], []>} : vector<9x512xf32>, vector<512x128xf32>, vector<9x128xf32> -> vector<9x128xf32>
    %205 = arith.addf %164, %204 : vector<9x128xf32>
    %206 = vector.broadcast %24 : vector<1x128xf32> to vector<9x128xf32>
    %207 = arith.addf %205, %206 : vector<9x128xf32>
    %c0_85 = arith.constant 0 : index
    %c0_86 = arith.constant 0 : index
    %c0_87 = arith.constant 0 : index
    %208 = vector.load %arg16[%c0_85, %c0_86, %c0_87] : memref<2x9x128xf32, #tpu.memory_space<vmem>>, vector<1x9x128xf32>
    %209 = vector.shape_cast %208 : vector<1x9x128xf32> to vector<9x128xf32>
    %210 = vector.shape_cast %207 : vector<9x128xf32> to vector<1x9x128xf32>
    tpu.vector_store %arg16[%c0_85, %c0_86, %c0_87], %210 {strides = array<i32>} : memref<2x9x128xf32, #tpu.memory_space<vmem>>, vector<1x9x128xf32>,
    %c1 = arith.constant 1 : index
    %c0_88 = arith.constant 0 : index
    %c0_89 = arith.constant 0 : index
    %211 = vector.load %arg16[%c1, %c0_88, %c0_89] : memref<2x9x128xf32, #tpu.memory_space<vmem>>, vector<1x9x128xf32>
    %212 = vector.shape_cast %211 : vector<1x9x128xf32> to vector<9x128xf32>
    %cst_90 = arith.constant dense<0.000000e+00> : vector<9xf32>
    %213 = vector.multi_reduction <add>, %212, %cst_90 [1] : vector<9x128xf32> to vector<9xf32>
    %214 = vector.shape_cast %213 : vector<9xf32> to vector<9x1xf32>
    %cst_91 = arith.constant 1.280000e+02 : f32
    %215 = vector.broadcast %cst_91 : f32 to vector<9x1xf32>
    %216 = arith.divf %214, %215 : vector<9x1xf32>
    %217 = vector.broadcast %216 : vector<9x1xf32> to vector<9x128xf32>
    %218 = arith.subf %212, %217 : vector<9x128xf32>
    %219 = arith.mulf %218, %218 : vector<9x128xf32>
    %cst_92 = arith.constant dense<0.000000e+00> : vector<9xf32>
    %220 = vector.multi_reduction <add>, %219, %cst_92 [1] : vector<9x128xf32> to vector<9xf32>
    %221 = vector.shape_cast %220 : vector<9xf32> to vector<9x1xf32>
    %cst_93 = arith.constant 1.280000e+02 : f32
    %222 = vector.broadcast %cst_93 : f32 to vector<9x1xf32>
    %223 = arith.divf %221, %222 : vector<9x1xf32>
    %cst_94 = arith.constant 9.99999974E-6 : f32
    %224 = vector.broadcast %cst_94 : f32 to vector<9x1xf32>
    %225 = arith.addf %223, %224 : vector<9x1xf32>
    %226 = math.rsqrt %225 : vector<9x1xf32>
    %227 = vector.broadcast %226 : vector<9x1xf32> to vector<9x128xf32>
    %228 = arith.mulf %218, %227 : vector<9x128xf32>
    %229 = vector.broadcast %12 : vector<1x128xf32> to vector<9x128xf32>
    %230 = arith.mulf %228, %229 : vector<9x128xf32>
    %231 = vector.broadcast %14 : vector<1x128xf32> to vector<9x128xf32>
    %232 = arith.addf %230, %231 : vector<9x128xf32>
    %cst_95 = arith.constant dense<0.000000e+00> : vector<9x384xf32>
    %233 = tpu.matmul %232, %4, %cst_95 {dimension_numbers = #tpu.dot_dimension_numbers<[1], [0], [0], [1], [0, 0, 1, 1], [], []>} : vector<9x128xf32>, vector<128x384xf32>, vector<9x384xf32> -> vector<9x384xf32>
    %234 = vector.extract_strided_slice %233 {offsets = [0, 0], sizes = [9, 16], strides = [1, 1]} : vector<9x384xf32> to vector<9x16xf32>
    %235 = vector.extract_strided_slice %233 {offsets = [0, 128], sizes = [9, 16], strides = [1, 1]} : vector<9x384xf32> to vector<9x16xf32>
    %236 = vector.extract_strided_slice %233 {offsets = [0, 256], sizes = [9, 16], strides = [1, 1]} : vector<9x384xf32> to vector<9x16xf32>
    %cst_96 = arith.constant dense<0.000000e+00> : vector<9x9xf32>
    %237 = tpu.matmul %234, %235, %cst_96 {dimension_numbers = #tpu.dot_dimension_numbers<[1], [1], [0], [0], [0, 0, 1, 0], [], []>} : vector<9x16xf32>, vector<9x16xf32>, vector<9x9xf32> -> vector<9x9xf32>
    %cst_97 = arith.constant dense<0xFF800000> : vector<9xf32>
    %238 = vector.multi_reduction <maximumf>, %237, %cst_97 [1] : vector<9x9xf32> to vector<9xf32>
    %239 = vector.shape_cast %238 : vector<9xf32> to vector<9x1xf32>
    %240 = vector.broadcast %239 : vector<9x1xf32> to vector<9x9xf32>
    %241 = arith.subf %237, %240 : vector<9x9xf32>
    %242 = math.exp %241 : vector<9x9xf32>
    %cst_98 = arith.constant dense<0.000000e+00> : vector<9xf32>
    %243 = vector.multi_reduction <add>, %242, %cst_98 [1] : vector<9x9xf32> to vector<9xf32>
    %244 = vector.shape_cast %243 : vector<9xf32> to vector<9x1xf32>
    %245 = vector.broadcast %244 : vector<9x1xf32> to vector<9x9xf32>
    %246 = arith.divf %242, %245 : vector<9x9xf32>
    %cst_99 = arith.constant dense<0.000000e+00> : vector<9x16xf32>
    %247 = tpu.matmul %246, %236, %cst_99 {dimension_numbers = #tpu.dot_dimension_numbers<[1], [0], [0], [1], [0, 0, 1, 1], [], []>} : vector<9x9xf32>, vector<9x16xf32>, vector<9x16xf32> -> vector<9x16xf32>
    %248 = vector.extract_strided_slice %233 {offsets = [0, 16], sizes = [9, 16], strides = [1, 1]} : vector<9x384xf32> to vector<9x16xf32>
    %249 = vector.extract_strided_slice %233 {offsets = [0, 144], sizes = [9, 16], strides = [1, 1]} : vector<9x384xf32> to vector<9x16xf32>
    %250 = vector.extract_strided_slice %233 {offsets = [0, 272], sizes = [9, 16], strides = [1, 1]} : vector<9x384xf32> to vector<9x16xf32>
    %cst_100 = arith.constant dense<0.000000e+00> : vector<9x9xf32>
    %251 = tpu.matmul %248, %249, %cst_100 {dimension_numbers = #tpu.dot_dimension_numbers<[1], [1], [0], [0], [0, 0, 1, 0], [], []>} : vector<9x16xf32>, vector<9x16xf32>, vector<9x9xf32> -> vector<9x9xf32>
    %cst_101 = arith.constant dense<0xFF800000> : vector<9xf32>
    %252 = vector.multi_reduction <maximumf>, %251, %cst_101 [1] : vector<9x9xf32> to vector<9xf32>
    %253 = vector.shape_cast %252 : vector<9xf32> to vector<9x1xf32>
    %254 = vector.broadcast %253 : vector<9x1xf32> to vector<9x9xf32>
    %255 = arith.subf %251, %254 : vector<9x9xf32>
    %256 = math.exp %255 : vector<9x9xf32>
    %cst_102 = arith.constant dense<0.000000e+00> : vector<9xf32>
    %257 = vector.multi_reduction <add>, %256, %cst_102 [1] : vector<9x9xf32> to vector<9xf32>
    %258 = vector.shape_cast %257 : vector<9xf32> to vector<9x1xf32>
    %259 = vector.broadcast %258 : vector<9x1xf32> to vector<9x9xf32>
    %260 = arith.divf %256, %259 : vector<9x9xf32>
    %cst_103 = arith.constant dense<0.000000e+00> : vector<9x16xf32>
    %261 = tpu.matmul %260, %250, %cst_103 {dimension_numbers = #tpu.dot_dimension_numbers<[1], [0], [0], [1], [0, 0, 1, 1], [], []>} : vector<9x9xf32>, vector<9x16xf32>, vector<9x16xf32> -> vector<9x16xf32>
    %262 = vector.extract_strided_slice %233 {offsets = [0, 32], sizes = [9, 16], strides = [1, 1]} : vector<9x384xf32> to vector<9x16xf32>
    %263 = vector.extract_strided_slice %233 {offsets = [0, 160], sizes = [9, 16], strides = [1, 1]} : vector<9x384xf32> to vector<9x16xf32>
    %264 = vector.extract_strided_slice %233 {offsets = [0, 288], sizes = [9, 16], strides = [1, 1]} : vector<9x384xf32> to vector<9x16xf32>
    %cst_104 = arith.constant dense<0.000000e+00> : vector<9x9xf32>
    %265 = tpu.matmul %262, %263, %cst_104 {dimension_numbers = #tpu.dot_dimension_numbers<[1], [1], [0], [0], [0, 0, 1, 0], [], []>} : vector<9x16xf32>, vector<9x16xf32>, vector<9x9xf32> -> vector<9x9xf32>
    %cst_105 = arith.constant dense<0xFF800000> : vector<9xf32>
    %266 = vector.multi_reduction <maximumf>, %265, %cst_105 [1] : vector<9x9xf32> to vector<9xf32>
    %267 = vector.shape_cast %266 : vector<9xf32> to vector<9x1xf32>
    %268 = vector.broadcast %267 : vector<9x1xf32> to vector<9x9xf32>
    %269 = arith.subf %265, %268 : vector<9x9xf32>
    %270 = math.exp %269 : vector<9x9xf32>
    %cst_106 = arith.constant dense<0.000000e+00> : vector<9xf32>
    %271 = vector.multi_reduction <add>, %270, %cst_106 [1] : vector<9x9xf32> to vector<9xf32>
    %272 = vector.shape_cast %271 : vector<9xf32> to vector<9x1xf32>
    %273 = vector.broadcast %272 : vector<9x1xf32> to vector<9x9xf32>
    %274 = arith.divf %270, %273 : vector<9x9xf32>
    %cst_107 = arith.constant dense<0.000000e+00> : vector<9x16xf32>
    %275 = tpu.matmul %274, %264, %cst_107 {dimension_numbers = #tpu.dot_dimension_numbers<[1], [0], [0], [1], [0, 0, 1, 1], [], []>} : vector<9x9xf32>, vector<9x16xf32>, vector<9x16xf32> -> vector<9x16xf32>
    %276 = vector.extract_strided_slice %233 {offsets = [0, 48], sizes = [9, 16], strides = [1, 1]} : vector<9x384xf32> to vector<9x16xf32>
    %277 = vector.extract_strided_slice %233 {offsets = [0, 176], sizes = [9, 16], strides = [1, 1]} : vector<9x384xf32> to vector<9x16xf32>
    %278 = vector.extract_strided_slice %233 {offsets = [0, 304], sizes = [9, 16], strides = [1, 1]} : vector<9x384xf32> to vector<9x16xf32>
    %cst_108 = arith.constant dense<0.000000e+00> : vector<9x9xf32>
    %279 = tpu.matmul %276, %277, %cst_108 {dimension_numbers = #tpu.dot_dimension_numbers<[1], [1], [0], [0], [0, 0, 1, 0], [], []>} : vector<9x16xf32>, vector<9x16xf32>, vector<9x9xf32> -> vector<9x9xf32>
    %cst_109 = arith.constant dense<0xFF800000> : vector<9xf32>
    %280 = vector.multi_reduction <maximumf>, %279, %cst_109 [1] : vector<9x9xf32> to vector<9xf32>
    %281 = vector.shape_cast %280 : vector<9xf32> to vector<9x1xf32>
    %282 = vector.broadcast %281 : vector<9x1xf32> to vector<9x9xf32>
    %283 = arith.subf %279, %282 : vector<9x9xf32>
    %284 = math.exp %283 : vector<9x9xf32>
    %cst_110 = arith.constant dense<0.000000e+00> : vector<9xf32>
    %285 = vector.multi_reduction <add>, %284, %cst_110 [1] : vector<9x9xf32> to vector<9xf32>
    %286 = vector.shape_cast %285 : vector<9xf32> to vector<9x1xf32>
    %287 = vector.broadcast %286 : vector<9x1xf32> to vector<9x9xf32>
    %288 = arith.divf %284, %287 : vector<9x9xf32>
    %cst_111 = arith.constant dense<0.000000e+00> : vector<9x16xf32>
    %289 = tpu.matmul %288, %278, %cst_111 {dimension_numbers = #tpu.dot_dimension_numbers<[1], [0], [0], [1], [0, 0, 1, 1], [], []>} : vector<9x9xf32>, vector<9x16xf32>, vector<9x16xf32> -> vector<9x16xf32>
    %290 = vector.extract_strided_slice %233 {offsets = [0, 64], sizes = [9, 16], strides = [1, 1]} : vector<9x384xf32> to vector<9x16xf32>
    %291 = vector.extract_strided_slice %233 {offsets = [0, 192], sizes = [9, 16], strides = [1, 1]} : vector<9x384xf32> to vector<9x16xf32>
    %292 = vector.extract_strided_slice %233 {offsets = [0, 320], sizes = [9, 16], strides = [1, 1]} : vector<9x384xf32> to vector<9x16xf32>
    %cst_112 = arith.constant dense<0.000000e+00> : vector<9x9xf32>
    %293 = tpu.matmul %290, %291, %cst_112 {dimension_numbers = #tpu.dot_dimension_numbers<[1], [1], [0], [0], [0, 0, 1, 0], [], []>} : vector<9x16xf32>, vector<9x16xf32>, vector<9x9xf32> -> vector<9x9xf32>
    %cst_113 = arith.constant dense<0xFF800000> : vector<9xf32>
    %294 = vector.multi_reduction <maximumf>, %293, %cst_113 [1] : vector<9x9xf32> to vector<9xf32>
    %295 = vector.shape_cast %294 : vector<9xf32> to vector<9x1xf32>
    %296 = vector.broadcast %295 : vector<9x1xf32> to vector<9x9xf32>
    %297 = arith.subf %293, %296 : vector<9x9xf32>
    %298 = math.exp %297 : vector<9x9xf32>
    %cst_114 = arith.constant dense<0.000000e+00> : vector<9xf32>
    %299 = vector.multi_reduction <add>, %298, %cst_114 [1] : vector<9x9xf32> to vector<9xf32>
    %300 = vector.shape_cast %299 : vector<9xf32> to vector<9x1xf32>
    %301 = vector.broadcast %300 : vector<9x1xf32> to vector<9x9xf32>
    %302 = arith.divf %298, %301 : vector<9x9xf32>
    %cst_115 = arith.constant dense<0.000000e+00> : vector<9x16xf32>
    %303 = tpu.matmul %302, %292, %cst_115 {dimension_numbers = #tpu.dot_dimension_numbers<[1], [0], [0], [1], [0, 0, 1, 1], [], []>} : vector<9x9xf32>, vector<9x16xf32>, vector<9x16xf32> -> vector<9x16xf32>
    %304 = vector.extract_strided_slice %233 {offsets = [0, 80], sizes = [9, 16], strides = [1, 1]} : vector<9x384xf32> to vector<9x16xf32>
    %305 = vector.extract_strided_slice %233 {offsets = [0, 208], sizes = [9, 16], strides = [1, 1]} : vector<9x384xf32> to vector<9x16xf32>
    %306 = vector.extract_strided_slice %233 {offsets = [0, 336], sizes = [9, 16], strides = [1, 1]} : vector<9x384xf32> to vector<9x16xf32>
    %cst_116 = arith.constant dense<0.000000e+00> : vector<9x9xf32>
    %307 = tpu.matmul %304, %305, %cst_116 {dimension_numbers = #tpu.dot_dimension_numbers<[1], [1], [0], [0], [0, 0, 1, 0], [], []>} : vector<9x16xf32>, vector<9x16xf32>, vector<9x9xf32> -> vector<9x9xf32>
    %cst_117 = arith.constant dense<0xFF800000> : vector<9xf32>
    %308 = vector.multi_reduction <maximumf>, %307, %cst_117 [1] : vector<9x9xf32> to vector<9xf32>
    %309 = vector.shape_cast %308 : vector<9xf32> to vector<9x1xf32>
    %310 = vector.broadcast %309 : vector<9x1xf32> to vector<9x9xf32>
    %311 = arith.subf %307, %310 : vector<9x9xf32>
    %312 = math.exp %311 : vector<9x9xf32>
    %cst_118 = arith.constant dense<0.000000e+00> : vector<9xf32>
    %313 = vector.multi_reduction <add>, %312, %cst_118 [1] : vector<9x9xf32> to vector<9xf32>
    %314 = vector.shape_cast %313 : vector<9xf32> to vector<9x1xf32>
    %315 = vector.broadcast %314 : vector<9x1xf32> to vector<9x9xf32>
    %316 = arith.divf %312, %315 : vector<9x9xf32>
    %cst_119 = arith.constant dense<0.000000e+00> : vector<9x16xf32>
    %317 = tpu.matmul %316, %306, %cst_119 {dimension_numbers = #tpu.dot_dimension_numbers<[1], [0], [0], [1], [0, 0, 1, 1], [], []>} : vector<9x9xf32>, vector<9x16xf32>, vector<9x16xf32> -> vector<9x16xf32>
    %318 = vector.extract_strided_slice %233 {offsets = [0, 96], sizes = [9, 16], strides = [1, 1]} : vector<9x384xf32> to vector<9x16xf32>
    %319 = vector.extract_strided_slice %233 {offsets = [0, 224], sizes = [9, 16], strides = [1, 1]} : vector<9x384xf32> to vector<9x16xf32>
    %320 = vector.extract_strided_slice %233 {offsets = [0, 352], sizes = [9, 16], strides = [1, 1]} : vector<9x384xf32> to vector<9x16xf32>
    %cst_120 = arith.constant dense<0.000000e+00> : vector<9x9xf32>
    %321 = tpu.matmul %318, %319, %cst_120 {dimension_numbers = #tpu.dot_dimension_numbers<[1], [1], [0], [0], [0, 0, 1, 0], [], []>} : vector<9x16xf32>, vector<9x16xf32>, vector<9x9xf32> -> vector<9x9xf32>
    %cst_121 = arith.constant dense<0xFF800000> : vector<9xf32>
    %322 = vector.multi_reduction <maximumf>, %321, %cst_121 [1] : vector<9x9xf32> to vector<9xf32>
    %323 = vector.shape_cast %322 : vector<9xf32> to vector<9x1xf32>
    %324 = vector.broadcast %323 : vector<9x1xf32> to vector<9x9xf32>
    %325 = arith.subf %321, %324 : vector<9x9xf32>
    %326 = math.exp %325 : vector<9x9xf32>
    %cst_122 = arith.constant dense<0.000000e+00> : vector<9xf32>
    %327 = vector.multi_reduction <add>, %326, %cst_122 [1] : vector<9x9xf32> to vector<9xf32>
    %328 = vector.shape_cast %327 : vector<9xf32> to vector<9x1xf32>
    %329 = vector.broadcast %328 : vector<9x1xf32> to vector<9x9xf32>
    %330 = arith.divf %326, %329 : vector<9x9xf32>
    %cst_123 = arith.constant dense<0.000000e+00> : vector<9x16xf32>
    %331 = tpu.matmul %330, %320, %cst_123 {dimension_numbers = #tpu.dot_dimension_numbers<[1], [0], [0], [1], [0, 0, 1, 1], [], []>} : vector<9x9xf32>, vector<9x16xf32>, vector<9x16xf32> -> vector<9x16xf32>
    %332 = vector.extract_strided_slice %233 {offsets = [0, 112], sizes = [9, 16], strides = [1, 1]} : vector<9x384xf32> to vector<9x16xf32>
    %333 = vector.extract_strided_slice %233 {offsets = [0, 240], sizes = [9, 16], strides = [1, 1]} : vector<9x384xf32> to vector<9x16xf32>
    %334 = vector.extract_strided_slice %233 {offsets = [0, 368], sizes = [9, 16], strides = [1, 1]} : vector<9x384xf32> to vector<9x16xf32>
    %cst_124 = arith.constant dense<0.000000e+00> : vector<9x9xf32>
    %335 = tpu.matmul %332, %333, %cst_124 {dimension_numbers = #tpu.dot_dimension_numbers<[1], [1], [0], [0], [0, 0, 1, 0], [], []>} : vector<9x16xf32>, vector<9x16xf32>, vector<9x9xf32> -> vector<9x9xf32>
    %cst_125 = arith.constant dense<0xFF800000> : vector<9xf32>
    %336 = vector.multi_reduction <maximumf>, %335, %cst_125 [1] : vector<9x9xf32> to vector<9xf32>
    %337 = vector.shape_cast %336 : vector<9xf32> to vector<9x1xf32>
    %338 = vector.broadcast %337 : vector<9x1xf32> to vector<9x9xf32>
    %339 = arith.subf %335, %338 : vector<9x9xf32>
    %340 = math.exp %339 : vector<9x9xf32>
    %cst_126 = arith.constant dense<0.000000e+00> : vector<9xf32>
    %341 = vector.multi_reduction <add>, %340, %cst_126 [1] : vector<9x9xf32> to vector<9xf32>
    %342 = vector.shape_cast %341 : vector<9xf32> to vector<9x1xf32>
    %343 = vector.broadcast %342 : vector<9x1xf32> to vector<9x9xf32>
    %344 = arith.divf %340, %343 : vector<9x9xf32>
    %cst_127 = arith.constant dense<0.000000e+00> : vector<9x16xf32>
    %345 = tpu.matmul %344, %334, %cst_127 {dimension_numbers = #tpu.dot_dimension_numbers<[1], [0], [0], [1], [0, 0, 1, 1], [], []>} : vector<9x9xf32>, vector<9x16xf32>, vector<9x16xf32> -> vector<9x16xf32>
    %346 = tpu.concatenate %247, %261, %275, %289, %303, %317, %331, %345 in 1 : vector<9x16xf32>, vector<9x16xf32>, vector<9x16xf32>, vector<9x16xf32>, vector<9x16xf32>, vector<9x16xf32>, vector<9x16xf32>, vector<9x16xf32> -> vector<9x128xf32>
    %cst_128 = arith.constant dense<0.000000e+00> : vector<9x128xf32>
    %347 = tpu.matmul %346, %6, %cst_128 {dimension_numbers = #tpu.dot_dimension_numbers<[1], [0], [0], [1], [0, 0, 1, 1], [], []>} : vector<9x128xf32>, vector<128x128xf32>, vector<9x128xf32> -> vector<9x128xf32>
    %348 = arith.addf %212, %347 : vector<9x128xf32>
    %349 = vector.broadcast %20 : vector<1x128xf32> to vector<9x128xf32>
    %350 = arith.addf %348, %349 : vector<9x128xf32>
    %cst_129 = arith.constant dense<0.000000e+00> : vector<9xf32>
    %351 = vector.multi_reduction <add>, %350, %cst_129 [1] : vector<9x128xf32> to vector<9xf32>
    %352 = vector.shape_cast %351 : vector<9xf32> to vector<9x1xf32>
    %cst_130 = arith.constant 1.280000e+02 : f32
    %353 = vector.broadcast %cst_130 : f32 to vector<9x1xf32>
    %354 = arith.divf %352, %353 : vector<9x1xf32>
    %355 = vector.broadcast %354 : vector<9x1xf32> to vector<9x128xf32>
    %356 = arith.subf %350, %355 : vector<9x128xf32>
    %357 = arith.mulf %356, %356 : vector<9x128xf32>
    %cst_131 = arith.constant dense<0.000000e+00> : vector<9xf32>
    %358 = vector.multi_reduction <add>, %357, %cst_131 [1] : vector<9x128xf32> to vector<9xf32>
    %359 = vector.shape_cast %358 : vector<9xf32> to vector<9x1xf32>
    %cst_132 = arith.constant 1.280000e+02 : f32
    %360 = vector.broadcast %cst_132 : f32 to vector<9x1xf32>
    %361 = arith.divf %359, %360 : vector<9x1xf32>
    %cst_133 = arith.constant 9.99999974E-6 : f32
    %362 = vector.broadcast %cst_133 : f32 to vector<9x1xf32>
    %363 = arith.addf %361, %362 : vector<9x1xf32>
    %364 = math.rsqrt %363 : vector<9x1xf32>
    %365 = vector.broadcast %364 : vector<9x1xf32> to vector<9x128xf32>
    %366 = arith.mulf %356, %365 : vector<9x128xf32>
    %367 = vector.broadcast %16 : vector<1x128xf32> to vector<9x128xf32>
    %368 = arith.mulf %366, %367 : vector<9x128xf32>
    %369 = vector.broadcast %18 : vector<1x128xf32> to vector<9x128xf32>
    %370 = arith.addf %368, %369 : vector<9x128xf32>
    %cst_134 = arith.constant dense<0.000000e+00> : vector<9x1024xf32>
    %371 = tpu.matmul %370, %8, %cst_134 {dimension_numbers = #tpu.dot_dimension_numbers<[1], [0], [0], [1], [0, 0, 1, 1], [], []>} : vector<9x128xf32>, vector<128x1024xf32>, vector<9x1024xf32> -> vector<9x1024xf32>
    %372 = vector.broadcast %22 : vector<1x1024xf32> to vector<9x1024xf32>
    %373 = arith.addf %371, %372 : vector<9x1024xf32>
    %374 = vector.extract_strided_slice %373 {offsets = [0, 0], sizes = [9, 512], strides = [1, 1]} : vector<9x1024xf32> to vector<9x512xf32>
    %375 = vector.extract_strided_slice %373 {offsets = [0, 512], sizes = [9, 512], strides = [1, 1]} : vector<9x1024xf32> to vector<9x512xf32>
    %cst_135 = arith.constant 5.000000e-01 : f32
    %376 = vector.broadcast %cst_135 : f32 to vector<9x512xf32>
    %377 = arith.mulf %376, %375 : vector<9x512xf32>
    %cst_136 = arith.constant 4.471500e-02 : f32
    %378 = vector.broadcast %cst_136 : f32 to vector<9x512xf32>
    %379 = arith.mulf %378, %375 : vector<9x512xf32>
    %380 = arith.mulf %379, %375 : vector<9x512xf32>
    %381 = arith.mulf %380, %375 : vector<9x512xf32>
    %382 = arith.addf %375, %381 : vector<9x512xf32>
    %cst_137 = arith.constant 0.797884583 : f32
    %383 = vector.broadcast %cst_137 : f32 to vector<9x512xf32>
    %384 = arith.mulf %383, %382 : vector<9x512xf32>
    %385 = math.tanh %384 : vector<9x512xf32>
    %cst_138 = arith.constant 1.000000e+00 : f32
    %386 = vector.broadcast %cst_138 : f32 to vector<9x512xf32>
    %387 = arith.addf %386, %385 : vector<9x512xf32>
    %388 = arith.mulf %377, %387 : vector<9x512xf32>
    %389 = arith.mulf %374, %388 : vector<9x512xf32>
    %cst_139 = arith.constant dense<0.000000e+00> : vector<9x128xf32>
    %390 = tpu.matmul %389, %10, %cst_139 {dimension_numbers = #tpu.dot_dimension_numbers<[1], [0], [0], [1], [0, 0, 1, 1], [], []>} : vector<9x512xf32>, vector<512x128xf32>, vector<9x128xf32> -> vector<9x128xf32>
    %391 = arith.addf %350, %390 : vector<9x128xf32>
    %392 = vector.broadcast %24 : vector<1x128xf32> to vector<9x128xf32>
    %393 = arith.addf %391, %392 : vector<9x128xf32>
    %c1_140 = arith.constant 1 : index
    %c0_141 = arith.constant 0 : index
    %c0_142 = arith.constant 0 : index
    %394 = vector.load %arg16[%c1_140, %c0_141, %c0_142] : memref<2x9x128xf32, #tpu.memory_space<vmem>>, vector<1x9x128xf32>
    %395 = vector.shape_cast %394 : vector<1x9x128xf32> to vector<9x128xf32>
    %396 = vector.shape_cast %393 : vector<9x128xf32> to vector<1x9x128xf32>
    tpu.vector_store %arg16[%c1_140, %c0_141, %c0_142], %396 {strides = array<i32>} : memref<2x9x128xf32, #tpu.memory_space<vmem>>, vector<1x9x128xf32>,
    return
  }
  func.func @transform_0(%arg0: i32, %arg1: i32) -> (i32, i32, i32) {
    %c0_i32 = arith.constant 0 : i32
    %c0_i32_0 = arith.constant 0 : i32
    %c0_i32_1 = arith.constant 0 : i32
    return %arg0, %c0_i32, %c0_i32_0 : i32, i32, i32
  }
  func.func @transform_1(%arg0: i32, %arg1: i32) -> (i32, i32) {
    %c0_i32 = arith.constant 0 : i32
    %c0_i32_0 = arith.constant 0 : i32
    %c0_i32_1 = arith.constant 0 : i32
    return %c0_i32, %c0_i32_0 : i32, i32
  }
  func.func @transform_2(%arg0: i32, %arg1: i32) -> (i32, i32) {
    %c0_i32 = arith.constant 0 : i32
    %c0_i32_0 = arith.constant 0 : i32
    %c0_i32_1 = arith.constant 0 : i32
    return %c0_i32, %c0_i32_0 : i32, i32
  }
  func.func @transform_3(%arg0: i32, %arg1: i32) -> (i32, i32, i32) {
    %c0_i32 = arith.constant 0 : i32
    %c0_i32_0 = arith.constant 0 : i32
    %c0_i32_1 = arith.constant 0 : i32
    return %arg1, %c0_i32, %c0_i32_0 : i32, i32, i32
  }
  func.func @transform_4(%arg0: i32, %arg1: i32) -> (i32, i32, i32) {
    %c0_i32 = arith.constant 0 : i32
    %c0_i32_0 = arith.constant 0 : i32
    %c0_i32_1 = arith.constant 0 : i32
    return %arg1, %c0_i32, %c0_i32_0 : i32, i32, i32
  }
  func.func @transform_5(%arg0: i32, %arg1: i32) -> (i32, i32, i32) {
    %c0_i32 = arith.constant 0 : i32
    %c0_i32_0 = arith.constant 0 : i32
    %c0_i32_1 = arith.constant 0 : i32
    return %arg1, %c0_i32, %c0_i32_0 : i32, i32, i32
  }
  func.func @transform_6(%arg0: i32, %arg1: i32) -> (i32, i32, i32) {
    %c0_i32 = arith.constant 0 : i32
    %c0_i32_0 = arith.constant 0 : i32
    %c0_i32_1 = arith.constant 0 : i32
    return %arg1, %c0_i32, %c0_i32_0 : i32, i32, i32
  }
  func.func @transform_7(%arg0: i32, %arg1: i32) -> (i32, i32, i32) {
    %c0_i32 = arith.constant 0 : i32
    %c0_i32_0 = arith.constant 0 : i32
    %c0_i32_1 = arith.constant 0 : i32
    return %arg1, %c0_i32, %c0_i32_0 : i32, i32, i32
  }
  func.func @transform_8(%arg0: i32, %arg1: i32) -> (i32, i32, i32) {
    %c0_i32 = arith.constant 0 : i32
    %c0_i32_0 = arith.constant 0 : i32
    %c0_i32_1 = arith.constant 0 : i32
    return %arg1, %c0_i32, %c0_i32_0 : i32, i32, i32
  }
  func.func @transform_9(%arg0: i32, %arg1: i32) -> (i32, i32, i32) {
    %c0_i32 = arith.constant 0 : i32
    %c0_i32_0 = arith.constant 0 : i32
    %c0_i32_1 = arith.constant 0 : i32
    return %arg1, %c0_i32, %c0_i32_0 : i32, i32, i32
  }
  func.func @transform_10(%arg0: i32, %arg1: i32) -> (i32, i32, i32) {
    %c0_i32 = arith.constant 0 : i32
    %c0_i32_0 = arith.constant 0 : i32
    %c0_i32_1 = arith.constant 0 : i32
    return %arg1, %c0_i32, %c0_i32_0 : i32, i32, i32
  }
  func.func @transform_11(%arg0: i32, %arg1: i32) -> (i32, i32, i32) {
    %c0_i32 = arith.constant 0 : i32
    %c0_i32_0 = arith.constant 0 : i32
    %c0_i32_1 = arith.constant 0 : i32
    return %arg1, %c0_i32, %c0_i32_0 : i32, i32, i32
  }
  func.func @transform_12(%arg0: i32, %arg1: i32) -> (i32, i32, i32) {
    %c0_i32 = arith.constant 0 : i32
    %c0_i32_0 = arith.constant 0 : i32
    %c0_i32_1 = arith.constant 0 : i32
    return %arg1, %c0_i32, %c0_i32_0 : i32, i32, i32
  }
  func.func @transform_13(%arg0: i32, %arg1: i32) -> (i32, i32, i32) {
    %c0_i32 = arith.constant 0 : i32
    %c0_i32_0 = arith.constant 0 : i32
    %c0_i32_1 = arith.constant 0 : i32
    return %arg1, %c0_i32, %c0_i32_0 : i32, i32, i32
  }
  func.func @transform_14(%arg0: i32, %arg1: i32) -> (i32, i32, i32) {
    %c0_i32 = arith.constant 0 : i32
    %c0_i32_0 = arith.constant 0 : i32
    %c0_i32_1 = arith.constant 0 : i32
    return %arg0, %c0_i32, %c0_i32_0 : i32, i32, i32
  }
}

</mosaic_0001>

<bundles_post_ra>
// kernel: tpu_custom_call.1
= control target key start
LH: loop header
LB: loop body
LE: loop exit
PB: predicated region body
PF: predicated region fallthrough
CT: control target
= control target key end

     0   :  { %s7386_s0 = inlined_call_operand.vmem [shape: f32[4,8,1], index: 0, kind: input, shape index: {}]   ;;  %s7387_s1 = inlined_call_operand.vmem [shape: f32[8,128], index: 1, kind: input, shape index: {}]   ;;  %s7388_s2 = inlined_call_operand.vmem [shape: f32[8,128], index: 2, kind: input, shape index: {}]   ;;  %s7389_s3 = inlined_call_operand.vmem [shape: f32[2,1,128], index: 3, kind: input, shape index: {}]   ;;  %s7390_s4 = inlined_call_operand.vmem [shape: f32[2,1,128], index: 4, kind: input, shape index: {}]   ;;  %s7391_s5 = inlined_call_operand.hbm [shape: f32[2,128,384], index: 5, kind: input, shape index: {}]   ;;  %s7392_s6 = inlined_call_operand.hbm [shape: f32[2,128,128], index: 6, kind: input, shape index: {}]   ;;  %s7393_s7 = inlined_call_operand.vmem [shape: f32[2,1,128], index: 7, kind: input, shape index: {}]   ;;  %s7394_s8 = inlined_call_operand.vmem [shape: f32[2,1,128], index: 8, kind: input, shape index: {}]   ;;  %s7395_s9 = inlined_call_operand.vmem [shape: f32[2,1,128], index: 9, kind: input, shape index: {}]   ;;  %s7396_s10 = inlined_call_operand.hbm [shape: f32[2,128,1024], index: 10, kind: input, shape index: {}]   ;;  %s7397_s11 = inlined_call_operand.vmem [shape: f32[2,1,1024], index: 11, kind: input, shape index: {}]   ;;  %s7398_s12 = inlined_call_operand.hbm [shape: f32[2,512,128], index: 12, kind: input, shape index: {}]   ;;  %s7399_s13 = inlined_call_operand.vmem [shape: f32[2,1,128], index: 13, kind: input, shape index: {}]   ;;  %s7400_s14 = inlined_call_operand.vmem [shape: f32[4,9,128], index: 14, kind: output, shape index: {}]  }
   0x1   :  { %7410 = sst [smem:[#allocation19_spill]] %s7386_s0 }
   0x2   :  { %7411 = sst [smem:[#allocation20_spill]] %s7387_s1 }
   0x3   :  { %7412 = sst [smem:[#allocation21_spill]] %s7388_s2 }
   0x4   :  { %7413 = sst [smem:[#allocation22_spill]] %s7389_s3 }
   0x5   :  { %7414 = sst [smem:[#allocation23_spill]] %s7390_s4 }
   0x6   :  { %7415 = sst [smem:[#allocation24_spill]] %s7391_s5 }
   0x7   :  { %7416 = sst [smem:[#allocation25_spill]] %s7392_s6 }
   0x8   :  { %7417 = sst [smem:[#allocation26_spill]] %s7393_s7 }
   0x9   :  { %7418 = sst [smem:[#allocation27_spill]] %s7394_s8 }
   0xa   :  { %7419 = sst [smem:[#allocation28_spill]] %s7395_s9 }
   0xb   :  { %7420 = sst [smem:[#allocation29_spill]] %s7396_s10 }
   0xc   :  { %7421 = sst [smem:[#allocation30_spill]] %s7397_s11 }
   0xd   :  { %7422 = sst [smem:[#allocation31_spill]] %s7398_s12 }
   0xe   :  { %7423 = sst [smem:[#allocation32_spill]] %s7399_s13 }
   0xf   :  { %7424 = sst [smem:[#allocation33_spill]] %s7400_s14 }
  0x10   :  { %19 = vsyncpa [#allocation3], 0 }
  0x11   :  { %21 = vsyncpa [#allocation3 + $0x1], 0 }
  0x12   :  { %22 = vsyncpa [#allocation5], 0 }
  0x13   :  { %24 = vsyncpa [#allocation5 + $0x1], 0 }
  0x14   :  { %25 = vsyncpa [#allocation8], 0 }
  0x15   :  { %27 = vsyncpa [#allocation8 + $0x1], 0  ;;  %s5574_s29 = smov 0   ;;  %s5576_s30 = smov 0  }
  0x16   :  { %s5578_s15 = smov 0   ;;  %s5580_s16 = smov 0  }
  0x17   :  { %s5582_s17 = smov 0   ;;  %s5584_s18 = smov 0  }
  0x18   :  { %s5586_s19 = smov 0   ;;  %s5588_s20 = smov 0  }
  0x19 LB: > { %7425 = sst [smem:[#allocation12_spill]] %s5458_s30  ;;  %s7402_s21 = sadd.s32 4294967295, %s5482_s20   ;;  %s5482_s20 = sphi %s5588_s20, %s33_s20   ;;  %s5478_s19 = sphi %s5586_s19, %s7461_s19   ;;  %s5474_s18 = sphi %s5584_s18, %s7460_s18   ;;  %s5470_s17 = sphi %s5582_s17, %s7459_s17   ;;  %s5466_s16 = sphi %s5580_s16, %s7458_s16   ;;  %s5462_s15 = sphi %s5578_s15, %s7457_s15   ;;  %s5458_s30 = sphi %s5576_s30, %s7456_s30   ;;  %s5454_s29 = sphi %s5574_s29, %s7455_s29  }
  0x1a   : > { %7426 = sst [smem:[#allocation13_spill]] %s5462_s15  ;;  %s42_s22 = sadd.s32 1, %s5474_s18 }
  0x1b   : > { %7427 = sst [smem:[#allocation14_spill]] %s5474_s18  ;;  %p43_p0 = scmp.ge.s32.totalorder %s42_s22, 2 }
  0x1c   : > { %7428 = sst [smem:[#allocation15_spill]] %s5478_s19  ;;  %s45_s23 = sadd.s32 1, %s5478_s19 }
  0x1d   : > { %s172_s24 = sadd.s32 1, %s5462_s15  ;;  %p179_p1 = scmp.ne.s32.totalorder %s5462_s15, %s5458_s30 }
  0x1e   : > { %s7463_s22 = smov (%p43_p0, %s42_s22), 0  ;;  %s7465_s23 = smov (!%p43_p0, %s45_s23), %s5478_s19 }
  0x1f   : > { %7429 = sst [smem:[#allocation16_spill]] %s7463_s22  ;;  %s169_s25 = ssub.s32 %s5474_s18, %s7463_s22 }
  0x20   : > { %p180_p2 = scmp.eq.s32.totalorder %s5482_s20, 0  ;;  %p47_p3 = scmp.ge.s32.totalorder %s7465_s23, 2 }
  0x21   : > { %p170_p4 = scmp.eq.s32.totalorder %s169_s25, 0  ;;  %p185_p6 = scmp.ne.s32.totalorder %s5458_s30, %s5454_s29 }
  0x22   : > { %p181_p5 = por %p180_p2, %p179_p1  ;;  %s7467_s23 = smov (%p47_p3, %s7465_s23), 0 }
  0x23   : > { %7430 = sst [smem:[#allocation17_spill]] %s7467_s23  ;;  %p186_p7 = scmp.eq.s32.totalorder %s7402_s21, 0 }
  0x24   : > { %s5628_s26 = scalar_select %p170_p4, %s5462_s15, %s172_s24  }
  0x25   : > { %p4717_p8 = scmp.lt.s32.totalorder %s5482_s20, 4  ;;  %s5634_s27 = sand.u32 1, %s5462_s15  }
  0x26   : > { %7431 = sst [smem:[#allocation18_spill]] %s5628_s26  ;;  %p5636_p9 = por %p186_p7, %p185_p6 }
  0x27   : > { %s492_s22 = sand.u32 1, %s5482_s20   ;;  %p5641_p10 = pnand %p4717_p8, %p181_p5 }
  0x28   : > { %s4548_s29 = sshll.u32 %s5634_s27, 7  ;;  %s4689_s24 = sshll.u32 %s5474_s18, 7 }
  0x29   : > { %s7434_s6 = sld [smem:[#allocation25_spill]]  ;;  %s496_s26 = scalar_lea.vmem [#allocation4], %s4548_s29 }
  0x2a   : > { %s504_s15 = sshll.u32 %s496_s26, 4  ;;  %p4557_p11 = scmp.ge.s32.totalorder %s5482_s20, 1  ;;  %s505_s15 = int_to_ptr.vmem [resolvable:$true] %s504_s15 }
  0x2b   : > { %s5651_s1 = scalar_lea.sflag [#allocation5], %s492_s22  ;;  %s7405_s14 = smov 128  }
  0x2c   : > { %s7406_s13 = smov 8   ;;  %p587_p12 = scmp.lt.s32.totalorder %s5482_s20, 5 }
  0x2d   : > { %s4693_s21 = smul.u32 384, %s5634_s27  ;;  %s7436_s5 = sld [smem:[#allocation24_spill]] }
  0x2e   : > { %p5660_p13 = pnand %p4557_p11, %p587_p12  ;;  %s4694_s23 = smul.u32 384, %s5474_s18 }
  0x2f   : > { %s501_s19 = scalar_lea.hbm %s7434_s6, %s4689_s24  ;;  %s474_s24 = scalar_lea.vmem [#allocation2], %s4693_s21 }
  0x30   : > { %s502_s2 = sshll.u32 %s501_s19, 4  ;;  %s482_s6 = sshll.u32 %s474_s24, 4  ;;  %s503_s2 = int_to_ptr.hbm [resolvable:$true] %s502_s2  ;;  %s483_s6 = int_to_ptr.vmem [resolvable:$true] %s482_s6 }
  0x31   : > { %4710 = dma.hbm_to_vmem [thread:$0]  (!%p5641_p10), %s503_s2, 2048, %s505_s15, %s5651_s1, %s7405_s14, %s7405_s14, %s7406_s13  }
  0x32   : > { %s4551_s2 = sshll.u32 %s5634_s27, 10  ;;  %s471_s15 = scalar_lea.sflag [#allocation3], %s5634_s27 }
  0x33   : > { %s479_s29 = scalar_lea.hbm %s7436_s5, %s4694_s23  ;;  %s5486_s14 = smov 384  }
  0x34   : > { %s480_s11 = sshll.u32 %s479_s29, 4  ;;  %s5487_s13 = smov 24   ;;  %s481_s11 = int_to_ptr.hbm [resolvable:$true] %s480_s11 }
  0x35   : > { %4707 = dma.hbm_to_vmem [thread:$0]  (!%p5641_p10), %s481_s11, 6144, %s483_s6, %s471_s15, %s5486_s14, %s5486_s14, %s5487_s13  }
  0x36   : > { %s4690_s9 = sshll.u32 %s5474_s18, 10  ;;  %s7437_s10 = sld [smem:[#allocation29_spill]] }
  0x37   : > { %s536_s21 = scalar_lea.vmem [#allocation6], %s4551_s2  ;;  %s5488_s29 = smov 1024  }
  0x38   : > { %s544_s26 = sshll.u32 %s536_s21, 4  ;;  %s5489_s24 = smov 64   ;;  %s545_s26 = int_to_ptr.vmem [resolvable:$true] %s544_s26 }
  0x39   : > { %s4554_s5 = sshll.u32 %s5634_s27, 9  ;;  %s4691_s7 = sshll.u32 %s5474_s18, 9 }
  0x3a   : > { %s7438_s12 = sld [smem:[#allocation31_spill]]  ;;  %s565_s0 = scalar_lea.vmem [#allocation7], %s4554_s5 }
  0x3b   : > { %s573_s8 = sshll.u32 %s565_s0, 4  ;;  %s7439_s14 = smov 8   ;;  %s574_s8 = int_to_ptr.vmem [resolvable:$true] %s573_s8 }
  0x3c   : > { %s541_s23 = scalar_lea.hbm %s7437_s10, %s4690_s9  ;;  %s562_s9 = scalar_lea.sflag [#allocation8], %s5634_s27 }
  0x3d   : > { %s542_s22 = sshll.u32 %s541_s23, 4  ;;  %s7440_s2 = smov 128   ;;  %s543_s22 = int_to_ptr.hbm [resolvable:$true] %s542_s22 }
  0x3e   : > { %4713 = dma.hbm_to_vmem [thread:$0]  (!%p5641_p10), %s543_s22, 16384, %s545_s26, %s5651_s1, %s5488_s29, %s5488_s29, %s5489_s24  }
  0x3f   : > { %591 = sbr.rel (%p5660_p13) target bundleno = 4583 (0x11e7), region = 76  ;;  %s593_s1 = sand.u32 (!%p5660_p13), 1, %s5458_s30  }
  0x40   : > { %s570_s11 = scalar_lea.hbm %s7438_s12, %s4691_s7  ;;  %s4695_s15 = smul.u32 (!%p5660_p13), 384, %s593_s1 }
  0x41   : > { %s571_s13 = sshll.u32 %s570_s11, 4  ;;  %s594_s4 = scalar_lea.sflag (!%p5660_p13), [#allocation3], %s593_s1  ;;  %s572_s13 = int_to_ptr.hbm [resolvable:$true] %s571_s13 }
  0x42   : > { %4716 = dma.hbm_to_vmem [thread:$0]  (!%p5641_p10), %s572_s13, 8192, %s574_s8, %s562_s9, %s7440_s2, %s7440_s2, %s7439_s14  }
  0x43   : > { %s5694_s7 = scalar_lea.vmem (!%p5660_p13), [#allocation2], %s4695_s15 }
  0x44   : > { %5441 = dma.done.wait (%p5636_p9), %s594_s4, 6144  }
  0x45   : > { %5443 = vsyncadd (%p5636_p9), %s594_s4, 4294961152  ;;  %s7441_s5 = sadd.s32 4294967295, %s5482_s20   ;;  %s4558_s25 = sshll.u32 %s593_s1, 7 }
  0x46   : > { %s603_s27 = sand.u32 1, %s7441_s5   ;;  %s5702_s19 = scalar_lea.vmem [#allocation4], %s4558_s25 }
  0x47   : > { %s604_s23 = scalar_lea.sflag [#allocation5], %s603_s27 }
  0x48   : > { %5445 = dma.done.wait (%p5636_p9), %s604_s23, 18432  }
  0x49   : > { %5447 = vsyncadd (%p5636_p9), %s604_s23, 4294948864  ;;  %s4559_s21 = sshll.u32 %s593_s1, 10  ;;  %s4560_s26 = sshll.u32 %s593_s1, 9 }
  0x4a   : > { %s5708_s22 = scalar_lea.vmem [#allocation6], %s4559_s21  ;;  %s624_s29 = scalar_lea.sflag [#allocation8], %s593_s1 }
  0x4b   : > { %s5710_s24 = scalar_lea.vmem [#allocation7], %s4560_s26 }
  0x4c   : > { %5449 = dma.done.wait (%p5636_p9), %s624_s29, 8192  }
  0x4d   : > { %5451 = vsyncadd (%p5636_p9), %s624_s29, 4294959104  ;;  %s4561_s6 = sshll.u32 %s5470_s17, 1  ;;  %p722_p0 = scmp.lt.s32.totalorder %s5466_s16, 1 }
  0x4e   : > { %p717_p1 = scmp.lt.s32.totalorder %s4561_s6, 3  ;;  %s7442_s3 = sld [smem:[#allocation22_spill]] }
  0x4f   : > { %s723_s11 = scalar_select %p722_p0, %s5466_s16, 1 }
  0x50   : > { %s7469_s6 = smov (!%p717_p1, %s4561_s6), 3  ;;  %s7443_s2 = sld [smem:[#allocation23_spill]] }
  0x51   : > { %s4562_s28 = sshll.u32 %s7469_s6, 3  ;;  %s7444_s5 = sld [smem:[#allocation26_spill]] }
  0x52   : > { %s7445_s23 = sld [smem:[#allocation19_spill]]  ;;  %s4692_s25 = sshll.u32 %s7469_s6, 4 }
  0x53   : > { %s7446_s13 = sld [smem:[#allocation27_spill]]  ;;  %p4567_p2 = scmp.ne.s32.totalorder %s5466_s16, 0 }
  0x54   : > { %s5722_s8 = scalar_lea.vmem %s7442_s3, %s723_s11  ;;  %s7447_s9 = sld [smem:[#allocation28_spill]] }
  0x55   : > { %s7448_s15 = sld [smem:[#allocation30_spill]] }
  0x56   : > { %s5727_s1 = scalar_lea.vmem %s7443_s2, %s723_s11  ;;  %s4563_s2 = sshll.u32 %s723_s11, 3 }
  0x57   : > { %s5732_s27 = scalar_lea.vmem %s7444_s5, %s723_s11  ;;  %s7449_s17 = sld [smem:[#allocation32_spill]] }
  0x58   : > { %s720_s21 = scalar_lea.vmem %s7445_s23, %s4562_s28  ;;  %s7450_s29 = sld [smem:[#allocation33_spill]] }
  0x59   : > { %s5740_s0 = scalar_lea.vmem %s7446_s13, %s723_s11  ;;  %s7451_s12 = sld [smem:[#allocation20_spill]] (!%p4567_p2) }
  0x5a   : > { %s5745_s14 = scalar_lea.vmem %s7447_s9, %s723_s11  ;;  %754 = sbr.rel (%p4567_p2) target bundleno = 240 (0xf0), region = 96 }
  0x5b   : > { %s5750_s4 = scalar_lea.vmem %s7448_s15, %s4563_s2  ;;  %s7452_s6 = sld [smem:[#allocation21_spill]] (!%p4567_p2) }
  0x5d   : > { %s5755_s28 = scalar_lea.vmem %s7449_s17, %s723_s11 }
  0x5e   : > { %s5760_s13 = scalar_lea.vmem %s7450_s29, %s4692_s25 }
  0x5f   : > { %v755_v0 = vld [vmem:[%s720_s21] sm:$0xff]  ;;  %v5490_v1 = vmov 0   ;;  %v4568_v2 = vld [vmem:[%s720_s21 + $0x8] sm:$0xff]  ;;  %vm775_vm0 = vcmask 1040384  }
  0x60   : > { %4797 = vset.pattern.permute.xlu0 %v5490_v1  ;;  %v756_v3 = vld [vmem:[%s7451_s12] sm:$0xff] }
  0x61   : > { %759 = vperm.xlu0 %4797, %v755_v0   ;;  %v763_v4 = vld [vmem:[%s7452_s6] sm:$0xff] }
  0x69   : > { %784 = vperm.xlu0 %4797, %v4568_v2  }
  0xd3   : > { %v760_v5 = vpop.permute.xlu0 %759 }
  0xd4   : > { %v762_v6 = vmul.f32 %v760_v5, %v756_v3 }
  0xd6   : > { %v764_v7 = vadd.f32 %v763_v4, %v762_v6 }
  0xd8   : > { %v765_v8 = vrot.slane %v764_v7, 4  ;;  %v773_v9 = vrot.slane %v764_v7, 7 }
  0xda   : > { %v766_v10 = vadd.f32 %v765_v8, %v764_v7  ;;  %778 = vst [vmem:[%s5760_s13 + $0x8] sm:$0x1] %v773_v9 }
  0xdb   : > { %v785_v11 = vpop.permute.xlu0 %784 }
  0xdc   : > { %v767_v12 = vrot.slane %v766_v10, 2  ;;  %v787_v13 = vmul.f32 %v785_v11, %v756_v3 }
  0xde   : > { %v768_v14 = vadd.f32 %v767_v12, %v766_v10  ;;  %v789_v15 = vadd.f32 %v787_v13, %v763_v4 }
  0xe0   : > { %v769_v16 = vrot.slane %v768_v14, 1  ;;  %v790_v17 = vrot.slane %v789_v15, 4  ;;  %v798_v18 = vrot.slane %v789_v15, 7 }
  0xe2   : > { %v770_v19 = vadd.f32 %v769_v16, %v768_v14  ;;  %v791_v20 = vadd.f32 %v790_v17, %v789_v15  ;;  %4570 = vst [vmem:[%s5760_s13 + $0x18] sm:$0x1] %v798_v18 }
  0xe4   : > { %v771_v21 = vmul.f32 0.125, %v770_v19  ;;  %v792_v22 = vrot.slane %v791_v20, 2 }
  0xe6   : > { %v776_v23 = vsel %vm775_vm0, %v771_v21, %v773_v9  ;;  %v793_v24 = vadd.f32 %v792_v22, %v791_v20 }
  0xe7   : > { %777 = vst [vmem:[%s5760_s13] sm:$0xff] %v776_v23 }
  0xe8   : > { %v794_v25 = vrot.slane %v793_v24, 1 }
  0xea   : > { %v795_v26 = vadd.f32 %v794_v25, %v793_v24 }
  0xec   : > { %v796_v27 = vmul.f32 0.125, %v795_v26 }
  0xee   : > { %v800_v28 = vsel %vm775_vm0, %v796_v27, %v798_v18 }
  0xef   : > { %4569 = vst [vmem:[%s5760_s13 + $0x10] sm:$0xff] %v800_v28 }
  0xf0 PF: > { %v1067_v29 = vld [vmem:[%s5760_s13] sm:$0xff]  ;;  %v1068_v30 = vld [vmem:[%s5760_s13 + $0x8] sm:$0x1]  ;;  %vm1071_vm1 = vcmask 1040384   ;;  %v5491_v32 = vmov 128.0   ;;  %v850_v36 = vld [vmem:[%s5694_s7 + $0x170] sm:$0xff] }
  0xf1   : > { %1069 = vadd.xlane.f32.xlu0 %v1067_v29  ;;  %v1072_v31 = vsel %vm1071_vm1, %v1068_v30, 0.0  ;;  %4844 = vrcp.f32 %v5491_v32  ;;  %v849_v35 = vld [vmem:[%s5694_s7 + $0x168] sm:$0xff]  ;;  %v851_v37 = vld [vmem:[%s5694_s7 + $0x178] sm:$0xff]  ;;  %1152 = vmatpush.msra.mxu1 %v850_v36  ;;  %v846_v51 = vld [vmem:[%s5694_s7 + $0x150] sm:$0xff]  ;;  %s5492_s16 = smov 80   ;;  %s5493_s11 = smov 112  }
  0xf2   : > { %1129 = vmatpush.msra.mxu0 %v849_v35  ;;  %1175 = vmatpush.msra.mxu2 %v851_v37  ;;  %v847_v52 = vld [vmem:[%s5694_s7 + $0x158] sm:$0xff]  ;;  %v848_v53 = vld [vmem:[%s5694_s7 + $0x160] sm:$0xff]  ;;  %v845_v56 = vld [vmem:[%s5694_s7 + $0x148] sm:$0xff]  ;;  %vm1198_vm9 = vcmask 130048   ;;  %s5494_s21 = smov 96   ;;  %s5495_s9 = smov 64  }
  0xf3   : > { %1153 = vmatpush.msra.mxu1 %v847_v52  ;;  %v843_v54 = vld [vmem:[%s5694_s7 + $0x138] sm:$0xff]  ;;  %v844_v55 = vld [vmem:[%s5694_s7 + $0x140] sm:$0xff]  ;;  %v841_v58 = vld [vmem:[%s5694_s7 + $0x128] sm:$0xff]  ;;  %s5496_s2 = smov 48   ;;  %vm1234_vm10 = vcmask 72704   ;;  %vm1238_vm11 = vcmask 65536  }
  0xf4   : > { %1130 = vmatpush.msra.mxu0 %v846_v51  ;;  %1176 = vmatpush.msra.mxu2 %v848_v53  ;;  %v840_v57 = vld [vmem:[%s5694_s7 + $0x120] sm:$0xff]  ;;  %v842_v59 = vld [vmem:[%s5694_s7 + $0x130] sm:$0xff]  ;;  %v837_v60 = vld [vmem:[%s5694_s7 + $0x108] sm:$0xff]  ;;  %s5497_s15 = smov 32   ;;  %s5498_s5 = smov 16  }
  0xf5   : > { %1154 = vmatpush.msra.mxu1 %v844_v55  ;;  %v838_v61 = vld [vmem:[%s5694_s7 + $0x110] sm:$0xff]  ;;  %v839_v62 = vld [vmem:[%s5694_s7 + $0x118] sm:$0xff]  ;;  %v836_v1 = vld [vmem:[%s5694_s7 + $0x100] sm:$0xff] }
  0xf6   : > { %1131 = vmatpush.msra.mxu0 %v843_v54  ;;  %1177 = vmatpush.msra.mxu2 %v845_v56  ;;  %v834_v63 = vld [vmem:[%s5694_s7 + $0xf0] sm:$0xff]  ;;  %v835_v0 = vld [vmem:[%s5694_s7 + $0xf8] sm:$0xff]  ;;  %v832_v3 = vld [vmem:[%s5694_s7 + $0xe0] sm:$0xff] }
  0xf7   : > { %v4845_v33 = vpop.eup %4844  ;;  %1155 = vmatpush.msra.mxu1 %v841_v58  ;;  %v831_v2 = vld [vmem:[%s5694_s7 + $0xd8] sm:$0xff]  ;;  %v833_v4 = vld [vmem:[%s5694_s7 + $0xe8] sm:$0xff]  ;;  %v828_v5 = vld [vmem:[%s5694_s7 + $0xc0] sm:$0xff] }
  0xf8   : > { %v1076_v34 = vmul.f32 128.0, %v4845_v33  ;;  %vm1080_vm2 = vweird.f32 %v4845_v33  ;;  %1132 = vmatpush.msra.mxu0 %v840_v57  ;;  %1178 = vmatpush.msra.mxu2 %v842_v59  ;;  %v829_v6 = vld [vmem:[%s5694_s7 + $0xc8] sm:$0xff]  ;;  %v830_v7 = vld [vmem:[%s5694_s7 + $0xd0] sm:$0xff]  ;;  %v827_v10 = vld [vmem:[%s5694_s7 + $0xb8] sm:$0xff] }
  0xf9   : > { %1073 = vadd.xlane.f32.xlu0 %v1072_v31  ;;  %1156 = vmatpush.msra.mxu1 %v838_v61  ;;  %v825_v8 = vld [vmem:[%s5694_s7 + $0xa8] sm:$0xff]  ;;  %v826_v9 = vld [vmem:[%s5694_s7 + $0xb0] sm:$0xff]  ;;  %v823_v12 = vld [vmem:[%s5694_s7 + $0x98] sm:$0xff] }
  0xfa   : > { %v1077_v38 = vsub.f32 1.0, %v1076_v34  ;;  %1133 = vmatpush.msra.mxu0 %v837_v60  ;;  %1179 = vmatpush.msra.mxu2 %v839_v62  ;;  %v822_v11 = vld [vmem:[%s5694_s7 + $0x90] sm:$0xff]  ;;  %v824_v13 = vld [vmem:[%s5694_s7 + $0xa0] sm:$0xff]  ;;  %v819_v14 = vld [vmem:[%s5694_s7 + $0x78] sm:$0xff] }
  0xfb   : > { %1157 = vmatpush.msra.mxu1 %v835_v0  ;;  %v820_v15 = vld [vmem:[%s5694_s7 + $0x80] sm:$0xff]  ;;  %v821_v16 = vld [vmem:[%s5694_s7 + $0x88] sm:$0xff]  ;;  %v818_v19 = vld [vmem:[%s5694_s7 + $0x70] sm:$0xff] }
  0xfc   : > { %v1078_v39 = vmul.f32 %v4845_v33, %v1077_v38  ;;  %1134 = vmatpush.msra.mxu0 %v834_v63  ;;  %1180 = vmatpush.msra.mxu2 %v836_v1  ;;  %v816_v17 = vld [vmem:[%s5694_s7 + $0x60] sm:$0xff]  ;;  %v817_v18 = vld [vmem:[%s5694_s7 + $0x68] sm:$0xff]  ;;  %v814_v21 = vld [vmem:[%s5694_s7 + $0x50] sm:$0xff] }
  0xfd   : > { %1158 = vmatpush.msra.mxu1 %v832_v3  ;;  %v813_v20 = vld [vmem:[%s5694_s7 + $0x48] sm:$0xff]  ;;  %v815_v22 = vld [vmem:[%s5694_s7 + $0x58] sm:$0xff]  ;;  %v810_v23 = vld [vmem:[%s5694_s7 + $0x30] sm:$0xff] }
  0xfe   : > { %v1079_v40 = vadd.f32 %v4845_v33, %v1078_v39  ;;  %1135 = vmatpush.msra.mxu0 %v831_v2  ;;  %1181 = vmatpush.msra.mxu2 %v833_v4  ;;  %v811_v24 = vld [vmem:[%s5694_s7 + $0x38] sm:$0xff]  ;;  %v812_v25 = vld [vmem:[%s5694_s7 + $0x40] sm:$0xff]  ;;  %v809_v28 = vld [vmem:[%s5694_s7 + $0x28] sm:$0xff] }
  0xff   : > { %1159 = vmatpush.msra.mxu1 %v829_v6  ;;  %v807_v26 = vld [vmem:[%s5694_s7 + $0x18] sm:$0xff]  ;;  %v808_v27 = vld [vmem:[%s5694_s7 + $0x20] sm:$0xff]  ;;  %v806_v31 = vld [vmem:[%s5694_s7 + $0x10] sm:$0xff] }
 0x100   : > { %v5779_v41 = vsel %vm1080_vm2, %v4845_v33, %v1079_v40  ;;  %1136 = vmatpush.msra.mxu0 %v828_v5  ;;  %1182 = vmatpush.msra.mxu2 %v830_v7  ;;  %v4839_v53 = vld [vmem:[%s5727_s1] ss:$0 sm:$0xff] }
 0x101   : > { %1160 = vmatpush.msra.mxu1 %v826_v9 }
 0x102   : > { %1137 = vmatpush.msra.mxu0 %v825_v8  ;;  %1183 = vmatpush.msra.mxu2 %v827_v10 }
 0x103   : > { %1161 = vmatpush.msra.mxu1 %v823_v12 }
 0x104   : > { %1138 = vmatpush.msra.mxu0 %v822_v11  ;;  %1184 = vmatpush.msra.mxu2 %v824_v13 }
 0x105   : > { %1162 = vmatpush.msra.mxu1 %v820_v15 }
 0x106   : > { %1139 = vmatpush.msra.mxu0 %v819_v14  ;;  %1185 = vmatpush.msra.mxu2 %v821_v16 }
 0x107   : > { %1163 = vmatpush.msra.mxu1 %v817_v18 }
 0x108   : > { %1140 = vmatpush.msra.mxu0 %v816_v17  ;;  %1186 = vmatpush.msra.mxu2 %v818_v19 }
 0x109   : > { %1164 = vmatpush.msra.mxu1 %v814_v21 }
 0x10a   : > { %1141 = vmatpush.msra.mxu0 %v813_v20  ;;  %1187 = vmatpush.msra.mxu2 %v815_v22 }
 0x10b   : > { %1165 = vmatpush.msra.mxu1 %v811_v24 }
 0x10c   : > { %1142 = vmatpush.msra.mxu0 %v810_v23  ;;  %1188 = vmatpush.msra.mxu2 %v812_v25 }
 0x10d   : > { %1166 = vmatpush.msra.mxu1 %v808_v27 }
 0x10e   : > { %1143 = vmatpush.msra.mxu0 %v807_v26  ;;  %1189 = vmatpush.msra.mxu2 %v809_v28 }
 0x110   : > { %1190 = vmatpush.msra.mxu2 %v806_v31 }
 0x164   : > { %v1070_v42 = vpop.xlane.xlu0 %1069 }
 0x165   : > { %v1082_v43 = vmul.f32 %v5779_v41, %v1070_v42 }
 0x167   : > { %v5782_v44 = vsub.f32 %v1067_v29, %v1082_v43  ;;  %v804_v29 = vld [vmem:[%s5694_s7] sm:$0xff] }
 0x168   : > { %1144 = vmatpush.msra.mxu0 %v804_v29 }
 0x169   : > { %v1086_v45 = vmul.f32 %v5782_v44, %v5782_v44 }
 0x16b   : > { %1088 = vadd.xlane.f32.xlu1 %v1086_v45 }
 0x16c   : > { %v1074_v46 = vpop.xlane.xlu0 %1073 }
 0x16d   : > { %v1083_v47 = vmul.f32 %v5779_v41, %v1074_v46 }
 0x16f   : > { %v5787_v48 = vsub.f32 %v1068_v30, %v1083_v47  ;;  %v805_v30 = vld [vmem:[%s5694_s7 + $0x8] sm:$0xff] }
 0x170   : > { %1167 = vmatpush.msra.mxu1 %v805_v30 }
 0x171   : > { %v1087_v49 = vmul.f32 %v5787_v48, %v5787_v48 }
 0x173   : > { %v1090_v50 = vsel %vm1071_vm1, %v1087_v49, 0.0  ;;  %v4838_v49 = vld [vmem:[%s5722_s8] ss:$0 sm:$0xff] }
 0x174   : > { %1091 = vadd.xlane.f32.xlu1 %v1090_v50 }
 0x1de   : > { %v1089_v32 = vpop.xlane.xlu1 %1088 }
 0x1df   : > { %v1093_v33 = vmul.f32 %v1089_v32, %v5779_v41 }
 0x1e1   : > { %v1095_v34 = vadd.f32 1e-05, %v1093_v33 }
 0x1e3   : > { %4846 = vrsqrt.f32 %v1095_v34  ;;  %vm1103_vm4 = vweird.f32 %v1095_v34 }
 0x1e7   : > { %v1092_v35 = vpop.xlane.xlu1 %1091 }
 0x1e8   : > { %v1094_v36 = vmul.f32 %v1092_v35, %v5779_v41 }
 0x1e9   : > { %v4847_v37 = vpop.eup %4846 }
 0x1ea   : > { %v1098_v38 = vmul.f32 %v4847_v37, %v1095_v34  ;;  %v1096_v39 = vadd.f32 1e-05, %v1094_v36  ;;  %vm1104_vm3 = vweird.f32 %v4847_v37 }
 0x1eb   : > { %vm1105_vm5 = vmor %vm1103_vm4, %vm1104_vm3 }
 0x1ec   : > { %v1099_v40 = vmul.f32 %v4847_v37, %v1098_v38  ;;  %4848 = vrsqrt.f32 %v1096_v39  ;;  %vm1113_vm7 = vweird.f32 %v1096_v39 }
 0x1ee   : > { %v1100_v42 = vmul.f32 0.5, %v1099_v40 }
 0x1f0   : > { %v1101_v43 = vsub.f32 1.5, %v1100_v42 }
 0x1f2   : > { %v4849_v45 = vpop.eup %4848  ;;  %v1102_v46 = vmul.f32 %v4847_v37, %v1101_v43 }
 0x1f3   : > { %v1108_v47 = vmul.f32 %v4849_v45, %v1096_v39  ;;  %vm1114_vm6 = vweird.f32 %v4849_v45 }
 0x1f4   : > { %v1106_v50 = vsel %vm1105_vm5, %v4847_v37, %v1102_v46  ;;  %vm1115_vm8 = vmor %vm1113_vm7, %vm1114_vm6 }
 0x1f5   : > { %v1109_v51 = vmul.f32 %v4849_v45, %v1108_v47  ;;  %v1117_v52 = vmul.f32 %v1106_v50, %v5782_v44 }
 0x1f7   : > { %v1110_v54 = vmul.f32 0.5, %v1109_v51  ;;  %v1122_v55 = vmul.f32 %v4838_v49, %v1117_v52 }
 0x1f9   : > { %v1111_v56 = vsub.f32 1.5, %v1110_v54  ;;  %v1127_v57 = vadd.f32 %v4839_v53, %v1122_v55 }
 0x1fb   : > { %v1112_v58 = vmul.f32 %v4849_v45, %v1111_v56  ;;  %1145 = vmatmul.f32.vlgmr.msra.gmra.mxu0 %v1127_v57  ;;  %1168 = vmatmul.f32.vlgmr.msra.gmra.mxu1 %v1127_v57 }
 0x1fc   : > { %1191 = vmatmul.f32.vlgmr.msra.gmra.mxu2 %v1127_v57 }
 0x1fd   : > { %v1116_v59 = vsel %vm1115_vm8, %v4849_v45, %v1112_v58 }
 0x1fe   : > { %v1118_v60 = vmul.f32 %v1116_v59, %v5787_v48 }
 0x200   : > { %v1123_v61 = vmul.f32 %v4838_v49, %v1118_v60 }
 0x202   : > { %v1128_v62 = vadd.f32 %v4839_v53, %v1123_v61 }
 0x204   : > { %1148 = vmatmul.f32.gmra.mxu0 %v1128_v62  ;;  %1171 = vmatmul.f32.gmra.mxu1 %v1128_v62 }
 0x205   : > { %1194 = vmatmul.f32.gmra.mxu2 %v1128_v62 }
 0x278   : > { %v5843_v44 = vpop.f32.mrf.mxu0  ;;  %v5845_v63 = vpop.f32.mrf.mxu1 }
 0x279   : > { %1567 = vrot.lane.b32.xlu2 %v5845_v63, %s5492_s16  ;;  %1320 = vrot.lane.b32.xlu0 %v5845_v63, %s5493_s11 }
 0x27a   : > { %1316 = vrot.lane.b32.xlu1 %v5843_v44, %s5493_s11 }
 0x27f   : > { %v5853_v48 = vpop.f32.mrf.mxu2 }
 0x281   : > { %1444 = vrot.lane.b32.xlu0 %v5845_v63, %s5494_s21  ;;  %v5857_v0 = vpop.f32.mrf.mxu1  ;;  %v5880_v2 = vpop.f32.mrf.mxu0 }
 0x282   : > { %1440 = vrot.lane.b32.xlu1 %v5843_v44, %s5494_s21  ;;  %1322 = vrot.lane.b32.xlu2 %v5857_v0, %s5493_s11 }
 0x283   : > { %4571 = vmatpush.xpose.msk.msra.mxu3 %vm1198_vm9, %v5857_v0 }
 0x287   : > { %4572 = vmatpush.xpose.msk.msra.mxu3 %vm1198_vm9, %v5845_v63 }
 0x288   : > { %v5867_v1 = vpop.f32.mrf.mxu2 }
 0x289   : > { %1569 = vrot.lane.b32.xlu0 %v5857_v0, %s5492_s16 }
 0x28a   : > { %1563 = vrot.lane.b32.xlu1 %v5843_v44, %s5492_s16  ;;  %4573 = vmatmul.msk.f32.vlgmr.msra.gmra.mxu3 %vm1198_vm9, %v5843_v44 }
 0x28b   : > { %4575 = vmatpush.msk.msrb.mxu3 %vm1071_vm1, %v5867_v1  ;;  %1446 = vrot.lane.b32.xlu2 %v5857_v0, %s5494_s21 }
 0x28d   : > { %1308 = vmatpush.msrb.mxu3 %v5853_v48 }
 0x291   : > { %1442 = vrot.lane.b32.xlu0 %v5880_v2, %s5494_s21 }
 0x292   : > { %1692 = vrot.lane.b32.xlu1 %v5857_v0, %s5495_s9  ;;  %4574 = vmatmul.msk.f32.gmra.mxu3 %vm1198_vm9, %v5880_v2 }
 0x293   : > { %1318 = vrot.lane.b32.xlu2 %v5880_v2, %s5493_s11 }
 0x29a   : > { %1813 = vrot.lane.b32.xlu1 %v5845_v63, %s5496_s2 }
 0x2d3   : > { %v5892_v3 = vpop.permute.xlu2 %1567 }
 0x2dc   : > { %v1323_v4 = vpop.permute.xlu2 %1322 }
 0x2dd   : > { %4578 = vmatpush.xpose.msk.msra.mxu3 %vm1198_vm9, %v1323_v4 }
 0x2e5   : > { %v1447_v5 = vpop.permute.xlu2 %1446 }
 0x2e6   : > { %4585 = vmatpush.xpose.msk.msrb.mxu2 %vm1198_vm9, %v1447_v5 }
 0x2eb   : > { %v1321_v6 = vpop.permute.xlu0 %1320 }
 0x2ec   : > { %v5896_v7 = vpop.permute.xlu1 %1316  ;;  %4579 = vmatpush.xpose.msk.msra.mxu3 %vm1198_vm9, %v1321_v6 }
 0x2ed   : > { %v5921_v18 = vpop.permute.xlu2 %1318 }
 0x2f3   : > { %v1445_v8 = vpop.permute.xlu0 %1444 }
 0x2f4   : > { %v1441_v9 = vpop.permute.xlu1 %1440  ;;  %4586 = vmatpush.xpose.msk.msrb.mxu2 %vm1198_vm9, %v1445_v8 }
 0x2f7   : > { %4587 = vmatmul.msk.f32.vlgmr.msrb.gmra.mxu2 %vm1198_vm9, %v1441_v9 }
 0x2fb   : > { %v5901_v10 = vpop.permute.xlu0 %1569 }
 0x2fc   : > { %v5903_v11 = vpop.permute.xlu1 %1563 }
 0x303   : > { %v1443_v12 = vpop.permute.xlu0 %1442 }
 0x304   : > { %v1693_v13 = vpop.permute.xlu1 %1692  ;;  %4588 = vmatmul.msk.f32.gmra.mxu2 %vm1198_vm9, %v1443_v12 }
 0x305   : > { %4599 = vmatpush.xpose.msk.msrb.mxu1 %vm1198_vm9, %v1693_v13 }
 0x30c   : > { %v1814_v37 = vpop.permute.xlu1 %1813 }
 0x30d   : > { %v1228_v14 = vpop.f32.mrf.mxu3 }
 0x30e   : > { %v1235_v15 = vsel %vm1234_vm10, %v1228_v14, -inf }
 0x30f   : > { %1236 = vmax.xlane.f32.xlu2 %v1235_v15 }
 0x315   : > { %v1231_v16 = vpop.f32.mrf.mxu3 }
 0x316   : > { %v1239_v17 = vsel %vm1238_vm11, %v1231_v16, -inf }
 0x317   : > { %1240 = vmax.xlane.f32.xlu2 %v1239_v17 }
 0x32f   : > { %1565 = vrot.lane.b32.xlu2 %v5880_v2, %s5492_s16 }
 0x337   : > { %1690 = vrot.lane.b32.xlu2 %v5845_v63, %s5495_s9 }
 0x33f   : > { %1809 = vrot.lane.b32.xlu2 %v5843_v44, %s5496_s2 }
 0x347   : > { %1938 = vrot.lane.b32.xlu2 %v5857_v0, %s5497_s15 }
 0x34f   : > { %2059 = vrot.lane.b32.xlu2 %v5845_v63, %s5498_s5 }
 0x357   : > { %1934 = vrot.lane.b32.xlu2 %v5880_v2, %s5497_s15 }
 0x37a   : > { %v5923_v19 = vpop.f32.mrf.mxu2 }
 0x37b   : > { %v1479_v36 = vsel %vm1234_vm10, %v5923_v19, -inf }
 0x382   : > { %v1237_v20 = vpop.xlane.xlu2 %1236 }
 0x383   : > { %v1242_v21 = vsub.f32 %v1228_v14, %v1237_v20 }
 0x385   : > { %v1244_v22 = vmul.f32 1.442695, %v1242_v21 }
 0x387   : > { %4850 = vpow2.f32 %v1244_v22  ;;  %v5925_v23 = vpop.f32.mrf.mxu2 }
 0x388   : > { %v1482_v24 = vsel %vm1238_vm11, %v5925_v23, -inf }
 0x389   : > { %1483 = vmax.xlane.f32.xlu2 %v1482_v24 }
 0x38a   : > { %v1241_v25 = vpop.xlane.xlu2 %1240 }
 0x38b   : > { %v1243_v26 = vsub.f32 %v1231_v16, %v1241_v25 }
 0x38d   : > { %v4851_v27 = vpop.eup %4850  ;;  %v1246_v28 = vmul.f32 1.442695, %v1243_v26 }
 0x38e   : > { %v1248_v29 = vsel %vm1234_vm10, %v4851_v27, 0.0 }
 0x38f   : > { %4852 = vpow2.f32 %v1246_v28  ;;  %1249 = vadd.xlane.f32.xlu0 %v1248_v29 }
 0x392   : > { %v5930_v30 = vpop.permute.xlu2 %1565 }
 0x395   : > { %v4853_v31 = vpop.eup %4852 }
 0x396   : > { %v1251_v32 = vsel %vm1238_vm11, %v4853_v31, 0.0 }
 0x397   : > { %1252 = vadd.xlane.f32.xlu1 %v1251_v32 }
 0x39a   : > { %v1691_v33 = vpop.permute.xlu2 %1690 }
 0x39b   : > { %4600 = vmatpush.xpose.msk.msrb.mxu1 %vm1198_vm9, %v1691_v33 }
 0x3a2   : > { %v5934_v34 = vpop.permute.xlu2 %1809 }
 0x3a3   : > { %1815 = vrot.lane.b32.xlu0 %v5857_v0, %s5496_s2 }
 0x3aa   : > { %v1939_v35 = vpop.permute.xlu2 %1938 }
 0x3ab   : > { %1686 = vrot.lane.b32.xlu0 %v5843_v44, %s5495_s9  ;;  %4613 = vmatpush.xpose.msk.msra.mxu1 %vm1198_vm9, %v1939_v35 }
 0x3b0   : > { %1688 = vrot.lane.b32.xlu1 %v5880_v2, %s5495_s9 }
 0x3b2   : > { %v2060_v8 = vpop.permute.xlu2 %2059 }
 0x3b3   : > { %1811 = vrot.lane.b32.xlu0 %v5880_v2, %s5496_s2 }
 0x3b8   : > { %2061 = vrot.lane.b32.xlu1 %v5857_v0, %s5498_s5 }
 0x3bb   : > { %1936 = vrot.lane.b32.xlu0 %v5845_v63, %s5497_s15 }
 0x3c0   : > { %1932 = vrot.lane.b32.xlu1 %v5843_v44, %s5497_s15 }
 0x3c3   : > { %2055 = vrot.lane.b32.xlu0 %v5843_v44, %s5498_s5 }
 0x3c8   : > { %2057 = vrot.lane.b32.xlu1 %v5880_v2, %s5498_s5 }
 0x3f2   : > { %1480 = vmax.xlane.f32.xlu1 %v1479_v36 }
 0x402   : > { %v1250_v38 = vpop.xlane.xlu0 %1249 }
 0x403   : > { %4854 = vrcp.f32 %v1250_v38  ;;  %v1265_v45 = vand.u32 2147483648, %v1250_v38  ;;  %v1263_v47 = vand.u32 2147483647, %v1250_v38  ;;  %vm1259_vm13 = vweird.f32 %v1250_v38 }
 0x405   : > { %v1266_v51 = vor.u32 1.1754944e-38, %v1265_v45  ;;  %vm1264_vm15 = vcmp.eq.f32.partialorder %v1263_v47, 8.507059e+37 }
 0x409   : > { %v4855_v39 = vpop.eup %4854 }
 0x40a   : > { %v1255_v40 = vmul.f32 %v4855_v39, %v1250_v38  ;;  %v1253_v42 = vpop.xlane.xlu1 %1252  ;;  %vm1260_vm12 = vweird.f32 %v4855_v39 }
 0x40b   : > { %4856 = vrcp.f32 %v1253_v42  ;;  %vm1261_vm14 = vmor %vm1259_vm13, %vm1260_vm12  ;;  %v1280_v58 = vand.u32 2147483648, %v1253_v42  ;;  %v1278_v60 = vand.u32 2147483647, %v1253_v42  ;;  %vm1274_vm2 = vweird.f32 %v1253_v42 }
 0x40c   : > { %v1256_v43 = vsub.f32 1.0, %v1255_v40 }
 0x40d   : > { %v1281_v62 = vor.u32 1.1754944e-38, %v1280_v58  ;;  %vm1279_vm4 = vcmp.eq.f32.partialorder %v1278_v60, 8.507059e+37 }
 0x40e   : > { %v1257_v46 = vmul.f32 %v4855_v39, %v1256_v43 }
 0x410   : > { %v1258_v49 = vadd.f32 %v4855_v39, %v1257_v46 }
 0x411   : > { %v4857_v50 = vpop.eup %4856 }
 0x412   : > { %v1270_v52 = vmul.f32 %v4857_v50, %v1253_v42  ;;  %v1262_v53 = vsel %vm1261_vm14, %v4855_v39, %v1258_v49  ;;  %vm1275_vm0 = vweird.f32 %v4857_v50 }
 0x413   : > { %v1267_v54 = vsel %vm1264_vm15, %v1266_v51, %v1262_v53  ;;  %vm1276_vm3 = vmor %vm1274_vm2, %vm1275_vm0 }
 0x414   : > { %v1271_v55 = vsub.f32 1.0, %v1270_v52  ;;  %v1268_v56 = vmul.f32 %v4851_v27, %v1267_v54 }
 0x415   : > { %v1816_v57 = vpop.permute.xlu0 %1815 }
 0x416   : > { %4576 = vmatmul.msk.f32.vlgmr.msrb.gmra.mxu3 %vm1234_vm10, %v1268_v56  ;;  %v1272_v59 = vmul.f32 %v4857_v50, %v1271_v55 }
 0x417   : > { %4592 = vmatpush.xpose.msk.msrb.mxu3 %vm1198_vm9, %v5901_v10 }
 0x418   : > { %v1273_v61 = vadd.f32 %v4857_v50, %v1272_v59 }
 0x41a   : > { %v1277_v44 = vsel %vm1276_vm3, %v4857_v50, %v1273_v61 }
 0x41b   : > { %4593 = vmatpush.xpose.msk.msrb.mxu3 %vm1198_vm9, %v5892_v3  ;;  %v1282_v63 = vsel %vm1279_vm4, %v1281_v62, %v1277_v44 }
 0x41c   : > { %v1283_v0 = vmul.f32 %v4853_v31, %v1282_v63 }
 0x41d   : > { %v1687_v2 = vpop.permute.xlu0 %1686 }
 0x41e   : > { %4577 = vmatmul.msk.f32.gmra.mxu3 %vm1234_vm10, %v1283_v0  ;;  %4601 = vmatmul.msk.f32.vlgmr.msrb.gmra.mxu1 %vm1198_vm9, %v1687_v2 }
 0x422   : > { %v1689_v4 = vpop.permute.xlu1 %1688 }
 0x425   : > { %v1812_v5 = vpop.permute.xlu0 %1811 }
 0x426   : > { %4580 = vmatmul.msk.f32.vlgmr.msra.gmra.mxu3 %vm1198_vm9, %v5896_v7  ;;  %4602 = vmatmul.msk.f32.gmra.mxu1 %vm1198_vm9, %v1689_v4  ;;  %v1935_v7 = vpop.permute.xlu2 %1934 }
 0x427   : > { %4606 = vmatpush.xpose.msk.msra.mxu3 %vm1198_vm9, %v1816_v57 }
 0x42a   : > { %v2062_v6 = vpop.permute.xlu1 %2061 }
 0x42b   : > { %4607 = vmatpush.xpose.msk.msra.mxu3 %vm1198_vm9, %v1814_v37 }
 0x42d   : > { %v1937_v3 = vpop.permute.xlu0 %1936 }
 0x42e   : > { %4581 = vmatmul.msk.f32.gmra.mxu3 %vm1198_vm9, %v5921_v18  ;;  %4614 = vmatpush.xpose.msk.msra.mxu1 %vm1198_vm9, %v1937_v3  ;;  %v1484_v32 = vpop.xlane.xlu2 %1483 }
 0x42f   : > { %v1486_v36 = vsub.f32 %v5925_v23, %v1484_v32 }
 0x432   : > { %v1933_v9 = vpop.permute.xlu1 %1932 }
 0x433   : > { %4615 = vmatmul.msk.f32.vlgmr.msra.gmra.mxu1 %vm1198_vm9, %v1933_v9 }
 0x435   : > { %v2056_v10 = vpop.permute.xlu0 %2055 }
 0x436   : > { %4594 = vmatmul.msk.f32.vlgmr.msrb.gmra.mxu3 %vm1198_vm9, %v5903_v11 }
 0x437   : > { %4620 = vmatpush.xpose.msk.msrb.mxu3 %vm1198_vm9, %v2062_v6 }
 0x43a   : > { %v2058_v12 = vpop.permute.xlu1 %2057 }
 0x43b   : > { %4621 = vmatpush.xpose.msk.msrb.mxu3 %vm1198_vm9, %v2060_v8  ;;  %4616 = vmatmul.msk.f32.gmra.mxu1 %vm1198_vm9, %v1935_v7 }
 0x43e   : > { %4595 = vmatmul.msk.f32.gmra.mxu3 %vm1198_vm9, %v5930_v30 }
 0x446   : > { %4608 = vmatmul.msk.f32.vlgmr.msra.gmra.mxu3 %vm1198_vm9, %v5934_v34 }
 0x44e   : > { %4609 = vmatmul.msk.f32.gmra.mxu3 %vm1198_vm9, %v1812_v5 }
 0x456   : > { %4622 = vmatmul.msk.f32.vlgmr.msrb.gmra.mxu3 %vm1198_vm9, %v2056_v10 }
 0x45e   : > { %4623 = vmatmul.msk.f32.gmra.mxu3 %vm1198_vm9, %v2058_v12 }
 0x465   : > { %v1481_v25 = vpop.xlane.xlu1 %1480 }
 0x466   : > { %v1485_v28 = vsub.f32 %v5923_v19, %v1481_v25  ;;  %v1489_v19 = vmul.f32 1.442695, %v1486_v36 }
 0x468   : > { %v1487_v31 = vmul.f32 1.442695, %v1485_v28 }
 0x499   : > { %v6004_v21 = vpop.f32.mrf.mxu3 }
 0x49b   : > { %v1719_v11 = vpop.f32.mrf.mxu1 }
 0x49c   : > { %v1725_v13 = vsel %vm1234_vm10, %v1719_v11, -inf }
 0x49d   : > { %1726 = vmax.xlane.f32.xlu0 %v1725_v13 }
 0x4a1   : > { %v6006_v22 = vpop.f32.mrf.mxu3 }
 0x4a3   : > { %v1722_v14 = vpop.f32.mrf.mxu1 }
 0x4a4   : > { %v1728_v15 = vsel %vm1238_vm11, %v1722_v14, -inf }
 0x4a5   : > { %1729 = vmax.xlane.f32.xlu1 %v1728_v15 }
 0x4a9   : > { %v6008_v24 = vpop.f32.mrf.mxu3 }
 0x4aa   : > { %v1355_v58 = vsel %vm1234_vm10, %v6008_v24, -inf }
 0x4b0   : > { %v1965_v16 = vpop.f32.mrf.mxu1 }
 0x4b1   : > { %v1971_v17 = vsel %vm1234_vm10, %v1965_v16, -inf  ;;  %v6011_v30 = vpop.f32.mrf.mxu3 }
 0x4b2   : > { %1972 = vmax.xlane.f32.xlu2 %v1971_v17  ;;  %v1358_v55 = vsel %vm1238_vm11, %v6011_v30, -inf }
 0x4b8   : > { %v5988_v18 = vpop.f32.mrf.mxu1 }
 0x4b9   : > { %v1974_v20 = vsel %vm1238_vm11, %v5988_v18, -inf  ;;  %v6018_v39 = vpop.f32.mrf.mxu3 }
 0x4ba   : > { %1975 = vmax.xlane.f32.xlu0 %v1974_v20  ;;  %v1602_v61 = vsel %vm1234_vm10, %v6018_v39, -inf }
 0x4be   : > { %1404 = vrot.lane.b32.xlu1 %v5853_v48, %s5493_s11 }
 0x4c1   : > { %v6030_v50 = vpop.f32.mrf.mxu3 }
 0x4c2   : > { %v1605_v51 = vsel %vm1238_vm11, %v6030_v50, -inf }
 0x4c6   : > { %1652 = vrot.lane.b32.xlu1 %v5867_v1, %s5492_s16 }
 0x4c9   : > { %v6055_v0 = vpop.f32.mrf.mxu3 }
 0x4ca   : > { %1527 = vrot.lane.b32.xlu2 %v5853_v48, %s5494_s21  ;;  %v1848_v3 = vsel %vm1234_vm10, %v6055_v0, -inf }
 0x4ce   : > { %1406 = vrot.lane.b32.xlu0 %v5867_v1, %s5493_s11 }
 0x4d1   : > { %v6059_v2 = vpop.f32.mrf.mxu3 }
 0x4d2   : > { %1650 = vrot.lane.b32.xlu2 %v5853_v48, %s5492_s16  ;;  %v1851_v9 = vsel %vm1238_vm11, %v6059_v2, -inf }
 0x4d6   : > { %1529 = vrot.lane.b32.xlu0 %v5867_v1, %s5494_s21 }
 0x4d9   : > { %v6061_v4 = vpop.f32.mrf.mxu3 }
 0x4da   : > { %v2094_v5 = vsel %vm1234_vm10, %v6061_v4, -inf }
 0x4e1   : > { %v6065_v6 = vpop.f32.mrf.mxu3 }
 0x4e2   : > { %v2097_v8 = vsel %vm1238_vm11, %v6065_v6, -inf }
 0x510   : > { %v1727_v26 = vpop.xlane.xlu0 %1726 }
 0x511   : > { %v1731_v27 = vsub.f32 %v1719_v11, %v1727_v26 }
 0x513   : > { %v1733_v29 = vmul.f32 1.442695, %v1731_v27 }
 0x515   : > { %4858 = vpow2.f32 %v1733_v29 }
 0x516   : > { %4860 = vpow2.f32 %v1487_v31 }
 0x518   : > { %v1730_v33 = vpop.xlane.xlu1 %1729 }
 0x519   : > { %v1732_v34 = vsub.f32 %v1722_v14, %v1730_v33 }
 0x51b   : > { %v6013_v35 = vpop.eup %4858  ;;  %v1735_v37 = vmul.f32 1.442695, %v1732_v34 }
 0x51c   : > { %v1737_v38 = vsel %vm1234_vm10, %v6013_v35, 0.0  ;;  %v6020_v40 = vpop.eup %4860 }
 0x51d   : > { %4862 = vpow2.f32 %v1735_v37  ;;  %1738 = vadd.xlane.f32.xlu2 %v1737_v38  ;;  %v1491_v23 = vsel %vm1234_vm10, %v6020_v40, 0.0 }
 0x51e   : > { %4864 = vpow2.f32 %v1489_v19 }
 0x523   : > { %v6022_v42 = vpop.eup %4862 }
 0x524   : > { %v1740_v43 = vsel %vm1238_vm11, %v6022_v42, 0.0  ;;  %v6028_v49 = vpop.eup %4864 }
 0x525   : > { %1741 = vadd.xlane.f32.xlu1 %v1740_v43  ;;  %1492 = vadd.xlane.f32.xlu2 %v1491_v23  ;;  %v1973_v45 = vpop.xlane.xlu2 %1972  ;;  %v1494_v52 = vsel %vm1238_vm11, %v6028_v49, 0.0 }
 0x526   : > { %v1977_v46 = vsub.f32 %v1965_v16, %v1973_v45 }
 0x528   : > { %v1979_v47 = vmul.f32 1.442695, %v1977_v46 }
 0x52a   : > { %4866 = vpow2.f32 %v1979_v47 }
 0x52d   : > { %1606 = vmax.xlane.f32.xlu1 %v1605_v51  ;;  %1495 = vadd.xlane.f32.xlu2 %v1494_v52  ;;  %v6042_v56 = vpop.xlane.xlu0 %1975  ;;  %v1528_v59 = vpop.permute.xlu2 %1527 }
 0x530   : > { %v6036_v53 = vpop.eup %4866  ;;  %v1405_v57 = vpop.permute.xlu1 %1404 }
 0x531   : > { %v1983_v54 = vsel %vm1234_vm10, %v6036_v53, 0.0 }
 0x532   : > { %1984 = vadd.xlane.f32.xlu0 %v1983_v54 }
 0x535   : > { %1359 = vmax.xlane.f32.xlu2 %v1358_v55  ;;  %v1651_v44 = vpop.permute.xlu2 %1650 }
 0x538   : > { %v1653_v62 = vpop.permute.xlu1 %1652 }
 0x53a   : > { %1356 = vmax.xlane.f32.xlu0 %v1355_v58 }
 0x540   : > { %v1407_v60 = vpop.permute.xlu0 %1406 }
 0x541   : > { %4582 = vmatpush.msk.msrb.mxu0 %vm1071_vm1, %v1407_v60 }
 0x542   : > { %1603 = vmax.xlane.f32.xlu0 %v1602_v61 }
 0x543   : > { %1432 = vmatpush.msrb.mxu0 %v1405_v57 }
 0x545   : > { %4596 = vmatpush.msk.msra.mxu0 %vm1071_vm1, %v1653_v62 }
 0x546   : > { %1773 = vrot.lane.b32.xlu1 %v5853_v48, %s5495_s9 }
 0x547   : > { %1678 = vmatpush.msra.mxu0 %v1651_v44 }
 0x548   : > { %v1530_v63 = vpop.permute.xlu0 %1529 }
 0x549   : > { %4589 = vmatpush.msk.msra.mxu2 %vm1071_vm1, %v1530_v63  ;;  %v1978_v63 = vsub.f32 %v5988_v18, %v6042_v56 }
 0x54b   : > { %1555 = vmatpush.msra.mxu2 %v1528_v59 }
 0x54d   : > { %1898 = vrot.lane.b32.xlu2 %v5867_v1, %s5496_s2 }
 0x556   : > { %1775 = vrot.lane.b32.xlu0 %v5867_v1, %s5495_s9 }
 0x570   : > { %2095 = vmax.xlane.f32.xlu1 %v2094_v5 }
 0x576   : > { %1849 = vmax.xlane.f32.xlu2 %v1848_v3 }
 0x578   : > { %2098 = vmax.xlane.f32.xlu1 %v2097_v8 }
 0x580   : > { %1852 = vmax.xlane.f32.xlu0 %v1851_v9  ;;  %v1981_v9 = vmul.f32 1.442695, %v1978_v63 }
 0x590   : > { %v6073_v7 = vpop.xlane.xlu2 %1738 }
 0x591   : > { %v1754_v56 = vand.u32 2147483648, %v6073_v7  ;;  %vm1748_vm2 = vweird.f32 %v6073_v7 }
 0x598   : > { %v1493_v10 = vpop.xlane.xlu2 %1492  ;;  %v6075_v14 = vpop.xlane.xlu1 %1741 }
 0x599   : > { %4868 = vrcp.f32 %v1493_v10  ;;  %v1508_v16 = vand.u32 2147483648, %v1493_v10  ;;  %v1506_v20 = vand.u32 2147483647, %v1493_v10  ;;  %vm1502_vm6 = vweird.f32 %v1493_v10 }
 0x59b   : > { %v1509_v28 = vor.u32 1.1754944e-38, %v1508_v16  ;;  %vm1507_vm8 = vcmp.eq.f32.partialorder %v1506_v20, 8.507059e+37 }
 0x59f   : > { %v4869_v12 = vpop.eup %4868 }
 0x5a0   : > { %v1496_v11 = vpop.xlane.xlu2 %1495  ;;  %v1498_v13 = vmul.f32 %v4869_v12, %v1493_v10  ;;  %vm1503_vm5 = vweird.f32 %v4869_v12  ;;  %v1607_v43 = vpop.xlane.xlu1 %1606 }
 0x5a1   : > { %4870 = vrcp.f32 %v1496_v11  ;;  %vm1504_vm7 = vmor %vm1502_vm6, %vm1503_vm5  ;;  %v1523_v19 = vand.u32 2147483648, %v1496_v11  ;;  %v1521_v46 = vand.u32 2147483647, %v1496_v11  ;;  %vm1517_vm13 = vweird.f32 %v1496_v11 }
 0x5a2   : > { %v1499_v15 = vsub.f32 1.0, %v1498_v13  ;;  %4872 = vrcp.f32 %v6073_v7  ;;  %v1609_v51 = vsub.f32 %v6030_v50, %v1607_v43  ;;  %vm1763_vm6 = vweird.f32 %v6075_v14 }
 0x5a3   : > { %v1524_v52 = vor.u32 1.1754944e-38, %v1523_v19  ;;  %vm1522_vm15 = vcmp.eq.f32.partialorder %v1521_v46, 8.507059e+37 }
 0x5a4   : > { %v1500_v17 = vmul.f32 %v4869_v12, %v1499_v15  ;;  %v1612_v60 = vmul.f32 1.442695, %v1609_v51 }
 0x5a5   : > { %v6077_v25 = vpop.xlane.xlu0 %1984 }
 0x5a6   : > { %v1501_v26 = vadd.f32 %v4869_v12, %v1500_v17  ;;  %v1752_v17 = vand.u32 2147483647, %v6073_v7 }
 0x5a7   : > { %v4871_v27 = vpop.eup %4870 }
 0x5a8   : > { %v1360_v29 = vpop.xlane.xlu2 %1359  ;;  %v1505_v31 = vsel %vm1504_vm7, %v4869_v12, %v1501_v26  ;;  %v1513_v32 = vmul.f32 %v4871_v27, %v1496_v11  ;;  %vm1518_vm12 = vweird.f32 %v4871_v27  ;;  %v4873_v55 = vpop.eup %4872  ;;  %vm1753_vm4 = vcmp.eq.f32.partialorder %v1752_v17, 8.507059e+37 }
 0x5a9   : > { %v1362_v33 = vsub.f32 %v6011_v30, %v1360_v29  ;;  %v1510_v34 = vsel %vm1507_vm8, %v1509_v28, %v1505_v31  ;;  %vm1519_vm14 = vmor %vm1517_vm13, %vm1518_vm12  ;;  %vm1749_vm0 = vweird.f32 %v4873_v55 }
 0x5aa   : > { %v1514_v36 = vsub.f32 1.0, %v1513_v32  ;;  %v1511_v38 = vmul.f32 %v6020_v40, %v1510_v34  ;;  %vm1750_vm3 = vmor %vm1748_vm2, %vm1749_vm0 }
 0x5ab   : > { %v1365_v37 = vmul.f32 1.442695, %v1362_v33  ;;  %v1769_v33 = vand.u32 2147483648, %v6075_v14 }
 0x5ac   : > { %v1515_v23 = vmul.f32 %v4871_v27, %v1514_v36  ;;  %4590 = vmatmul.msk.f32.vlgmr.msra.gmra.mxu2 %vm1234_vm10, %v1511_v38 }
 0x5ad   : > { %4874 = vpow2.f32 %v1365_v37  ;;  %v1357_v45 = vpop.xlane.xlu0 %1356  ;;  %v1767_v37 = vand.u32 2147483647, %v6075_v14  ;;  %v1770_v19 = vor.u32 1.1754944e-38, %v1769_v33 }
 0x5ae   : > { %v1361_v47 = vsub.f32 %v6008_v24, %v1357_v45  ;;  %v1516_v30 = vadd.f32 %v4871_v27, %v1515_v23  ;;  %v1744_v24 = vmul.f32 %v4873_v55, %v6073_v7 }
 0x5af   : > { %vm1768_vm8 = vcmp.eq.f32.partialorder %v1767_v37, 8.507059e+37 }
 0x5b0   : > { %v1363_v54 = vmul.f32 1.442695, %v1361_v47  ;;  %v1520_v40 = vsel %vm1519_vm14, %v4871_v27, %v1516_v30  ;;  %v1745_v5 = vsub.f32 1.0, %v1744_v24  ;;  %v1755_v27 = vor.u32 1.1754944e-38, %v1754_v56  ;;  %v6124_v45 = vpop.permute.xlu2 %1898 }
 0x5b1   : > { %v1525_v57 = vsel %vm1522_vm15, %v1524_v52, %v1520_v40 }
 0x5b2   : > { %4876 = vpow2.f32 %v1363_v54  ;;  %v1526_v59 = vmul.f32 %v6028_v49, %v1525_v57  ;;  %v1746_v10 = vmul.f32 %v4873_v55, %v1745_v5 }
 0x5b3   : > { %v6085_v58 = vpop.eup %4874  ;;  %4878 = vrcp.f32 %v6075_v14 }
 0x5b4   : > { %v1370_v50 = vsel %vm1238_vm11, %v6085_v58, 0.0  ;;  %4591 = vmatmul.msk.f32.gmra.mxu2 %vm1234_vm10, %v1526_v59  ;;  %4880 = vpow2.f32 %v1612_v60  ;;  %v1747_v13 = vadd.f32 %v4873_v55, %v1746_v10 }
 0x5b5   : > { %v1604_v61 = vpop.xlane.xlu0 %1603  ;;  %1371 = vadd.xlane.f32.xlu0 %v1370_v50 }
 0x5b6   : > { %v1608_v62 = vsub.f32 %v6018_v39, %v1604_v61  ;;  %v1751_v20 = vsel %vm1750_vm3, %v4873_v55, %v1747_v13 }
 0x5b7   : > { %v1756_v29 = vsel %vm1753_vm4, %v1755_v27, %v1751_v20 }
 0x5b8   : > { %v6094_v44 = vpop.eup %4876  ;;  %v1610_v49 = vmul.f32 1.442695, %v1608_v62  ;;  %v1774_v34 = vpop.permute.xlu1 %1773  ;;  %v1757_v36 = vmul.f32 %v6013_v35, %v1756_v29 }
 0x5b9   : > { %v4879_v3 = vpop.eup %4878  ;;  %v1367_v8 = vsel %vm1234_vm10, %v6094_v44, 0.0 }
 0x5ba   : > { %4882 = vpow2.f32 %v1610_v49  ;;  %1368 = vadd.xlane.f32.xlu2 %v1367_v8  ;;  %v1759_v12 = vmul.f32 %v4879_v3, %v6075_v14  ;;  %v6101_v11 = vpop.eup %4880  ;;  %vm1764_vm5 = vweird.f32 %v4879_v3 }
 0x5bb   : > { %4884 = vpow2.f32 %v1981_v9  ;;  %v1617_v15 = vsel %vm1238_vm11, %v6101_v11, 0.0  ;;  %vm1765_vm7 = vmor %vm1763_vm6, %vm1764_vm5 }
 0x5bc   : > { %v1760_v18 = vsub.f32 1.0, %v1759_v12 }
 0x5be   : > { %v1761_v26 = vmul.f32 %v4879_v3, %v1760_v18 }
 0x5c0   : > { %v6103_v39 = vpop.eup %4882  ;;  %v1762_v32 = vadd.f32 %v4879_v3, %v1761_v26 }
 0x5c1   : > { %v1614_v16 = vsel %vm1234_vm10, %v6103_v39, 0.0  ;;  %v6112_v28 = vpop.eup %4884 }
 0x5c2   : > { %1618 = vadd.xlane.f32.xlu2 %v1617_v15  ;;  %1615 = vadd.xlane.f32.xlu1 %v1614_v16  ;;  %v1986_v7 = vsel %vm1238_vm11, %v6112_v28, 0.0  ;;  %v1766_v38 = vsel %vm1765_vm7, %v4879_v3, %v1762_v32 }
 0x5c3   : > { %v1771_v43 = vsel %vm1768_vm8, %v1770_v19, %v1766_v38 }
 0x5c4   : > { %v1772_v23 = vmul.f32 %v6022_v42, %v1771_v43 }
 0x5c8   : > { %v1776_v31 = vpop.permute.xlu0 %1775 }
 0x5c9   : > { %4603 = vmatpush.msk.msrb.mxu2 %vm1071_vm1, %v1776_v31 }
 0x5ca   : > { %1987 = vadd.xlane.f32.xlu1 %v1986_v7 }
 0x5cb   : > { %1801 = vmatpush.msrb.mxu2 %v1774_v34 }
 0x5cc   : > { %4604 = vmatmul.msk.f32.vlgmr.msrb.gmra.mxu2 %vm1234_vm10, %v1757_v36 }
 0x5d4   : > { %4605 = vmatmul.msk.f32.gmra.mxu2 %vm1234_vm10, %v1772_v23 }
 0x5e3   : > { %2019 = vrot.lane.b32.xlu1 %v5853_v48, %s5497_s15  ;;  %v2096_v35 = vpop.xlane.xlu1 %2095 }
 0x5e4   : > { %v2100_v47 = vsub.f32 %v6061_v4, %v2096_v35 }
 0x5e6   : > { %v2102_v51 = vmul.f32 1.442695, %v2100_v47 }
 0x5e9   : > { %v1850_v46 = vpop.xlane.xlu2 %1849 }
 0x5ea   : > { %v1854_v14 = vsub.f32 %v6055_v0, %v1850_v46 }
 0x5eb   : > { %v2099_v24 = vpop.xlane.xlu1 %2098 }
 0x5ec   : > { %v1856_v30 = vmul.f32 1.442695, %v1854_v14  ;;  %v2101_v61 = vsub.f32 %v6065_v6, %v2099_v24 }
 0x5ee   : > { %4886 = vpow2.f32 %v1856_v30  ;;  %v2104_v63 = vmul.f32 1.442695, %v2101_v61 }
 0x5ef   : > { %4888 = vpow2.f32 %v2102_v51 }
 0x5f3   : > { %v1853_v52 = vpop.xlane.xlu0 %1852 }
 0x5f4   : > { %v6130_v54 = vpop.eup %4886  ;;  %v1855_v42 = vsub.f32 %v6059_v2, %v1853_v52 }
 0x5f5   : > { %v1860_v55 = vsel %vm1234_vm10, %v6130_v54, 0.0  ;;  %v6135_v57 = vpop.eup %4888 }
 0x5f6   : > { %v1858_v40 = vmul.f32 1.442695, %v1855_v42  ;;  %1861 = vadd.xlane.f32.xlu0 %v1860_v55  ;;  %v2106_v0 = vsel %vm1234_vm10, %v6135_v57, 0.0 }
 0x5f8   : > { %4890 = vpow2.f32 %v1858_v40 }
 0x5fe   : > { %v6139_v4 = vpop.eup %4890  ;;  %2107 = vadd.xlane.f32.xlu0 %v2106_v0 }
 0x5ff   : > { %v1863_v59 = vsel %vm1238_vm11, %v6139_v4, 0.0 }
 0x600   : > { %1864 = vadd.xlane.f32.xlu2 %v1863_v59 }
 0x612   : > { %2021 = vrot.lane.b32.xlu0 %v5867_v1, %s5497_s15 }
 0x618   : > { %1896 = vrot.lane.b32.xlu2 %v5853_v48, %s5496_s2 }
 0x61a   : > { %2144 = vrot.lane.b32.xlu0 %v5867_v1, %s5498_s5 }
 0x622   : > { %2142 = vrot.lane.b32.xlu0 %v5853_v48, %s5498_s5 }
 0x628   : > { %v1372_v2 = vpop.xlane.xlu0 %1371 }
 0x629   : > { %4892 = vrcp.f32 %v1372_v2  ;;  %v1399_v29 = vand.u32 2147483648, %v1372_v2  ;;  %vm1393_vm2 = vweird.f32 %v1372_v2  ;;  %v1397_v34 = vand.u32 2147483647, %v1372_v2 }
 0x62b   : > { %v1400_v19 = vor.u32 1.1754944e-38, %v1399_v29  ;;  %vm1398_vm4 = vcmp.eq.f32.partialorder %v1397_v34, 8.507059e+37 }
 0x62d   : > { %v1369_v60 = vpop.xlane.xlu2 %1368 }
 0x62e   : > { %4894 = vrcp.f32 %v1369_v60  ;;  %v1384_v10 = vand.u32 2147483648, %v1369_v60  ;;  %v1382_v13 = vand.u32 2147483647, %v1369_v60  ;;  %vm1378_vm13 = vweird.f32 %v1369_v60 }
 0x62f   : > { %v4893_v50 = vpop.eup %4892  ;;  %v1557_v16 = vpop.f32.mrf.mxu2 }
 0x630   : > { %v1389_v62 = vmul.f32 %v4893_v50, %v1372_v2  ;;  %v1385_v15 = vor.u32 1.1754944e-38, %v1384_v10  ;;  %vm1383_vm15 = vcmp.eq.f32.partialorder %v1382_v13, 8.507059e+37  ;;  %vm1394_vm0 = vweird.f32 %v4893_v50 }
 0x631   : > { %vm1395_vm3 = vmor %vm1393_vm2, %vm1394_vm0 }
 0x632   : > { %v1390_v8 = vsub.f32 1.0, %v1389_v62 }
 0x634   : > { %v4895_v5 = vpop.eup %4894  ;;  %v1391_v12 = vmul.f32 %v4893_v50, %v1390_v8 }
 0x635   : > { %v1374_v49 = vmul.f32 %v4895_v5, %v1369_v60  ;;  %v1616_v3 = vpop.xlane.xlu1 %1615  ;;  %v6152_v9 = vpop.xlane.xlu2 %1618  ;;  %vm1379_vm12 = vweird.f32 %v4895_v5 }
 0x636   : > { %4896 = vrcp.f32 %v1616_v3  ;;  %vm1380_vm14 = vmor %vm1378_vm13, %vm1379_vm12  ;;  %v1392_v26 = vadd.f32 %v4893_v50, %v1391_v12  ;;  %v1631_v46 = vand.u32 2147483648, %v1616_v3  ;;  %vm1625_vm6 = vweird.f32 %v1616_v3 }
 0x637   : > { %4898 = vpow2.f32 %v2104_v63  ;;  %v1375_v1 = vsub.f32 1.0, %v1374_v49  ;;  %v1629_v14 = vand.u32 2147483647, %v1616_v3  ;;  %v1646_v55 = vand.u32 2147483648, %v6152_v9 }
 0x638   : > { %4900 = vrcp.f32 %v6152_v9  ;;  %v1396_v38 = vsel %vm1395_vm3, %v4893_v50, %v1392_v26  ;;  %v1632_v52 = vor.u32 1.1754944e-38, %v1631_v46  ;;  %vm1640_vm13 = vweird.f32 %v6152_v9 }
 0x639   : > { %v1376_v48 = vmul.f32 %v4895_v5, %v1375_v1  ;;  %v1401_v43 = vsel %vm1398_vm4, %v1400_v19, %v1396_v38  ;;  %vm1630_vm8 = vcmp.eq.f32.partialorder %v1629_v14, 8.507059e+37  ;;  %v1644_v59 = vand.u32 2147483647, %v6152_v9 }
 0x63a   : > { %v1402_v47 = vmul.f32 %v6085_v58, %v1401_v43  ;;  %v1647_v2 = vor.u32 1.1754944e-38, %v1646_v55  ;;  %4902 = vrcp.f32 %v6077_v25  ;;  %v1998_v38 = vand.u32 2147483647, %v6077_v25 }
 0x63b   : > { %v1377_v18 = vadd.f32 %v4895_v5, %v1376_v48 }
 0x63c   : > { %v4897_v6 = vpop.eup %4896 }
 0x63d   : > { %v6155_v56 = vpop.eup %4898  ;;  %v1621_v17 = vmul.f32 %v4897_v6, %v1616_v3  ;;  %v1381_v20 = vsel %vm1380_vm14, %v4895_v5, %v1377_v18  ;;  %vm1626_vm5 = vweird.f32 %v4897_v6  ;;  %v6176_v63 = vpop.xlane.xlu1 %1987 }
 0x63e   : > { %v4901_v27 = vpop.eup %4900  ;;  %v1386_v32 = vsel %vm1383_vm15, %v1385_v15, %v1381_v20  ;;  %v2109_v33 = vsel %vm1238_vm11, %v6155_v56, 0.0  ;;  %vm1627_vm7 = vmor %vm1625_vm6, %vm1626_vm5  ;;  %vm1645_vm15 = vcmp.eq.f32.partialorder %v1644_v59, 8.507059e+37  ;;  %vm1994_vm6 = vweird.f32 %v6077_v25 }
 0x63f   : > { %v1622_v31 = vsub.f32 1.0, %v1621_v17  ;;  %v1387_v7 = vmul.f32 %v6094_v44, %v1386_v32  ;;  %v1636_v37 = vmul.f32 %v4901_v27, %v6152_v9  ;;  %v1560_v44 = vpop.f32.mrf.mxu2  ;;  %vm1641_vm12 = vweird.f32 %v4901_v27 }
 0x640   : > { %vm1642_vm14 = vmor %vm1640_vm13, %vm1641_vm12  ;;  %v4798_v60 = vpack.i.bf16 %v1560_v44, %v1557_v16  ;;  %v4903_v5 = vpop.eup %4902  ;;  %vm1999_vm13 = vcmp.eq.f32.partialorder %v1998_v38, 8.507059e+37  ;;  %v2015_v55 = vand.u32 2147483648, %v6176_v63 }
 0x641   : > { %2110 = vadd.xlane.f32.xlu2 %v2109_v33  ;;  %v1623_v36 = vmul.f32 %v4897_v6, %v1622_v31  ;;  %4583 = vmatmul.msk.f32.vlgmr.msrb.gmra.mxu0 %vm1234_vm10, %v1387_v7  ;;  %v1637_v35 = vsub.f32 1.0, %v1636_v37  ;;  %v1990_v3 = vmul.f32 %v4903_v5, %v6077_v25  ;;  %vm1995_vm5 = vweird.f32 %v4903_v5 }
 0x642   : > { %4610 = vmatpush.msk.msrb.mxu0 %vm1071_vm1, %v6124_v45 }
 0x643   : > { %v1624_v23 = vadd.f32 %v4897_v6, %v1623_v36  ;;  %v1638_v51 = vmul.f32 %v4901_v27, %v1637_v35  ;;  %v1991_v48 = vsub.f32 1.0, %v1990_v3  ;;  %v2000_v36 = vand.u32 2147483648, %v6077_v25 }
 0x645   : > { %v1628_v30 = vsel %vm1627_vm7, %v4897_v6, %v1624_v23  ;;  %v1639_v45 = vadd.f32 %v4901_v27, %v1638_v51  ;;  %v1992_v15 = vmul.f32 %v4903_v5, %v1991_v48  ;;  %vm1996_vm7 = vmor %vm1994_vm6, %vm1995_vm5  ;;  %v2001_v44 = vor.u32 1.1754944e-38, %v2000_v36  ;;  %v866_v36 = vld [vmem:[%s5702_s19 + $0x70] sm:$0xff] }
 0x646   : > { %v1633_v42 = vsel %vm1630_vm8, %v1632_v52, %v1628_v30 }
 0x647   : > { %v1634_v0 = vmul.f32 %v6103_v39, %v1633_v42  ;;  %v1643_v58 = vsel %vm1642_vm14, %v4901_v27, %v1639_v45  ;;  %v1993_v7 = vadd.f32 %v4903_v5, %v1992_v15 }
 0x648   : > { %v1648_v24 = vsel %vm1645_vm15, %v1647_v2, %v1643_v58  ;;  %v2013_v2 = vand.u32 2147483647, %v6176_v63 }
 0x649   : > { %4584 = vmatmul.msk.f32.gmra.mxu0 %vm1234_vm10, %v1402_v47  ;;  %v1649_v62 = vmul.f32 %v6101_v11, %v1648_v24  ;;  %v1997_v35 = vsel %vm1996_vm7, %v4903_v5, %v1993_v7 }
 0x64a   : > { %v2002_v51 = vsel %vm1999_vm13, %v2001_v44, %v1997_v35  ;;  %vm2014_vm5 = vcmp.eq.f32.partialorder %v2013_v2, 8.507059e+37  ;;  %v860_v35 = vld [vmem:[%s5702_s19 + $0x40] sm:$0xff]  ;;  %v858_v44 = vld [vmem:[%s5702_s19 + $0x30] sm:$0xff] }
 0x64b   : > { %v2003_v58 = vmul.f32 %v6036_v53, %v2002_v51  ;;  %v854_v51 = vld [vmem:[%s5702_s19 + $0x10] sm:$0xff] }
 0x64f   : > { %v1803_v40 = vpop.f32.mrf.mxu2 }
 0x651   : > { %4597 = vmatmul.msk.f32.vlgmr.msra.gmra.mxu0 %vm1234_vm10, %v1634_v0 }
 0x655   : > { %v2020_v0 = vpop.permute.xlu1 %2019 }
 0x657   : > { %v1806_v50 = vpop.f32.mrf.mxu2 }
 0x658   : > { %v4803_v61 = vpack.i.bf16 %v1806_v50, %v1803_v40 }
 0x659   : > { %4799 = vrot.lane.b32.xlu2 %v4798_v60, %s5497_s15  ;;  %4598 = vmatmul.msk.f32.gmra.mxu0 %vm1234_vm10, %v1649_v62  ;;  %v2016_v60 = vor.u32 1.1754944e-38, %v2015_v55 }
 0x65a   : > { %4804 = vrot.lane.b32.xlu1 %v4803_v61, %s5495_s9 }
 0x669   : > { %v1862_v39 = vpop.xlane.xlu0 %1861 }
 0x66a   : > { %4904 = vrcp.f32 %v1862_v39  ;;  %v1877_v10 = vand.u32 2147483648, %v1862_v39  ;;  %v1875_v18 = vand.u32 2147483647, %v1862_v39  ;;  %vm1871_vm2 = vweird.f32 %v1862_v39 }
 0x66b   : > { %4906 = vrcp.f32 %v6176_v63 }
 0x66c   : > { %v1878_v17 = vor.u32 1.1754944e-38, %v1877_v10  ;;  %vm1876_vm4 = vcmp.eq.f32.partialorder %v1875_v18, 8.507059e+37 }
 0x670   : > { %v4905_v49 = vpop.eup %4904 }
 0x671   : > { %v1867_v8 = vmul.f32 %v4905_v49, %v1862_v39  ;;  %v6180_v11 = vpop.xlane.xlu0 %2107  ;;  %v6182_v12 = vpop.eup %4906  ;;  %vm1872_vm0 = vweird.f32 %v4905_v49 }
 0x672   : > { %v2005_v16 = vmul.f32 %v6182_v12, %v6176_v63  ;;  %vm1873_vm3 = vmor %vm1871_vm2, %vm1872_vm0  ;;  %vm2010_vm0 = vweird.f32 %v6182_v12  ;;  %vm2009_vm2 = vweird.f32 %v6176_v63  ;;  %v2123_v50 = vand.u32 2147483648, %v6180_v11 }
 0x673   : > { %v1868_v9 = vsub.f32 1.0, %v1867_v8  ;;  %v1865_v1 = vpop.xlane.xlu2 %1864  ;;  %vm2117_vm6 = vweird.f32 %v6180_v11  ;;  %v2121_v53 = vand.u32 2147483647, %v6180_v11 }
 0x674   : > { %4908 = vrcp.f32 %v1865_v1  ;;  %v2006_v34 = vsub.f32 1.0, %v2005_v16  ;;  %v1892_v43 = vand.u32 2147483648, %v1865_v1  ;;  %vm1886_vm12 = vweird.f32 %v1865_v1 }
 0x675   : > { %v1869_v13 = vmul.f32 %v4905_v49, %v1868_v9  ;;  %4910 = vrcp.f32 %v6180_v11  ;;  %v2124_v5 = vor.u32 1.1754944e-38, %v2123_v50 }
 0x676   : > { %v2007_v46 = vmul.f32 %v6182_v12, %v2006_v34  ;;  %v1893_v30 = vor.u32 1.1754944e-38, %v1892_v43  ;;  %v867_v34 = vld [vmem:[%s5702_s19 + $0x78] sm:$0xff] }
 0x677   : > { %v1870_v6 = vadd.f32 %v4905_v49, %v1869_v13  ;;  %2254 = vmatpush.msrb.mxu1 %v867_v34  ;;  %v863_v43 = vld [vmem:[%s5702_s19 + $0x58] sm:$0xff]  ;;  %v988_v34 = vld [vmem:[%s5708_s22 + $0x3c0] sm:$0xff] }
 0x678   : > { %v2008_v45 = vadd.f32 %v6182_v12, %v2007_v46  ;;  %v859_v46 = vld [vmem:[%s5702_s19 + $0x38] sm:$0xff] }
 0x679   : > { %v1874_v20 = vsel %vm1873_vm3, %v4905_v49, %v1870_v6  ;;  %vm2011_vm3 = vmor %vm2009_vm2, %vm2010_vm0  ;;  %2255 = vmatpush.msrb.mxu1 %v866_v36  ;;  %vm2236_vm0 = vcmask 261120   ;;  %vm2239_vm2 = vcmask 392192   ;;  %v989_v36 = vld [vmem:[%s5708_s22 + $0x3c8] sm:$0xff] }
 0x67a   : > { %v4909_v26 = vpop.eup %4908  ;;  %v1879_v27 = vsel %vm1876_vm4, %v1878_v17, %v1874_v20  ;;  %v2012_v24 = vsel %vm2011_vm3, %v6182_v12, %v2008_v45  ;;  %vm2242_vm3 = vcmask 523264   ;;  %2376 = vmatpush.msra.mxu3 %v989_v36  ;;  %v876_v36 = vld [vmem:[%s5708_s22 + $0x40] sm:$0xff] }
 0x67b   : > { %v6187_v29 = vpop.eup %4910  ;;  %v1882_v31 = vmul.f32 %v4909_v26, %v1865_v1  ;;  %v1897_v32 = vpop.permute.xlu2 %1896  ;;  %v1880_v33 = vmul.f32 %v6130_v54, %v1879_v27  ;;  %vm1887_vm8 = vweird.f32 %v4909_v26  ;;  %v1890_v54 = vand.u32 2147483647, %v1865_v1 }
 0x67c   : > { %1924 = vmatpush.msrb.mxu0 %v1897_v32  ;;  %v2113_v19 = vmul.f32 %v6187_v29, %v6180_v11  ;;  %vm1888_vm14 = vmor %vm1886_vm12, %vm1887_vm8  ;;  %vm2118_vm4 = vweird.f32 %v6187_v29  ;;  %v2017_v61 = vsel %vm2014_vm5, %v2016_v60, %v2012_v24  ;;  %vm2122_vm8 = vcmp.eq.f32.partialorder %v2121_v53, 8.507059e+37 }
 0x67d   : > { %v1883_v37 = vsub.f32 1.0, %v1882_v31  ;;  %4611 = vmatmul.msk.f32.vlgmr.msrb.gmra.mxu0 %vm1234_vm10, %v1880_v33  ;;  %vm1891_vm15 = vcmp.eq.f32.partialorder %v1890_v54, 8.507059e+37  ;;  %vm2119_vm7 = vmor %vm2117_vm6, %vm2118_vm4  ;;  %v2018_v63 = vmul.f32 %v6112_v28, %v2017_v61  ;;  %v861_v54 = vld [vmem:[%s5702_s19 + $0x48] sm:$0xff]  ;;  %vm2245_vm4 = vcmask 654336  }
 0x67e   : > { %v2114_v47 = vsub.f32 1.0, %v2113_v19  ;;  %v864_v19 = vld [vmem:[%s5702_s19 + $0x60] sm:$0xff]  ;;  %vm2248_vm5 = vcmask 785408   ;;  %vm7409_vm6 = vcmask 916480  }
 0x67f   : > { %v1884_v23 = vmul.f32 %v4909_v26, %v1883_v37  ;;  %v865_v37 = vld [vmem:[%s5702_s19 + $0x68] sm:$0xff] }
 0x680   : > { %v2115_v59 = vmul.f32 %v6187_v29, %v2114_v47  ;;  %2256 = vmatpush.msrb.mxu1 %v865_v37  ;;  %v856_v47 = vld [vmem:[%s5702_s19 + $0x20] sm:$0xff]  ;;  %v990_v37 = vld [vmem:[%s5708_s22 + $0x3d0] sm:$0xff] }
 0x681   : > { %v1885_v14 = vadd.f32 %v4909_v26, %v1884_v23  ;;  %v862_v23 = vld [vmem:[%s5702_s19 + $0x50] sm:$0xff] }
 0x682   : > { %2257 = vmatpush.msrb.mxu1 %v864_v19  ;;  %v980_v19 = vld [vmem:[%s5708_s22 + $0x380] sm:$0xff] }
 0x683   : > { %v1889_v25 = vsel %vm1888_vm14, %v4909_v26, %v1885_v14  ;;  %v857_v14 = vld [vmem:[%s5702_s19 + $0x28] sm:$0xff] }
 0x684   : > { %v2022_v52 = vpop.permute.xlu0 %2021  ;;  %v1894_v42 = vsel %vm1891_vm15, %v1893_v30, %v1889_v25  ;;  %2258 = vmatpush.msrb.mxu1 %v863_v43  ;;  %v855_v30 = vld [vmem:[%s5702_s19 + $0x18] sm:$0xff]  ;;  %v853_v25 = vld [vmem:[%s5702_s19 + $0x8] sm:$0xff] }
 0x685   : > { %4617 = vmatpush.msk.msra.mxu2 %vm1071_vm1, %v2022_v52  ;;  %v1895_v40 = vmul.f32 %v6139_v4, %v1894_v42  ;;  %v2116_v4 = vadd.f32 %v6187_v29, %v2115_v59  ;;  %v852_v52 = vld [vmem:[%s5702_s19] sm:$0xff]  ;;  %v981_v43 = vld [vmem:[%s5708_s22 + $0x388] sm:$0xff] }
 0x686   : > { %2259 = vmatpush.msrb.mxu1 %v862_v23  ;;  %v982_v23 = vld [vmem:[%s5708_s22 + $0x390] sm:$0xff]  ;;  %2377 = vmatpush.msra.mxu3 %v981_v43  ;;  %v868_v43 = vld [vmem:[%s5708_s22] sm:$0xff] }
 0x687   : > { %4612 = vmatmul.msk.f32.gmra.mxu0 %vm1234_vm10, %v1895_v40  ;;  %2047 = vmatpush.msra.mxu2 %v2020_v0  ;;  %v2120_v39 = vsel %vm2119_vm7, %v6187_v29, %v2116_v4 }
 0x688   : > { %4618 = vmatmul.msk.f32.vlgmr.msra.gmra.mxu2 %vm1234_vm10, %v2003_v58  ;;  %v2125_v49 = vsel %vm2122_vm8, %v2124_v5, %v2120_v39  ;;  %2260 = vmatpush.msrb.mxu1 %v861_v54  ;;  %v983_v54 = vld [vmem:[%s5708_s22 + $0x398] sm:$0xff] }
 0x689   : > { %v2126_v8 = vmul.f32 %v6135_v57, %v2125_v49  ;;  %2353 = vmatpush.msrb.mxu2 %v988_v34  ;;  %v887_v34 = vld [vmem:[%s5708_s22 + $0x98] sm:$0xff] }
 0x68a   : > { %2261 = vmatpush.msrb.mxu1 %v860_v35 }
 0x68b   : > { %2354 = vmatpush.msrb.mxu2 %v980_v19  ;;  %v879_v19 = vld [vmem:[%s5708_s22 + $0x58] sm:$0xff] }
 0x68c   : > { %v2145_v62 = vpop.permute.xlu0 %2144  ;;  %2262 = vmatpush.msrb.mxu1 %v859_v46 }
 0x68d   : > { %4624 = vmatpush.msk.msra.mxu0 %vm1071_vm1, %v2145_v62 }
 0x68e   : > { %2263 = vmatpush.msrb.mxu1 %v858_v44 }
 0x690   : > { %4619 = vmatmul.msk.f32.gmra.mxu2 %vm1234_vm10, %v2018_v63  ;;  %2264 = vmatpush.msrb.mxu1 %v857_v14 }
 0x692   : > { %2265 = vmatpush.msrb.mxu1 %v856_v47 }
 0x694   : > { %v2143_v3 = vpop.permute.xlu0 %2142  ;;  %2266 = vmatpush.msrb.mxu1 %v855_v30  ;;  %v972_v30 = vld [vmem:[%s5708_s22 + $0x340] sm:$0xff] }
 0x695   : > { %2170 = vmatpush.msra.mxu0 %v2143_v3  ;;  %2355 = vmatpush.msrb.mxu2 %v972_v30 }
 0x696   : > { %4625 = vmatmul.msk.f32.vlgmr.msra.gmra.mxu0 %vm1234_vm10, %v2126_v8  ;;  %2267 = vmatpush.msrb.mxu1 %v854_v51  ;;  %v973_v51 = vld [vmem:[%s5708_s22 + $0x348] sm:$0xff] }
 0x697   : > { %2399 = vmatpush.msrb.mxu0 %v990_v37  ;;  %2378 = vmatpush.msra.mxu3 %v973_v51  ;;  %v877_v37 = vld [vmem:[%s5708_s22 + $0x48] sm:$0xff] }
 0x698   : > { %2268 = vmatpush.msrb.mxu1 %v853_v25  ;;  %v974_v25 = vld [vmem:[%s5708_s22 + $0x350] sm:$0xff] }
 0x699   : > { %2400 = vmatpush.msrb.mxu0 %v982_v23  ;;  %v869_v23 = vld [vmem:[%s5708_s22 + $0x8] sm:$0xff] }
 0x69a   : > { %2269 = vmatpush.msrb.mxu1 %v852_v52  ;;  %v975_v52 = vld [vmem:[%s5708_s22 + $0x358] sm:$0xff] }
 0x69b   : > { %2401 = vmatpush.msrb.mxu0 %v974_v25 }
 0x6b4   : > { %v2111_v11 = vpop.xlane.xlu2 %2110 }
 0x6b5   : > { %4912 = vrcp.f32 %v2111_v11  ;;  %v2138_v10 = vand.u32 2147483648, %v2111_v11  ;;  %v2136_v28 = vand.u32 2147483647, %v2111_v11  ;;  %vm2132_vm13 = vweird.f32 %v2111_v11 }
 0x6b7   : > { %v2139_v6 = vor.u32 1.1754944e-38, %v2138_v10  ;;  %vm2137_vm15 = vcmp.eq.f32.partialorder %v2136_v28, 8.507059e+37 }
 0x6bb   : > { %v4913_v9 = vpop.eup %4912 }
 0x6bc   : > { %v2128_v1 = vmul.f32 %v4913_v9, %v2111_v11  ;;  %vm2133_vm12 = vweird.f32 %v4913_v9  ;;  %v4800_v0 = vpop.permute.xlu2 %4799 }
 0x6bd   : > { %vm2134_vm14 = vmor %vm2132_vm13, %vm2133_vm12  ;;  %v4801_v2 = vunpack.i.l.bf16 %v4800_v0  ;;  %v4802_v8 = vunpack.i.h.bf16 %v4800_v0  ;;  %v956_v0 = vld [vmem:[%s5708_s22 + $0x2c0] sm:$0xff] }
 0x6be   : > { %v2129_v48 = vsub.f32 1.0, %v2128_v1  ;;  %v1434_v12 = vpop.f32.mrf.mxu0 }
 0x6c0   : > { %v2130_v13 = vmul.f32 %v4913_v9, %v2129_v48 }
 0x6c2   : > { %v2131_v18 = vadd.f32 %v4913_v9, %v2130_v13 }
 0x6c4   : > { %v2135_v15 = vsel %vm2134_vm14, %v4913_v9, %v2131_v18 }
 0x6c5   : > { %v2140_v57 = vsel %vm2137_vm15, %v2139_v6, %v2135_v15  ;;  %v4840_v6 = vld [vmem:[%s5732_s27] ss:$0 sm:$0xff] }
 0x6c6   : > { %v2141_v16 = vmul.f32 %v6155_v56, %v2140_v57  ;;  %v1437_v17 = vpop.f32.mrf.mxu0  ;;  %v5022_v57 = vld [vmem:[%s5760_s13] sm:$0xff] }
 0x6c7   : > { %v4808_v20 = vpack.i.bf16 %v1437_v17, %v1434_v12 }
 0x6c8   : > { %4626 = vmatmul.msk.f32.gmra.mxu0 %vm1234_vm10, %v2141_v16 }
 0x6c9   : > { %4809 = vrot.lane.b32.xlu1 %v4808_v20, %s5498_s5 }
 0x6cc   : > { %v4805_v42 = vpop.permute.xlu1 %4804 }
 0x6cd   : > { %v4806_v50 = vunpack.i.l.bf16 %v4805_v42  ;;  %v4807_v1 = vunpack.i.h.bf16 %v4805_v42  ;;  %v964_v42 = vld [vmem:[%s5708_s22 + $0x300] sm:$0xff] }
 0x6ce   : > { %v1680_v26 = vpop.f32.mrf.mxu0  ;;  %2356 = vmatpush.msrb.mxu2 %v964_v42 }
 0x6d0   : > { %2357 = vmatpush.msrb.mxu2 %v956_v0  ;;  %v6354_v0 = vld [vmem:[%s5745_s14] ss:$0 sm:$0xff] }
 0x6d6   : > { %v1683_v27 = vpop.f32.mrf.mxu0 }
 0x6d7   : > { %v4813_v29 = vpack.i.bf16 %v1683_v27, %v1680_v26  ;;  %v5023_v26 = vld [vmem:[%s5760_s13 + $0x8] sm:$0x1] }
 0x6d9   : > { %4814 = vrot.lane.b32.xlu0 %v4813_v29, %s5496_s2 }
 0x6fa   : > { %v1926_v31 = vpop.f32.mrf.mxu0 }
 0x6fb   : > { %2212 = vrot.lane.b32.xlu0 %v1926_v31, %s5492_s16 }
 0x704   : > { %v1929_v32 = vpop.f32.mrf.mxu0 }
 0x70b   : > { %v2049_v56 = vpop.f32.mrf.mxu2 }
 0x70c   : > { %2220 = vrot.lane.b32.xlu1 %v2049_v56, %s5494_s21 }
 0x713   : > { %v2052_v33 = vpop.f32.mrf.mxu2  ;;  %v2172_v7 = vpop.f32.mrf.mxu0 }
 0x714   : > { %2222 = vrot.lane.b32.xlu2 %v2052_v33, %s5494_s21  ;;  %2214 = vrot.lane.b32.xlu1 %v1929_v32, %s5492_s16 }
 0x715   : > { %2228 = vrot.lane.b32.xlu0 %v2172_v7, %s5493_s11 }
 0x73b   : > { %v4810_v45 = vpop.permute.xlu1 %4809 }
 0x73c   : > { %v4811_v40 = vunpack.i.l.bf16 %v4810_v45  ;;  %v4812_v5 = vunpack.i.h.bf16 %v4810_v45  ;;  %v965_v45 = vld [vmem:[%s5708_s22 + $0x308] sm:$0xff] }
 0x73d   : > { %2379 = vmatpush.msra.mxu3 %v965_v45 }
 0x73e   : > { %v2234_v59 = vsel %vm1198_vm9, %v6004_v21, %v4811_v40  ;;  %v2235_v49 = vsel %vm1198_vm9, %v6006_v22, %v4812_v5  ;;  %v967_v40 = vld [vmem:[%s5708_s22 + $0x318] sm:$0xff]  ;;  %v934_v5 = vld [vmem:[%s5708_s22 + $0x210] sm:$0xff] }
 0x73f   : > { %v2237_v60 = vsel %vm2236_vm0, %v2234_v59, %v4801_v2  ;;  %v2238_v11 = vsel %vm2236_vm0, %v2235_v49, %v4802_v8  ;;  %v957_v59 = vld [vmem:[%s5708_s22 + $0x2c8] sm:$0xff]  ;;  %v959_v2 = vld [vmem:[%s5708_s22 + $0x2d8] sm:$0xff] }
 0x740   : > { %2380 = vmatpush.msra.mxu3 %v957_v59  ;;  %v935_v49 = vld [vmem:[%s5708_s22 + $0x218] sm:$0xff]  ;;  %v925_v8 = vld [vmem:[%s5708_s22 + $0x1c8] sm:$0xff] }
 0x745   : > { %v2175_v38 = vpop.f32.mrf.mxu0 }
 0x746   : > { %2230 = vrot.lane.b32.xlu0 %v2175_v38, %s5493_s11  ;;  %v991_v38 = vld [vmem:[%s5708_s22 + $0x3d8] sm:$0xff] }
 0x747   : > { %2422 = vmatpush.msra.mxu1 %v991_v38  ;;  %v878_v38 = vld [vmem:[%s5708_s22 + $0x50] sm:$0xff] }
 0x749   : > { %2423 = vmatpush.msra.mxu1 %v983_v54  ;;  %v870_v54 = vld [vmem:[%s5708_s22 + $0x10] sm:$0xff] }
 0x74b   : > { %v4815_v55 = vpop.permute.xlu0 %4814  ;;  %2424 = vmatpush.msra.mxu1 %v975_v52 }
 0x74c   : > { %v4816_v58 = vunpack.i.l.bf16 %v4815_v55  ;;  %v4817_v3 = vunpack.i.h.bf16 %v4815_v55  ;;  %v966_v55 = vld [vmem:[%s5708_s22 + $0x310] sm:$0xff] }
 0x74d   : > { %2402 = vmatpush.msrb.mxu0 %v966_v55  ;;  %2425 = vmatpush.msra.mxu1 %v967_v40  ;;  %v6351_v55 = vld [vmem:[%s5740_s0] ss:$0 sm:$0xff] }
 0x74e   : > { %v2240_v4 = vsel %vm2239_vm2, %v2237_v60, %v4816_v58  ;;  %v2241_v9 = vsel %vm2239_vm2, %v2238_v11, %v4817_v3  ;;  %v958_v58 = vld [vmem:[%s5708_s22 + $0x2d0] sm:$0xff]  ;;  %v949_v60 = vld [vmem:[%s5708_s22 + $0x288] sm:$0xff]  ;;  %v924_v3 = vld [vmem:[%s5708_s22 + $0x1c0] sm:$0xff] }
 0x74f   : > { %v2243_v53 = vsel %vm2242_vm3, %v2240_v4, %v4806_v50  ;;  %v2244_v10 = vsel %vm2242_vm3, %v2241_v9, %v4807_v1  ;;  %2403 = vmatpush.msrb.mxu0 %v958_v58  ;;  %2426 = vmatpush.msra.mxu1 %v959_v2  ;;  %v950_v4 = vld [vmem:[%s5708_s22 + $0x290] sm:$0xff]  ;;  %v951_v50 = vld [vmem:[%s5708_s22 + $0x298] sm:$0xff]  ;;  %v916_v1 = vld [vmem:[%s5708_s22 + $0x180] sm:$0xff] }
 0x750   : > { %2381 = vmatpush.msra.mxu3 %v949_v60  ;;  %v926_v11 = vld [vmem:[%s5708_s22 + $0x1d0] sm:$0xff]  ;;  %v927_v9 = vld [vmem:[%s5708_s22 + $0x1d8] sm:$0xff]  ;;  %v992_v2 = vld [vmem:[%s5708_s22 + $0x3e0] sm:$0xff] }
 0x751   : > { %2404 = vmatpush.msrb.mxu0 %v950_v4  ;;  %2427 = vmatpush.msra.mxu1 %v951_v50  ;;  %v994_v60 = vld [vmem:[%s5708_s22 + $0x3f0] sm:$0xff]  ;;  %v995_v50 = vld [vmem:[%s5708_s22 + $0x3f8] sm:$0xff] }
 0x76d   : > { %v2213_v24 = vpop.permute.xlu0 %2212 }
 0x76e   : > { %v2246_v62 = vsel %vm2245_vm4, %v2243_v53, %v2213_v24  ;;  %v2223_v13 = vpop.permute.xlu2 %2222  ;;  %v948_v24 = vld [vmem:[%s5708_s22 + $0x280] sm:$0xff]  ;;  %v941_v53 = vld [vmem:[%s5708_s22 + $0x248] sm:$0xff] }
 0x76f   : > { %2358 = vmatpush.msrb.mxu2 %v948_v24  ;;  %2382 = vmatpush.msra.mxu3 %v941_v53  ;;  %v993_v24 = vld [vmem:[%s5708_s22 + $0x3e8] sm:$0xff]  ;;  %v986_v53 = vld [vmem:[%s5708_s22 + $0x3b0] sm:$0xff] }
 0x77e   : > { %v2221_v61 = vpop.permute.xlu1 %2220 }
 0x77f   : > { %v2249_v21 = vsel %vm2248_vm5, %v2246_v62, %v2221_v61  ;;  %v940_v61 = vld [vmem:[%s5708_s22 + $0x240] sm:$0xff]  ;;  %v942_v62 = vld [vmem:[%s5708_s22 + $0x250] sm:$0xff] }
 0x780   : > { %2359 = vmatpush.msrb.mxu2 %v940_v61  ;;  %2405 = vmatpush.msrb.mxu0 %v942_v62  ;;  %v984_v61 = vld [vmem:[%s5708_s22 + $0x3a0] sm:$0xff]  ;;  %v987_v62 = vld [vmem:[%s5708_s22 + $0x3b8] sm:$0xff] }
 0x782   : > { %2406 = vmatpush.msrb.mxu0 %v934_v5  ;;  %v979_v5 = vld [vmem:[%s5708_s22 + $0x378] sm:$0xff] }
 0x784   : > { %2407 = vmatpush.msrb.mxu0 %v926_v11  ;;  %v971_v11 = vld [vmem:[%s5708_s22 + $0x338] sm:$0xff] }
 0x786   : > { %v2215_v48 = vpop.permute.xlu1 %2214 }
 0x787   : > { %v2229_v39 = vpop.permute.xlu0 %2228  ;;  %v2247_v12 = vsel %vm2245_vm4, %v2244_v10, %v2215_v48  ;;  %v917_v48 = vld [vmem:[%s5708_s22 + $0x188] sm:$0xff]  ;;  %v918_v10 = vld [vmem:[%s5708_s22 + $0x190] sm:$0xff] }
 0x788   : > { %v2252_v63 = vsel %vm7409_vm6, %v2249_v21, %v2229_v39  ;;  %v2250_v18 = vsel %vm2248_vm5, %v2247_v12, %v2223_v13  ;;  %v943_v21 = vld [vmem:[%s5708_s22 + $0x258] sm:$0xff]  ;;  %v932_v39 = vld [vmem:[%s5708_s22 + $0x200] sm:$0xff]  ;;  %2408 = vmatpush.msrb.mxu0 %v918_v10 }
 0x789   : > { %2270 = vmatmul.f32.vlgmr.msrb.gmra.mxu1 %v2252_v63  ;;  %v933_v63 = vld [vmem:[%s5708_s22 + $0x208] sm:$0xff]  ;;  %2360 = vmatpush.msrb.mxu2 %v932_v39  ;;  %v919_v12 = vld [vmem:[%s5708_s22 + $0x198] sm:$0xff]  ;;  %v908_v13 = vld [vmem:[%s5708_s22 + $0x140] sm:$0xff] }
 0x78a   : > { %2428 = vmatpush.msra.mxu1 %v943_v21  ;;  %2383 = vmatpush.msra.mxu3 %v933_v63  ;;  %v976_v21 = vld [vmem:[%s5708_s22 + $0x360] sm:$0xff]  ;;  %v977_v39 = vld [vmem:[%s5708_s22 + $0x368] sm:$0xff]  ;;  %v978_v63 = vld [vmem:[%s5708_s22 + $0x370] sm:$0xff] }
 0x78b   : > { %2361 = vmatpush.msrb.mxu2 %v924_v3  ;;  %v969_v3 = vld [vmem:[%s5708_s22 + $0x328] sm:$0xff]  ;;  %v963_v10 = vld [vmem:[%s5708_s22 + $0x2f8] sm:$0xff] }
 0x78c   : > { %2429 = vmatpush.msra.mxu1 %v935_v49  ;;  %2384 = vmatpush.msra.mxu3 %v925_v8  ;;  %v968_v49 = vld [vmem:[%s5708_s22 + $0x320] sm:$0xff]  ;;  %v970_v8 = vld [vmem:[%s5708_s22 + $0x330] sm:$0xff] }
 0x78d   : > { %2362 = vmatpush.msrb.mxu2 %v916_v1  ;;  %v961_v1 = vld [vmem:[%s5708_s22 + $0x2e8] sm:$0xff] }
 0x78e   : > { %2430 = vmatpush.msra.mxu1 %v927_v9  ;;  %2385 = vmatpush.msra.mxu3 %v917_v48  ;;  %v960_v9 = vld [vmem:[%s5708_s22 + $0x2e0] sm:$0xff]  ;;  %v962_v48 = vld [vmem:[%s5708_s22 + $0x2f0] sm:$0xff] }
 0x78f   : > { %2363 = vmatpush.msrb.mxu2 %v908_v13  ;;  %v953_v13 = vld [vmem:[%s5708_s22 + $0x2a8] sm:$0xff] }
 0x790   : > { %2431 = vmatpush.msra.mxu1 %v919_v12  ;;  %v952_v12 = vld [vmem:[%s5708_s22 + $0x2a0] sm:$0xff] }
 0x7b8   : > { %v2231_v28 = vpop.permute.xlu0 %2230 }
 0x7b9   : > { %v2253_v22 = vsel %vm7409_vm6, %v2250_v18, %v2231_v28  ;;  %v909_v28 = vld [vmem:[%s5708_s22 + $0x148] sm:$0xff]  ;;  %v910_v18 = vld [vmem:[%s5708_s22 + $0x150] sm:$0xff] }
 0x7ba   : > { %2273 = vmatmul.f32.gmra.mxu1 %v2253_v22  ;;  %2386 = vmatpush.msra.mxu3 %v909_v28  ;;  %v911_v22 = vld [vmem:[%s5708_s22 + $0x158] sm:$0xff]  ;;  %v954_v28 = vld [vmem:[%s5708_s22 + $0x2b0] sm:$0xff] }
 0x7bb   : > { %2409 = vmatpush.msrb.mxu0 %v910_v18  ;;  %2432 = vmatpush.msra.mxu1 %v911_v22  ;;  %v955_v18 = vld [vmem:[%s5708_s22 + $0x2b8] sm:$0xff]  ;;  %v944_v22 = vld [vmem:[%s5708_s22 + $0x260] sm:$0xff] }
 0x806   : > { %v2271_v15 = vpop.f32.mrf.mxu1 }
 0x807   : > { %v2277_v16 = vadd.f32 %v5022_v57, %v2271_v15  ;;  %v901_v15 = vld [vmem:[%s5708_s22 + $0x108] sm:$0xff]  ;;  %v902_v57 = vld [vmem:[%s5708_s22 + $0x110] sm:$0xff] }
 0x808   : > { %2387 = vmatpush.msra.mxu3 %v901_v15  ;;  %2410 = vmatpush.msrb.mxu0 %v902_v57  ;;  %v946_v15 = vld [vmem:[%s5708_s22 + $0x270] sm:$0xff]  ;;  %v947_v57 = vld [vmem:[%s5708_s22 + $0x278] sm:$0xff] }
 0x809   : > { %v6264_v17 = vadd.f32 %v4840_v6, %v2277_v16  ;;  %v903_v16 = vld [vmem:[%s5708_s22 + $0x118] sm:$0xff] }
 0x80a   : > { %2433 = vmatpush.msra.mxu1 %v903_v16  ;;  %v936_v16 = vld [vmem:[%s5708_s22 + $0x220] sm:$0xff] }
 0x80b   : > { %2284 = vadd.xlane.f32.xlu1 %v6264_v17 }
 0x837   : > { %v2274_v20 = vpop.f32.mrf.mxu1 }
 0x838   : > { %v2278_v27 = vadd.f32 %v5023_v26, %v2274_v20  ;;  %v892_v20 = vld [vmem:[%s5708_s22 + $0xc0] sm:$0xff]  ;;  %v893_v26 = vld [vmem:[%s5708_s22 + $0xc8] sm:$0xff] }
 0x839   : > { %2388 = vmatpush.msra.mxu3 %v893_v26  ;;  %v938_v26 = vld [vmem:[%s5708_s22 + $0x230] sm:$0xff] }
 0x83a   : > { %v6268_v29 = vadd.f32 %v4840_v6, %v2278_v27  ;;  %v900_v6 = vld [vmem:[%s5708_s22 + $0x100] sm:$0xff]  ;;  %v894_v27 = vld [vmem:[%s5708_s22 + $0xd0] sm:$0xff] }
 0x83b   : > { %2364 = vmatpush.msrb.mxu2 %v900_v6  ;;  %2411 = vmatpush.msrb.mxu0 %v894_v27  ;;  %v945_v6 = vld [vmem:[%s5708_s22 + $0x268] sm:$0xff]  ;;  %v939_v27 = vld [vmem:[%s5708_s22 + $0x238] sm:$0xff] }
 0x83c   : > { %v2286_v31 = vsel %vm1071_vm1, %v6268_v29, 0.0 }
 0x83d   : > { %2287 = vadd.xlane.f32.xlu2 %v2286_v31  ;;  %2365 = vmatpush.msrb.mxu2 %v892_v20  ;;  %v895_v31 = vld [vmem:[%s5708_s22 + $0xd8] sm:$0xff]  ;;  %v937_v20 = vld [vmem:[%s5708_s22 + $0x228] sm:$0xff] }
 0x83e   : > { %2434 = vmatpush.msra.mxu1 %v895_v31  ;;  %v928_v31 = vld [vmem:[%s5708_s22 + $0x1e0] sm:$0xff] }
 0x840   : > { %2435 = vmatpush.msra.mxu1 %v887_v34  ;;  %v920_v34 = vld [vmem:[%s5708_s22 + $0x1a0] sm:$0xff] }
 0x842   : > { %2436 = vmatpush.msra.mxu1 %v879_v19  ;;  %v912_v19 = vld [vmem:[%s5708_s22 + $0x160] sm:$0xff] }
 0x87e   : > { %v2285_v32 = vpop.xlane.xlu1 %2284 }
 0x87f   : > { %v2289_v56 = vmul.f32 %v2285_v32, %v5779_v41  ;;  %v884_v32 = vld [vmem:[%s5708_s22 + $0x80] sm:$0xff] }
 0x880   : > { %2366 = vmatpush.msrb.mxu2 %v884_v32  ;;  %v929_v32 = vld [vmem:[%s5708_s22 + $0x1e8] sm:$0xff] }
 0x881   : > { %v6274_v33 = vsub.f32 %v6264_v17, %v2289_v56  ;;  %v885_v56 = vld [vmem:[%s5708_s22 + $0x88] sm:$0xff] }
 0x882   : > { %2389 = vmatpush.msra.mxu3 %v885_v56  ;;  %2367 = vmatpush.msrb.mxu2 %v876_v36  ;;  %v930_v56 = vld [vmem:[%s5708_s22 + $0x1f0] sm:$0xff]  ;;  %v921_v36 = vld [vmem:[%s5708_s22 + $0x1a8] sm:$0xff] }
 0x883   : > { %v2293_v7 = vmul.f32 %v6274_v33, %v6274_v33 }
 0x884   : > { %2390 = vmatpush.msra.mxu3 %v877_v37  ;;  %2368 = vmatpush.msrb.mxu2 %v868_v43  ;;  %v922_v37 = vld [vmem:[%s5708_s22 + $0x1b0] sm:$0xff]  ;;  %v913_v43 = vld [vmem:[%s5708_s22 + $0x168] sm:$0xff] }
 0x885   : > { %2295 = vadd.xlane.f32.xlu0 %v2293_v7  ;;  %v886_v7 = vld [vmem:[%s5708_s22 + $0x90] sm:$0xff] }
 0x886   : > { %2412 = vmatpush.msrb.mxu0 %v886_v7  ;;  %2391 = vmatpush.msra.mxu3 %v869_v23  ;;  %v931_v7 = vld [vmem:[%s5708_s22 + $0x1f8] sm:$0xff]  ;;  %v914_v23 = vld [vmem:[%s5708_s22 + $0x170] sm:$0xff] }
 0x887   : > { %2445 = vmatpush.msra.mxu2 %v992_v2  ;;  %v891_v2 = vld [vmem:[%s5708_s22 + $0xb8] sm:$0xff] }
 0x888   : > { %2413 = vmatpush.msrb.mxu0 %v878_v38  ;;  %2468 = vmatpush.msrb.mxu3 %v993_v24  ;;  %v923_v38 = vld [vmem:[%s5708_s22 + $0x1b8] sm:$0xff] }
 0x889   : > { %2446 = vmatpush.msra.mxu2 %v984_v61  ;;  %v882_v61 = vld [vmem:[%s5708_s22 + $0x70] sm:$0xff] }
 0x88a   : > { %2414 = vmatpush.msrb.mxu0 %v870_v54  ;;  %v915_v54 = vld [vmem:[%s5708_s22 + $0x178] sm:$0xff] }
 0x88b   : > { %2447 = vmatpush.msra.mxu2 %v976_v21  ;;  %v874_v21 = vld [vmem:[%s5708_s22 + $0x30] sm:$0xff] }
 0x88c   : > { %2491 = vmatpush.msra.mxu0 %v994_v60  ;;  %v880_v60 = vld [vmem:[%s5708_s22 + $0x60] sm:$0xff] }
 0x88d   : > { %2448 = vmatpush.msra.mxu2 %v968_v49 }
 0x88e   : > { %2492 = vmatpush.msra.mxu0 %v986_v53  ;;  %v872_v53 = vld [vmem:[%s5708_s22 + $0x20] sm:$0xff] }
 0x88f   : > { %2449 = vmatpush.msra.mxu2 %v960_v9 }
 0x890   : > { %2493 = vmatpush.msra.mxu0 %v978_v63 }
 0x891   : > { %2450 = vmatpush.msra.mxu2 %v952_v12  ;;  %v1058_v12 = vld [vmem:[%s5710_s24 + $0x1f0] sm:$0xff] }
 0x892   : > { %2494 = vmatpush.msra.mxu0 %v970_v8 }
 0x893   : > { %2451 = vmatpush.msra.mxu2 %v944_v22  ;;  %v1040_v22 = vld [vmem:[%s5710_s24 + $0x160] sm:$0xff] }
 0x894   : > { %2495 = vmatpush.msra.mxu0 %v962_v48 }
 0x895   : > { %2452 = vmatpush.msra.mxu2 %v936_v16  ;;  %v1039_v16 = vld [vmem:[%s5710_s24 + $0x158] sm:$0xff] }
 0x896   : > { %2496 = vmatpush.msra.mxu0 %v954_v28  ;;  %v1011_v28 = vld [vmem:[%s5710_s24 + $0x78] sm:$0xff] }
 0x897   : > { %2453 = vmatpush.msra.mxu2 %v928_v31  ;;  %v1038_v31 = vld [vmem:[%s5710_s24 + $0x150] sm:$0xff] }
 0x898   : > { %2497 = vmatpush.msra.mxu0 %v946_v15  ;;  %v1010_v15 = vld [vmem:[%s5710_s24 + $0x70] sm:$0xff] }
 0x899   : > { %2454 = vmatpush.msra.mxu2 %v920_v34  ;;  %v1037_v34 = vld [vmem:[%s5710_s24 + $0x148] sm:$0xff] }
 0x89a   : > { %2498 = vmatpush.msra.mxu0 %v938_v26  ;;  %v1009_v26 = vld [vmem:[%s5710_s24 + $0x68] sm:$0xff] }
 0x89b   : > { %2455 = vmatpush.msra.mxu2 %v912_v19  ;;  %v1036_v19 = vld [vmem:[%s5710_s24 + $0x140] sm:$0xff] }
 0x89c   : > { %2499 = vmatpush.msra.mxu0 %v930_v56  ;;  %v1008_v56 = vld [vmem:[%s5710_s24 + $0x60] sm:$0xff] }
 0x89e   : > { %2500 = vmatpush.msra.mxu0 %v922_v37  ;;  %v1007_v37 = vld [vmem:[%s5710_s24 + $0x58] sm:$0xff] }
 0x8a0   : > { %2501 = vmatpush.msra.mxu0 %v914_v23  ;;  %v1006_v23 = vld [vmem:[%s5710_s24 + $0x50] sm:$0xff] }
 0x8b0   : > { %v2288_v35 = vpop.xlane.xlu2 %2287 }
 0x8b1   : > { %v2290_v46 = vmul.f32 %v2288_v35, %v5779_v41  ;;  %v871_v35 = vld [vmem:[%s5708_s22 + $0x18] sm:$0xff] }
 0x8b2   : > { %2437 = vmatpush.msra.mxu1 %v871_v35  ;;  %v904_v35 = vld [vmem:[%s5708_s22 + $0x120] sm:$0xff] }
 0x8b3   : > { %v6288_v44 = vsub.f32 %v6268_v29, %v2290_v46  ;;  %2456 = vmatpush.msra.mxu2 %v904_v35  ;;  %v1035_v35 = vld [vmem:[%s5710_s24 + $0x138] sm:$0xff] }
 0x8b4   : > { %2514 = vmatpush.msrb.mxu1 %v995_v50  ;;  %v881_v50 = vld [vmem:[%s5708_s22 + $0x68] sm:$0xff] }
 0x8b5   : > { %v2294_v14 = vmul.f32 %v6288_v44, %v6288_v44 }
 0x8b6   : > { %2515 = vmatpush.msrb.mxu1 %v987_v62  ;;  %v873_v62 = vld [vmem:[%s5708_s22 + $0x28] sm:$0xff] }
 0x8b7   : > { %v2297_v47 = vsel %vm1071_vm1, %v2294_v14, 0.0 }
 0x8b8   : > { %2298 = vadd.xlane.f32.xlu1 %v2297_v47  ;;  %2516 = vmatpush.msrb.mxu1 %v979_v5 }
 0x8ba   : > { %2517 = vmatpush.msrb.mxu1 %v971_v11 }
 0x8bc   : > { %2518 = vmatpush.msrb.mxu1 %v963_v10 }
 0x8be   : > { %2519 = vmatpush.msrb.mxu1 %v955_v18  ;;  %v1027_v18 = vld [vmem:[%s5710_s24 + $0xf8] sm:$0xff] }
 0x8c0   : > { %2520 = vmatpush.msrb.mxu1 %v947_v57  ;;  %v1026_v57 = vld [vmem:[%s5710_s24 + $0xf0] sm:$0xff] }
 0x8c2   : > { %2521 = vmatpush.msrb.mxu1 %v939_v27  ;;  %v1025_v27 = vld [vmem:[%s5710_s24 + $0xe8] sm:$0xff] }
 0x8c4   : > { %2522 = vmatpush.msrb.mxu1 %v931_v7  ;;  %v1024_v7 = vld [vmem:[%s5710_s24 + $0xe0] sm:$0xff] }
 0x8c6   : > { %2523 = vmatpush.msrb.mxu1 %v923_v38  ;;  %v1023_v38 = vld [vmem:[%s5710_s24 + $0xd8] sm:$0xff] }
 0x8c8   : > { %2524 = vmatpush.msrb.mxu1 %v915_v54  ;;  %v1022_v54 = vld [vmem:[%s5710_s24 + $0xd0] sm:$0xff] }
 0x8f8   : > { %v2296_v46 = vpop.xlane.xlu0 %2295 }
 0x8f9   : > { %v2300_v14 = vmul.f32 %v2296_v46, %v5779_v41  ;;  %v905_v46 = vld [vmem:[%s5708_s22 + $0x128] sm:$0xff] }
 0x8fb   : > { %v2302_v47 = vadd.f32 1e-05, %v2300_v14  ;;  %v906_v14 = vld [vmem:[%s5708_s22 + $0x130] sm:$0xff] }
 0x8fc   : > { %2502 = vmatpush.msra.mxu0 %v906_v14  ;;  %v1005_v14 = vld [vmem:[%s5710_s24 + $0x48] sm:$0xff] }
 0x8fd   : > { %4914 = vrsqrt.f32 %v2302_v47  ;;  %vm2310_vm8 = vweird.f32 %v2302_v47 }
 0x903   : > { %v4915_v30 = vpop.eup %4914 }
 0x904   : > { %v2305_v51 = vmul.f32 %v4915_v30, %v2302_v47  ;;  %vm2311_vm7 = vweird.f32 %v4915_v30  ;;  %v907_v47 = vld [vmem:[%s5708_s22 + $0x138] sm:$0xff] }
 0x905   : > { %vm2312_vm12 = vmor %vm2310_vm8, %vm2311_vm7  ;;  %2525 = vmatpush.msrb.mxu1 %v907_v47  ;;  %v1021_v47 = vld [vmem:[%s5710_s24 + $0xc8] sm:$0xff] }
 0x906   : > { %v2306_v25 = vmul.f32 %v4915_v30, %v2305_v51  ;;  %v897_v51 = vld [vmem:[%s5708_s22 + $0xe8] sm:$0xff] }
 0x908   : > { %v2307_v52 = vmul.f32 0.5, %v2306_v25 }
 0x90a   : > { %v2308_v42 = vsub.f32 1.5, %v2307_v52  ;;  %v898_v52 = vld [vmem:[%s5708_s22 + $0xf0] sm:$0xff] }
 0x90b   : > { %2503 = vmatpush.msra.mxu0 %v898_v52  ;;  %v1020_v52 = vld [vmem:[%s5710_s24 + $0xc0] sm:$0xff] }
 0x90c   : > { %v2309_v45 = vmul.f32 %v4915_v30, %v2308_v42  ;;  %v899_v42 = vld [vmem:[%s5708_s22 + $0xf8] sm:$0xff] }
 0x90d   : > { %2526 = vmatpush.msrb.mxu1 %v899_v42  ;;  %v1033_v42 = vld [vmem:[%s5710_s24 + $0x128] sm:$0xff] }
 0x90e   : > { %v2313_v40 = vsel %vm2312_vm12, %v4915_v30, %v2309_v45  ;;  %v896_v30 = vld [vmem:[%s5708_s22 + $0xe0] sm:$0xff] }
 0x90f   : > { %v2324_v59 = vmul.f32 %v2313_v40, %v6274_v33  ;;  %v985_v33 = vld [vmem:[%s5708_s22 + $0x3a8] sm:$0xff]  ;;  %v888_v40 = vld [vmem:[%s5708_s22 + $0xa0] sm:$0xff]  ;;  %2457 = vmatpush.msra.mxu2 %v896_v30  ;;  %2527 = vmatpush.msrb.mxu1 %v891_v2  ;;  %v1034_v30 = vld [vmem:[%s5710_s24 + $0x130] sm:$0xff] }
 0x910   : > { %2469 = vmatpush.msrb.mxu3 %v985_v33  ;;  %v883_v33 = vld [vmem:[%s5708_s22 + $0x78] sm:$0xff] }
 0x911   : > { %v2329_v58 = vmul.f32 %v6351_v55, %v2324_v59  ;;  %v889_v59 = vld [vmem:[%s5708_s22 + $0xa8] sm:$0xff]  ;;  %2458 = vmatpush.msra.mxu2 %v888_v40  ;;  %2528 = vmatpush.msrb.mxu1 %v883_v33  ;;  %v1019_v2 = vld [vmem:[%s5710_s24 + $0xb8] sm:$0xff] }
 0x912   : > { %2470 = vmatpush.msrb.mxu3 %v977_v39  ;;  %v875_v39 = vld [vmem:[%s5708_s22 + $0x38] sm:$0xff] }
 0x913   : > { %v6362_v4 = vadd.f32 %v6354_v0, %v2329_v58  ;;  %v890_v58 = vld [vmem:[%s5708_s22 + $0xb0] sm:$0xff]  ;;  %2459 = vmatpush.msra.mxu2 %v880_v60  ;;  %2529 = vmatpush.msrb.mxu1 %v875_v39  ;;  %v1048_v60 = vld [vmem:[%s5710_s24 + $0x1a0] sm:$0xff]  ;;  %v1031_v33 = vld [vmem:[%s5710_s24 + $0x118] sm:$0xff] }
 0x914   : > { %2471 = vmatpush.msrb.mxu3 %v969_v3  ;;  %2504 = vmatpush.msra.mxu0 %v890_v58  ;;  %v1003_v58 = vld [vmem:[%s5710_s24 + $0x38] sm:$0xff]  ;;  %v1030_v39 = vld [vmem:[%s5710_s24 + $0x110] sm:$0xff] }
 0x915   : > { %2369 = vmatmul.f32.vlgmr.msrb.gmra.mxu2 %v6362_v4  ;;  %2392 = vmatmul.f32.vlgmr.msra.gmra.mxu3 %v6362_v4 }
 0x916   : > { %2415 = vmatmul.f32.vlgmr.msrb.gmra.mxu0 %v6362_v4  ;;  %2438 = vmatmul.f32.vlgmr.msra.gmra.mxu1 %v6362_v4 }
 0x917   : > { %2472 = vmatpush.msrb.mxu3 %v961_v1  ;;  %2505 = vmatpush.msra.mxu0 %v882_v61  ;;  %v1018_v61 = vld [vmem:[%s5710_s24 + $0xb0] sm:$0xff] }
 0x918   : > { %2460 = vmatpush.msra.mxu2 %v872_v53  ;;  %v1047_v53 = vld [vmem:[%s5710_s24 + $0x198] sm:$0xff] }
 0x919   : > { %2473 = vmatpush.msrb.mxu3 %v953_v13  ;;  %2506 = vmatpush.msra.mxu0 %v874_v21  ;;  %v1057_v13 = vld [vmem:[%s5710_s24 + $0x1e8] sm:$0xff] }
 0x91a   : > { %2617 = vmatpush.msrb.mxu2 %v1011_v28  ;;  %v1017_v21 = vld [vmem:[%s5710_s24 + $0xa8] sm:$0xff] }
 0x91b   : > { %2474 = vmatpush.msrb.mxu3 %v945_v6  ;;  %v1056_v6 = vld [vmem:[%s5710_s24 + $0x1e0] sm:$0xff]  ;;  %v997_v28 = vld [vmem:[%s5710_s24 + $0x8] sm:$0xff] }
 0x91c   : > { %2618 = vmatpush.msrb.mxu2 %v1010_v15 }
 0x91d   : > { %2475 = vmatpush.msrb.mxu3 %v937_v20  ;;  %v1055_v20 = vld [vmem:[%s5710_s24 + $0x1d8] sm:$0xff] }
 0x91e   : > { %2619 = vmatpush.msrb.mxu2 %v1009_v26  ;;  %v1012_v26 = vld [vmem:[%s5710_s24 + $0x80] sm:$0xff] }
 0x91f   : > { %2476 = vmatpush.msrb.mxu3 %v929_v32  ;;  %v1054_v32 = vld [vmem:[%s5710_s24 + $0x1d0] sm:$0xff] }
 0x920   : > { %2620 = vmatpush.msrb.mxu2 %v1008_v56  ;;  %v5026_v56 = vld [vmem:[%s5694_s7 + $0x148] sm:$0xff] }
 0x921   : > { %2477 = vmatpush.msrb.mxu3 %v921_v36  ;;  %v1053_v36 = vld [vmem:[%s5710_s24 + $0x1c8] sm:$0xff] }
 0x922   : > { %2621 = vmatpush.msrb.mxu2 %v1007_v37 }
 0x923   : > { %2478 = vmatpush.msrb.mxu3 %v913_v43  ;;  %v1052_v43 = vld [vmem:[%s5710_s24 + $0x1c0] sm:$0xff] }
 0x924   : > { %2622 = vmatpush.msrb.mxu2 %v1006_v23 }
 0x925   : > { %2479 = vmatpush.msrb.mxu3 %v905_v46  ;;  %v1051_v46 = vld [vmem:[%s5710_s24 + $0x1b8] sm:$0xff] }
 0x926   : > { %2623 = vmatpush.msrb.mxu2 %v1005_v14 }
 0x927   : > { %2480 = vmatpush.msrb.mxu3 %v897_v51  ;;  %v1050_v51 = vld [vmem:[%s5710_s24 + $0x1b0] sm:$0xff] }
 0x929   : > { %2481 = vmatpush.msrb.mxu3 %v889_v59  ;;  %v1049_v59 = vld [vmem:[%s5710_s24 + $0x1a8] sm:$0xff] }
 0x92b   : > { %v2299_v25 = vpop.xlane.xlu1 %2298  ;;  %2482 = vmatpush.msrb.mxu3 %v881_v50  ;;  %v1002_v50 = vld [vmem:[%s5710_s24 + $0x30] sm:$0xff] }
 0x92c   : > { %v2301_v45 = vmul.f32 %v2299_v25, %v5779_v41  ;;  %v1004_v25 = vld [vmem:[%s5710_s24 + $0x40] sm:$0xff] }
 0x92d   : > { %2483 = vmatpush.msrb.mxu3 %v873_v62  ;;  %2624 = vmatpush.msrb.mxu2 %v1004_v25  ;;  %v1001_v62 = vld [vmem:[%s5710_s24 + $0x28] sm:$0xff]  ;;  %v5032_v25 = vld [vmem:[%s5694_s7 + $0x118] sm:$0xff] }
 0x92e   : > { %v2303_v24 = vadd.f32 1e-05, %v2301_v45 }
 0x92f   : > { %2640 = vmatpush.msra.mxu3 %v1027_v18  ;;  %2625 = vmatpush.msrb.mxu2 %v1003_v58  ;;  %v5024_v18 = vld [vmem:[%s5694_s7 + $0x178] sm:$0xff]  ;;  %v5034_v58 = vld [vmem:[%s5694_s7 + $0x140] sm:$0xff] }
 0x930   : > { %4916 = vrsqrt.f32 %v2303_v24  ;;  %vm2320_vm14 = vweird.f32 %v2303_v24 }
 0x931   : > { %2641 = vmatpush.msra.mxu3 %v1026_v57  ;;  %2626 = vmatpush.msrb.mxu2 %v1002_v50 }
 0x933   : > { %2642 = vmatpush.msra.mxu3 %v1025_v27  ;;  %2627 = vmatpush.msrb.mxu2 %v1001_v62  ;;  %v5025_v27 = vld [vmem:[%s5694_s7 + $0x160] sm:$0xff] }
 0x934   : > { %v5036_v62 = vld [vmem:[%s5694_s7 + $0x120] sm:$0xff] }
 0x935   : > { %2643 = vmatpush.msra.mxu3 %v1024_v7 }
 0x936   : > { %v4917_v63 = vpop.eup %4916 }
 0x937   : > { %v2315_v5 = vmul.f32 %v4917_v63, %v2303_v24  ;;  %vm2321_vm13 = vweird.f32 %v4917_v63  ;;  %2644 = vmatpush.msra.mxu3 %v1023_v38  ;;  %v1032_v24 = vld [vmem:[%s5710_s24 + $0x120] sm:$0xff]  ;;  %v5027_v38 = vld [vmem:[%s5694_s7 + $0x168] sm:$0xff] }
 0x938   : > { %vm2322_vm15 = vmor %vm2320_vm14, %vm2321_vm13 }
 0x939   : > { %v2316_v49 = vmul.f32 %v4917_v63, %v2315_v5  ;;  %2645 = vmatpush.msra.mxu3 %v1022_v54  ;;  %v5029_v54 = vld [vmem:[%s5694_s7 + $0x130] sm:$0xff] }
 0x93b   : > { %v2317_v3 = vmul.f32 0.5, %v2316_v49  ;;  %2646 = vmatpush.msra.mxu3 %v1021_v47 }
 0x93d   : > { %v2318_v8 = vsub.f32 1.5, %v2317_v3  ;;  %2647 = vmatpush.msra.mxu3 %v1020_v52  ;;  %v1000_v3 = vld [vmem:[%s5710_s24 + $0x20] sm:$0xff] }
 0x93e   : > { %2628 = vmatpush.msrb.mxu2 %v1000_v3 }
 0x93f   : > { %v2319_v11 = vmul.f32 %v4917_v63, %v2318_v8  ;;  %2648 = vmatpush.msra.mxu3 %v1019_v2  ;;  %v1016_v8 = vld [vmem:[%s5710_s24 + $0xa0] sm:$0xff] }
 0x941   : > { %v2323_v9 = vsel %vm2322_vm15, %v4917_v63, %v2319_v11  ;;  %2649 = vmatpush.msra.mxu3 %v1018_v61  ;;  %v1046_v63 = vld [vmem:[%s5710_s24 + $0x190] sm:$0xff]  ;;  %v1029_v11 = vld [vmem:[%s5710_s24 + $0x108] sm:$0xff] }
 0x942   : > { %v2325_v1 = vmul.f32 %v2323_v9, %v6288_v44  ;;  %v1043_v44 = vld [vmem:[%s5710_s24 + $0x178] sm:$0xff]  ;;  %v1045_v9 = vld [vmem:[%s5710_s24 + $0x188] sm:$0xff] }
 0x943   : > { %2663 = vmatpush.msrb.mxu0 %v1043_v44  ;;  %2650 = vmatpush.msra.mxu3 %v1017_v21  ;;  %v5037_v21 = vld [vmem:[%s5694_s7 + $0x128] sm:$0xff] }
 0x944   : > { %v2330_v48 = vmul.f32 %v6351_v55, %v2325_v1  ;;  %v1059_v55 = vld [vmem:[%s5710_s24 + $0x1f8] sm:$0xff] }
 0x945   : > { %2686 = vmatpush.msra.mxu1 %v1059_v55  ;;  %v999_v1 = vld [vmem:[%s5710_s24 + $0x18] sm:$0xff]  ;;  %2651 = vmatpush.msra.mxu3 %v1016_v8  ;;  %v1028_v55 = vld [vmem:[%s5710_s24 + $0x100] sm:$0xff] }
 0x946   : > { %v2335_v10 = vadd.f32 %v6354_v0, %v2330_v48  ;;  %v1042_v0 = vld [vmem:[%s5710_s24 + $0x170] sm:$0xff]  ;;  %v1015_v48 = vld [vmem:[%s5710_s24 + $0x98] sm:$0xff]  ;;  %2629 = vmatpush.msrb.mxu2 %v999_v1 }
 0x947   : > { %2664 = vmatpush.msrb.mxu0 %v1042_v0  ;;  %2687 = vmatpush.msra.mxu1 %v1058_v12  ;;  %v1044_v0 = vld [vmem:[%s5710_s24 + $0x180] sm:$0xff] }
 0x948   : > { %2372 = vmatmul.f32.gmra.mxu2 %v2335_v10  ;;  %2395 = vmatmul.f32.gmra.mxu3 %v2335_v10  ;;  %v6508_v12 = vld [vmem:[%s5750_s4] sm:$0xff] }
 0x949   : > { %2418 = vmatmul.f32.gmra.mxu0 %v2335_v10  ;;  %2441 = vmatmul.f32.gmra.mxu1 %v2335_v10  ;;  %v6519_v15 = vperm.slane %v6508_v12, 6  ;;  %v6522_v57 = vperm.slane %v6508_v12, 7  ;;  %v6539_v37 = vperm.slane %v6508_v12, 5 }
 0x94a   : > { %2688 = vmatpush.msra.mxu1 %v1057_v13  ;;  %2652 = vmatpush.msra.mxu3 %v1015_v48  ;;  %v1014_v13 = vld [vmem:[%s5710_s24 + $0x90] sm:$0xff]  ;;  %v5039_v48 = vld [vmem:[%s5694_s7 + $0x108] sm:$0xff] }
 0x94c   : > { %2689 = vmatpush.msra.mxu1 %v1056_v6  ;;  %2653 = vmatpush.msra.mxu3 %v1014_v13 }
 0x94e   : > { %2690 = vmatpush.msra.mxu1 %v1055_v20  ;;  %v996_v20 = vld [vmem:[%s5710_s24] sm:$0xff] }
 0x950   : > { %2461 = vmatmul.f32.vlgmr.msra.gmra.mxu2 %v6362_v4  ;;  %2484 = vmatmul.f32.vlgmr.msrb.gmra.mxu3 %v6362_v4 }
 0x951   : > { %2507 = vmatmul.f32.vlgmr.msra.gmra.mxu0 %v6362_v4  ;;  %2530 = vmatmul.f32.vlgmr.msrb.gmra.mxu1 %v6362_v4  ;;  %v1041_v4 = vld [vmem:[%s5710_s24 + $0x168] sm:$0xff] }
 0x952   : > { %2665 = vmatpush.msrb.mxu0 %v1041_v4  ;;  %2691 = vmatpush.msra.mxu1 %v1054_v32  ;;  %v998_v4 = vld [vmem:[%s5710_s24 + $0x10] sm:$0xff] }
 0x953   : > { %2630 = vmatpush.msrb.mxu2 %v998_v4 }
 0x954   : > { %2666 = vmatpush.msrb.mxu0 %v1040_v22  ;;  %2692 = vmatpush.msra.mxu1 %v1053_v36  ;;  %v6536_v36 = vperm.slane %v6508_v12, 4 }
 0x955   : > { %2631 = vmatpush.msrb.mxu2 %v997_v28  ;;  %v5041_v28 = vld [vmem:[%s5694_s7 + $0xd0] sm:$0xff] }
 0x956   : > { %2667 = vmatpush.msrb.mxu0 %v1039_v16  ;;  %2693 = vmatpush.msra.mxu1 %v1052_v43  ;;  %v1013_v16 = vld [vmem:[%s5710_s24 + $0x88] sm:$0xff] }
 0x957   : > { %2654 = vmatpush.msra.mxu3 %v1013_v16  ;;  %2632 = vmatpush.msrb.mxu2 %v996_v20 }
 0x958   : > { %2464 = vmatmul.f32.gmra.mxu2 %v2335_v10  ;;  %2487 = vmatmul.f32.gmra.mxu3 %v2335_v10 }
 0x959   : > { %2510 = vmatmul.f32.gmra.mxu0 %v2335_v10  ;;  %2533 = vmatmul.f32.gmra.mxu1 %v2335_v10 }
 0x95a   : > { %2668 = vmatpush.msrb.mxu0 %v1038_v31  ;;  %2694 = vmatpush.msra.mxu1 %v1051_v46  ;;  %v5031_v46 = vld [vmem:[%s5694_s7 + $0x158] sm:$0xff] }
 0x95b   : > { %2655 = vmatpush.msra.mxu3 %v1012_v26  ;;  %2767 = vmatpush.msra.mxu2 %v5027_v38  ;;  %v5042_v26 = vld [vmem:[%s5694_s7 + $0xf0] sm:$0xff]  ;;  %v5044_v38 = vld [vmem:[%s5694_s7 + $0xb8] sm:$0xff] }
 0x95c   : > { %2669 = vmatpush.msrb.mxu0 %v1037_v34  ;;  %2695 = vmatpush.msra.mxu1 %v1050_v51 }
 0x95e   : > { %2670 = vmatpush.msrb.mxu0 %v1036_v19  ;;  %2696 = vmatpush.msra.mxu1 %v1049_v59  ;;  %v5028_v19 = vld [vmem:[%s5694_s7 + $0x170] sm:$0xff]  ;;  %v5033_v59 = vld [vmem:[%s5694_s7 + $0x138] sm:$0xff] }
 0x95f   : > { %2790 = vmatpush.msrb.mxu3 %v5028_v19 }
 0x960   : > { %2671 = vmatpush.msrb.mxu0 %v1035_v35  ;;  %2697 = vmatpush.msra.mxu1 %v1048_v60  ;;  %v5030_v35 = vld [vmem:[%s5694_s7 + $0x150] sm:$0xff]  ;;  %v5035_v60 = vld [vmem:[%s5694_s7 + $0x100] sm:$0xff] }
 0x961   : > { %2768 = vmatpush.msra.mxu2 %v5030_v35  ;;  %2791 = vmatpush.msrb.mxu3 %v5031_v46  ;;  %v5045_v35 = vld [vmem:[%s5694_s7 + $0xd8] sm:$0xff] }
 0x962   : > { %2672 = vmatpush.msrb.mxu0 %v1034_v30  ;;  %2698 = vmatpush.msra.mxu1 %v1047_v53 }
 0x963   : > { %2769 = vmatpush.msra.mxu2 %v5033_v59  ;;  %2792 = vmatpush.msrb.mxu3 %v5034_v58  ;;  %v5048_v58 = vld [vmem:[%s5694_s7 + $0xc0] sm:$0xff] }
 0x964   : > { %2673 = vmatpush.msrb.mxu0 %v1033_v42  ;;  %2699 = vmatpush.msra.mxu1 %v1046_v63 }
 0x965   : > { %2770 = vmatpush.msra.mxu2 %v5036_v62  ;;  %2793 = vmatpush.msrb.mxu3 %v5037_v21  ;;  %v5051_v62 = vld [vmem:[%s5694_s7 + $0xa8] sm:$0xff] }
 0x966   : > { %2674 = vmatpush.msrb.mxu0 %v1032_v24  ;;  %2700 = vmatpush.msra.mxu1 %v1045_v9 }
 0x967   : > { %2771 = vmatpush.msra.mxu2 %v5039_v48  ;;  %v6618_v48 = vperm.slane %v6508_v12, 3 }
 0x968   : > { %2675 = vmatpush.msrb.mxu0 %v1031_v33  ;;  %2701 = vmatpush.msra.mxu1 %v1044_v0 }
 0x969   : > { %2772 = vmatpush.msra.mxu2 %v5042_v26  ;;  %v5055_v26 = vld [vmem:[%s5694_s7 + $0x98] sm:$0xff] }
 0x96a   : > { %2676 = vmatpush.msrb.mxu0 %v1030_v39 }
 0x96b   : > { %2773 = vmatpush.msra.mxu2 %v5045_v35  ;;  %v5058_v35 = vld [vmem:[%s5694_s7 + $0x80] sm:$0xff] }
 0x96c   : > { %2677 = vmatpush.msrb.mxu0 %v1029_v11  ;;  %v5038_v11 = vld [vmem:[%s5694_s7 + $0xe8] sm:$0xff] }
 0x96d   : > { %2774 = vmatpush.msra.mxu2 %v5048_v58 }
 0x96e   : > { %2678 = vmatpush.msrb.mxu0 %v1028_v55  ;;  %v5040_v55 = vld [vmem:[%s5694_s7 + $0x110] sm:$0xff] }
 0x96f   : > { %2794 = vmatpush.msrb.mxu3 %v5040_v55  ;;  %2775 = vmatpush.msra.mxu2 %v5051_v62 }
 0x970   : > { %2813 = vmatpush.msra.mxu0 %v5024_v18 }
 0x972   : > { %2814 = vmatpush.msra.mxu0 %v5025_v27  ;;  %v5043_v27 = vld [vmem:[%s5694_s7 + $0xf8] sm:$0xff] }
 0x973   : > { %2795 = vmatpush.msrb.mxu3 %v5043_v27  ;;  %v5056_v27 = vld [vmem:[%s5694_s7 + $0x58] sm:$0xff] }
 0x974   : > { %2815 = vmatpush.msra.mxu0 %v5026_v56 }
 0x976   : > { %2816 = vmatpush.msra.mxu0 %v5029_v54 }
 0x978   : > { %2817 = vmatpush.msra.mxu0 %v5032_v25 }
 0x97a   : > { %2818 = vmatpush.msra.mxu0 %v5035_v60 }
 0x97c   : > { %2819 = vmatpush.msra.mxu0 %v5038_v11 }
 0x97e   : > { %2820 = vmatpush.msra.mxu0 %v5041_v28 }
 0x980   : > { %2821 = vmatpush.msra.mxu0 %v5044_v38  ;;  %v5057_v38 = vld [vmem:[%s5694_s7 + $0x78] sm:$0xff] }
 0x993   : > { %v6474_v45 = vpop.f32.mrf.mxu0  ;;  %v6476_v40 = vpop.f32.mrf.mxu1 }
 0x998   : > { %v6491_v5 = vpop.f32.mrf.mxu2  ;;  %v6493_v49 = vpop.f32.mrf.mxu3 }
 0x9c6   : > { %v6501_v10 = vpop.f32.mrf.mxu0  ;;  %v6503_v44 = vpop.f32.mrf.mxu1 }
 0x9cb   : > { %v6514_v22 = vpop.f32.mrf.mxu2  ;;  %v6516_v6 = vpop.f32.mrf.mxu3 }
 0x9ce   : > { %v2508_v31 = vpop.f32.mrf.mxu0  ;;  %v2531_v32 = vpop.f32.mrf.mxu1 }
 0x9cf   : > { %v6530_v7 = vadd.f32 %v2508_v31, %v6519_v15  ;;  %v6533_v34 = vadd.f32 %v2531_v32, %v6522_v57 }
 0x9d1   : > { %v2547_v43 = vmul.f32 0.044715, %v6530_v7  ;;  %v2548_v23 = vmul.f32 0.044715, %v6533_v34  ;;  %v2539_v55 = vmul.f32 0.5, %v6530_v7 }
 0x9d3   : > { %v2555_v14 = vmul.f32 %v2547_v43, %v6530_v7  ;;  %v2556_v47 = vmul.f32 %v2548_v23, %v6533_v34  ;;  %v2462_v30 = vpop.f32.mrf.mxu2  ;;  %v2485_v51 = vpop.f32.mrf.mxu3 }
 0x9d4   : > { %v6552_v52 = vadd.f32 %v2462_v30, %v6536_v36  ;;  %v6555_v42 = vadd.f32 %v2485_v51, %v6539_v37  ;;  %v5047_v30 = vld [vmem:[%s5694_s7 + $0xa0] sm:$0xff] }
 0x9d5   : > { %v2563_v2 = vmul.f32 %v2555_v14, %v6530_v7  ;;  %v2564_v24 = vmul.f32 %v2556_v47, %v6533_v34  ;;  %v5046_v47 = vld [vmem:[%s5694_s7 + $0xe0] sm:$0xff]  ;;  %2822 = vmatpush.msra.mxu0 %v5047_v30 }
 0x9d6   : > { %v2545_v50 = vmul.f32 0.044715, %v6552_v52  ;;  %v2546_v61 = vmul.f32 0.044715, %v6555_v42  ;;  %v2511_v33 = vpop.f32.mrf.mxu0  ;;  %v2534_v53 = vpop.f32.mrf.mxu1  ;;  %2796 = vmatpush.msrb.mxu3 %v5046_v47 }
 0x9d7   : > { %v2571_v39 = vadd.f32 %v2563_v2, %v6530_v7  ;;  %v2572_v63 = vadd.f32 %v2564_v24, %v6533_v34  ;;  %v6569_v3 = vadd.f32 %v2511_v33, %v6519_v15  ;;  %v6572_v8 = vadd.f32 %v2534_v53, %v6522_v57  ;;  %v5050_v33 = vld [vmem:[%s5694_s7 + $0x88] sm:$0xff] }
 0x9d8   : > { %v2553_v9 = vmul.f32 %v2545_v50, %v6552_v52  ;;  %v2554_v1 = vmul.f32 %v2546_v61, %v6555_v42  ;;  %v6604_v2 = vperm.slane %v6508_v12, 2  ;;  %v5049_v61 = vld [vmem:[%s5694_s7 + $0xc8] sm:$0xff]  ;;  %2823 = vmatpush.msra.mxu0 %v5050_v33 }
 0x9d9   : > { %v2579_v0 = vmul.f32 0.7978846, %v2571_v39  ;;  %v2580_v4 = vmul.f32 0.7978846, %v2572_v63  ;;  %v2551_v13 = vmul.f32 0.044715, %v6569_v3  ;;  %2797 = vmatpush.msrb.mxu3 %v5049_v61 }
 0x9da   : > { %v2561_v18 = vmul.f32 %v2553_v9, %v6552_v52  ;;  %v2562_v16 = vmul.f32 %v2554_v1, %v6555_v42  ;;  %v2552_v20 = vmul.f32 0.044715, %v6572_v8  ;;  %v5052_v9 = vld [vmem:[%s5694_s7 + $0xb0] sm:$0xff] }
 0x9db   : > { %v2465_v31 = vpop.f32.mrf.mxu2  ;;  %v2488_v32 = vpop.f32.mrf.mxu3  ;;  %4918 = vtanh.f32 %v2579_v0  ;;  %v2559_v56 = vmul.f32 %v2551_v13, %v6569_v3  ;;  %2798 = vmatpush.msrb.mxu3 %v5052_v9  ;;  %v5053_v1 = vld [vmem:[%s5694_s7 + $0x70] sm:$0xff]  ;;  %v2543_v9 = vmul.f32 0.5, %v6569_v3 }
 0x9dc   : > { %v2569_v19 = vadd.f32 %v2561_v18, %v6552_v52  ;;  %v2570_v43 = vadd.f32 %v2562_v16, %v6555_v42  ;;  %v6591_v23 = vadd.f32 %v2465_v31, %v6536_v36  ;;  %v6594_v54 = vadd.f32 %v2488_v32, %v6539_v37  ;;  %2824 = vmatpush.msra.mxu0 %v5053_v1  ;;  %v5054_v13 = vld [vmem:[%s5694_s7 + $0x90] sm:$0xff] }
 0x9dd   : > { %4920 = vtanh.f32 %v2580_v4  ;;  %v2567_v46 = vmul.f32 %v2559_v56, %v6569_v3  ;;  %v2560_v14 = vmul.f32 %v2552_v20, %v6572_v8  ;;  %2776 = vmatpush.msra.mxu2 %v5054_v13  ;;  %v2417_v18 = vadd.f32 %v6474_v45, %v6604_v2  ;;  %2799 = vmatpush.msrb.mxu3 %v5055_v26  ;;  %v5067_v13 = vld [vmem:[%s5694_s7 + $0x38] sm:$0xff] }
 0x9de   : > { %v2577_v51 = vmul.f32 0.7978846, %v2569_v19  ;;  %v2578_v25 = vmul.f32 0.7978846, %v2570_v43  ;;  %v2549_v59 = vmul.f32 0.044715, %v6591_v23  ;;  %2825 = vmatpush.msra.mxu0 %v5056_v27  ;;  %v2443_v27 = vadd.f32 %v6503_v44, %v6618_v48 }
 0x9df   : > { %v2550_v24 = vmul.f32 0.044715, %v6594_v54  ;;  %v2575_v60 = vadd.f32 %v2567_v46, %v6569_v3  ;;  %v2568_v50 = vmul.f32 %v2560_v14, %v6572_v8  ;;  %v2540_v31 = vmul.f32 0.5, %v6533_v34  ;;  %2777 = vmatpush.msra.mxu2 %v5057_v38  ;;  %2800 = vmatpush.msrb.mxu3 %v5058_v35  ;;  %v5059_v34 = vld [vmem:[%s5694_s7 + $0x40] sm:$0xff]  ;;  %v5071_v38 = vld [vmem:[%s5694_s7 + $0x8] sm:$0xff] }
 0x9e0   : > { %4922 = vtanh.f32 %v2577_v51  ;;  %v2557_v53 = vmul.f32 %v2549_v59, %v6591_v23  ;;  %v6632_v45 = vperm.slane %v6508_v12, 0  ;;  %v6635_v19 = vperm.slane %v6508_v12, 1  ;;  %2826 = vmatpush.msra.mxu0 %v5059_v34  ;;  %v5069_v3 = vld [vmem:[%s5694_s7 + $0x20] sm:$0xff] }
 0x9e1   : > { %v4919_v21 = vpop.eup %4918  ;;  %4924 = vtanh.f32 %v2578_v25  ;;  %v2583_v39 = vmul.f32 0.7978846, %v2575_v60  ;;  %v2576_v63 = vadd.f32 %v2568_v50, %v6572_v8  ;;  %v2558_v11 = vmul.f32 %v2550_v24, %v6594_v54  ;;  %v5060_v25 = vld [vmem:[%s5694_s7 + $0x60] sm:$0xff]  ;;  %v5061_v60 = vld [vmem:[%s5694_s7 + $0x68] sm:$0xff] }
 0x9e2   : > { %v2595_v0 = vadd.f32 1.0, %v4919_v21  ;;  %v2565_v4 = vmul.f32 %v2557_v53, %v6591_v23  ;;  %v2440_v14 = vadd.f32 %v6476_v40, %v6618_v48  ;;  %2778 = vmatpush.msra.mxu2 %v5060_v25  ;;  %v2537_v59 = vmul.f32 0.5, %v6552_v52  ;;  %2801 = vmatpush.msrb.mxu3 %v5061_v60  ;;  %v5062_v50 = vld [vmem:[%s5694_s7 + $0x28] sm:$0xff] }
 0x9e3   : > { %v4921_v28 = vpop.eup %4920  ;;  %4926 = vtanh.f32 %v2583_v39  ;;  %v2584_v16 = vmul.f32 0.7978846, %v2576_v63  ;;  %v2566_v20 = vmul.f32 %v2558_v11, %v6594_v54  ;;  %2827 = vmatpush.msra.mxu0 %v5062_v50  ;;  %v2538_v40 = vmul.f32 0.5, %v6555_v42  ;;  %v5063_v53 = vld [vmem:[%s5694_s7 + $0x48] sm:$0xff]  ;;  %v5064_v39 = vld [vmem:[%s5694_s7 + $0x50] sm:$0xff] }
 0x9e4   : > { %v2603_v7 = vmul.f32 %v2595_v0, %v2539_v55  ;;  %v2596_v32 = vadd.f32 1.0, %v4921_v28  ;;  %v2573_v56 = vadd.f32 %v2565_v4, %v6591_v23  ;;  %2779 = vmatpush.msra.mxu2 %v5063_v53  ;;  %v2371_v52 = vadd.f32 %v6491_v5, %v6632_v45  ;;  %2802 = vmatpush.msrb.mxu3 %v5064_v39  ;;  %v5065_v63 = vld [vmem:[%s5694_s7 + $0x10] sm:$0xff] }
 0x9e5   : > { %4928 = vtanh.f32 %v2584_v16  ;;  %v2574_v43 = vadd.f32 %v2566_v20, %v6594_v54  ;;  %2828 = vmatpush.msra.mxu0 %v5065_v63  ;;  %v2394_v11 = vadd.f32 %v6493_v49, %v6635_v19  ;;  %v5066_v55 = vld [vmem:[%s5694_s7 + $0x30] sm:$0xff]  ;;  %v2420_v0 = vadd.f32 %v6501_v10, %v6604_v2  ;;  %v5068_v20 = vld [vmem:[%s5694_s7 + $0x18] sm:$0xff] }
 0x9e6   : > { %v4923_v46 = vpop.eup %4922  ;;  %v2611_v47 = vmul.f32 %v2603_v7, %v2417_v18  ;;  %v2604_v30 = vmul.f32 %v2596_v32, %v2540_v31  ;;  %v2581_v51 = vmul.f32 0.7978846, %v2573_v56  ;;  %2780 = vmatpush.msra.mxu2 %v5066_v55  ;;  %2803 = vmatpush.msrb.mxu3 %v5067_v13  ;;  %v2544_v49 = vmul.f32 0.5, %v6572_v8  ;;  %v5070_v31 = vld [vmem:[%s5694_s7] sm:$0xff]  ;;  %v4627_v63 = vld [vmem:[%s5760_s13 + $0x10] sm:$0xff] }
 0x9e7   : > { %v4925_v12 = vpop.eup %4924  ;;  %v2593_v58 = vadd.f32 1.0, %v4923_v46  ;;  %v2582_v24 = vmul.f32 0.7978846, %v2574_v43  ;;  %v2541_v56 = vmul.f32 0.5, %v6591_v23  ;;  %v2542_v35 = vmul.f32 0.5, %v6594_v54  ;;  %2721 = vadd.xlane.f32.xlu2 %v4627_v63 }
 0x9e8   : > { %2679 = vmatmul.f32.vlgmr.msrb.gmra.mxu0 %v2611_v47  ;;  %v2612_v61 = vmul.f32 %v2604_v30, %v2440_v14  ;;  %v2594_v33 = vadd.f32 1.0, %v4925_v12  ;;  %4930 = vtanh.f32 %v2581_v51  ;;  %2781 = vmatpush.msra.mxu2 %v5068_v20  ;;  %v2374_v46 = vadd.f32 %v6514_v22, %v6632_v45 }
 0x9e9   : > { %v4927_v62 = vpop.eup %4926  ;;  %v2601_v21 = vmul.f32 %v2593_v58, %v2537_v59  ;;  %4932 = vtanh.f32 %v2582_v24  ;;  %2804 = vmatpush.msrb.mxu3 %v5069_v3  ;;  %v2397_v14 = vadd.f32 %v6516_v6, %v6635_v19  ;;  %v4843_v24 = vld [vmem:[%s5755_s28] ss:$0 sm:$0xff] }
 0x9ea   : > { %2702 = vmatmul.f32.vlgmr.msra.gmra.mxu1 %v2612_v61  ;;  %v2602_v42 = vmul.f32 %v2594_v33, %v2538_v40  ;;  %v2599_v1 = vadd.f32 1.0, %v4927_v62  ;;  %2782 = vmatpush.msra.mxu2 %v5070_v31 }
 0x9eb   : > { %v4929_v5 = vpop.eup %4928  ;;  %v2609_v4 = vmul.f32 %v2601_v21, %v2371_v52  ;;  %2805 = vmatpush.msrb.mxu3 %v5071_v38 }
 0x9ec   : > { %v2610_v28 = vmul.f32 %v2602_v42, %v2394_v11  ;;  %v2607_v18 = vmul.f32 %v2599_v1, %v2543_v9  ;;  %v2600_v16 = vadd.f32 1.0, %v4929_v5  ;;  %v4628_v11 = vld [vmem:[%s5760_s13 + $0x18] sm:$0x1] }
 0x9ed   : > { %2633 = vmatmul.f32.vlgmr.msrb.gmra.mxu2 %v2609_v4  ;;  %v2723_v42 = vsel %vm1071_vm1, %v4628_v11, 0.0 }
 0x9ee   : > { %v4931_v26 = vpop.eup %4930  ;;  %2656 = vmatmul.f32.vlgmr.msra.gmra.mxu3 %v2610_v28  ;;  %v2615_v10 = vmul.f32 %v2607_v18, %v2420_v0  ;;  %v2608_v7 = vmul.f32 %v2600_v16, %v2544_v49  ;;  %2724 = vadd.xlane.f32.xlu0 %v2723_v42 }
 0x9ef   : > { %v4933_v32 = vpop.eup %4932  ;;  %v2597_v8 = vadd.f32 1.0, %v4931_v26 }
 0x9f0   : > { %2682 = vmatmul.f32.gmra.mxu0 %v2615_v10  ;;  %v2616_v43 = vmul.f32 %v2608_v7, %v2443_v27  ;;  %v2598_v34 = vadd.f32 1.0, %v4933_v32 }
 0x9f1   : > { %v2605_v44 = vmul.f32 %v2597_v8, %v2541_v56 }
 0x9f2   : > { %2705 = vmatmul.f32.gmra.mxu1 %v2616_v43  ;;  %v2606_v47 = vmul.f32 %v2598_v34, %v2542_v35  ;;  %v5072_v34 = vld [vmem:[%s5722_s8] ss:$0 sm:$0xff] }
 0x9f3   : > { %v2613_v30 = vmul.f32 %v2605_v44, %v2374_v46 }
 0x9f4   : > { %v2614_v23 = vmul.f32 %v2606_v47, %v2397_v14  ;;  %v5073_v14 = vld [vmem:[%s5727_s1] ss:$0 sm:$0xff] }
 0x9f5   : > { %2636 = vmatmul.f32.gmra.mxu2 %v2613_v30 }
 0x9f6   : > { %2659 = vmatmul.f32.gmra.mxu3 %v2614_v23 }
 0xa61   : > { %v2725_v5 = vpop.xlane.xlu0 %2724 }
 0xa62   : > { %v2727_v0 = vmul.f32 %v2725_v5, %v5779_v41 }
 0xa64   : > { %v2729_v4 = vsub.f32 %v4628_v11, %v2727_v0 }
 0xa65   : > { %v2680_v25 = vpop.f32.mrf.mxu0 }
 0xa66   : > { %v2731_v13 = vmul.f32 %v2729_v4, %v2729_v4 }
 0xa67   : > { %v2703_v59 = vpop.f32.mrf.mxu1 }
 0xa6d   : > { %v2683_v33 = vpop.f32.mrf.mxu0 }
 0xa6f   : > { %v2706_v62 = vpop.f32.mrf.mxu1 }
 0xa70   : > { %v2634_v51 = vpop.f32.mrf.mxu2 }
 0xa71   : > { %v2657_v12 = vpop.f32.mrf.mxu3 }
 0xa72   : > { %v2658_v54 = vadd.f32 %v2657_v12, %v2634_v51 }
 0xa74   : > { %v2681_v58 = vadd.f32 %v2680_v25, %v2658_v54 }
 0xa76   : > { %v2704_v22 = vadd.f32 %v2703_v59, %v2681_v58 }
 0xa78   : > { %v2709_v6 = vadd.f32 %v2704_v22, %v6264_v17  ;;  %v2637_v60 = vpop.f32.mrf.mxu2  ;;  %v2722_v17 = vpop.xlane.xlu2 %2721 }
 0xa79   : > { %v2660_v50 = vpop.f32.mrf.mxu3  ;;  %v2726_v9 = vmul.f32 %v2722_v17, %v5779_v41 }
 0xa7a   : > { %v2714_v61 = vadd.f32 %v4843_v24, %v2709_v6  ;;  %v2661_v40 = vadd.f32 %v2660_v50, %v2637_v60 }
 0xa7b   : > { %v2728_v1 = vsub.f32 %v4627_v63, %v2726_v9 }
 0xa7c   : > { %2716 = vst [vmem:[%s5760_s13] sm:$0xff] %v2714_v61  ;;  %v2684_v53 = vadd.f32 %v2683_v33, %v2661_v40 }
 0xa7d   : > { %v2730_v55 = vmul.f32 %v2728_v1, %v2728_v1 }
 0xa7e   : > { %v2707_v52 = vadd.f32 %v2706_v62, %v2684_v53 }
 0xa7f   : > { %2732 = vadd.xlane.f32.xlu1 %v2730_v55 }
 0xa80   : > { %v2710_v21 = vadd.f32 %v2707_v52, %v6268_v29  ;;  %v2734_v29 = vsel %vm1071_vm1, %v2731_v13, 0.0 }
 0xa81   : > { %2735 = vadd.xlane.f32.xlu2 %v2734_v29 }
 0xa82   : > { %v2715_v39 = vadd.f32 %v4843_v24, %v2710_v21 }
 0xa84   : > { %2717 = vst [vmem:[%s5760_s13 + $0x8] sm:$0x1] %v2715_v39 }
 0xaf2   : > { %v2733_v28 = vpop.xlane.xlu1 %2732 }
 0xaf3   : > { %v2737_v18 = vmul.f32 %v2733_v28, %v5779_v41 }
 0xaf4   : > { %v2736_v16 = vpop.xlane.xlu2 %2735 }
 0xaf5   : > { %v2739_v49 = vadd.f32 1e-05, %v2737_v18  ;;  %v2738_v3 = vmul.f32 %v2736_v16, %v5779_v41 }
 0xaf7   : > { %4934 = vrsqrt.f32 %v2739_v49  ;;  %v2740_v27 = vadd.f32 1e-05, %v2738_v3  ;;  %vm2747_vm8 = vweird.f32 %v2739_v49 }
 0xaf9   : > { %4936 = vrsqrt.f32 %v2740_v27  ;;  %vm2757_vm14 = vweird.f32 %v2740_v27 }
 0xafd   : > { %v4935_v20 = vpop.eup %4934 }
 0xafe   : > { %v2742_v26 = vmul.f32 %v4935_v20, %v2739_v49  ;;  %vm2748_vm7 = vweird.f32 %v4935_v20 }
 0xaff   : > { %v4937_v56 = vpop.eup %4936  ;;  %vm2749_vm12 = vmor %vm2747_vm8, %vm2748_vm7 }
 0xb00   : > { %v2743_v10 = vmul.f32 %v4935_v20, %v2742_v26  ;;  %v2752_v38 = vmul.f32 %v4937_v56, %v2740_v27  ;;  %vm2758_vm13 = vweird.f32 %v4937_v56  ;;  %v5074_v27 = vld [vmem:[%s5702_s19 + $0x78] sm:$0xff] }
 0xb01   : > { %vm2759_vm15 = vmor %vm2757_vm14, %vm2758_vm13 }
 0xb02   : > { %v2744_v7 = vmul.f32 0.5, %v2743_v10  ;;  %v2753_v35 = vmul.f32 %v4937_v56, %v2752_v38  ;;  %v5075_v10 = vld [vmem:[%s5708_s22 + $0x3c8] sm:$0xff] }
 0xb04   : > { %v2745_v31 = vsub.f32 1.5, %v2744_v7  ;;  %v2754_v44 = vmul.f32 0.5, %v2753_v35  ;;  %v5076_v7 = vld [vmem:[%s5702_s19 + $0x70] sm:$0xff]  ;;  %v5080_v35 = vld [vmem:[%s5702_s19 + $0x60] sm:$0xff] }
 0xb06   : > { %v2746_v32 = vmul.f32 %v4935_v20, %v2745_v31  ;;  %v2755_v30 = vsub.f32 1.5, %v2754_v44  ;;  %v5083_v44 = vld [vmem:[%s5708_s22 + $0x2c8] sm:$0xff] }
 0xb08   : > { %v2750_v8 = vsel %vm2749_vm12, %v4935_v20, %v2746_v32  ;;  %v2756_v23 = vmul.f32 %v4937_v56, %v2755_v30  ;;  %v5077_v32 = vld [vmem:[%s5708_s22 + $0x388] sm:$0xff] }
 0xb09   : > { %v2761_v43 = vmul.f32 %v2750_v8, %v2728_v1  ;;  %v5078_v8 = vld [vmem:[%s5702_s19 + $0x68] sm:$0xff] }
 0xb0a   : > { %v2760_v51 = vsel %vm2759_vm15, %v4937_v56, %v2756_v23  ;;  %v5085_v30 = vld [vmem:[%s5708_s22 + $0x288] sm:$0xff] }
 0xb0b   : > { %v2763_v46 = vmul.f32 %v5072_v34, %v2761_v43  ;;  %v2762_v25 = vmul.f32 %v2760_v51, %v2729_v4  ;;  %v5079_v43 = vld [vmem:[%s5708_s22 + $0x348] sm:$0xff] }
 0xb0c   : > { %v5086_v51 = vld [vmem:[%s5702_s19 + $0x48] sm:$0xff] }
 0xb0d   : > { %v2765_v47 = vadd.f32 %v5073_v14, %v2763_v46  ;;  %v2764_v12 = vmul.f32 %v5072_v34, %v2762_v25  ;;  %v5081_v34 = vld [vmem:[%s5708_s22 + $0x308] sm:$0xff]  ;;  %v5082_v46 = vld [vmem:[%s5702_s19 + $0x58] sm:$0xff] }
 0xb0e   : > { %v5087_v25 = vld [vmem:[%s5708_s22 + $0x248] sm:$0xff] }
 0xb0f   : > { %2783 = vmatmul.f32.vlgmr.msra.gmra.mxu2 %v2765_v47  ;;  %2806 = vmatmul.f32.vlgmr.msrb.gmra.mxu3 %v2765_v47  ;;  %v2766_v54 = vadd.f32 %v5073_v14, %v2764_v12 }
 0xb10   : > { %2829 = vmatmul.f32.vlgmr.msra.gmra.mxu0 %v2765_v47  ;;  %v5084_v47 = vld [vmem:[%s5702_s19 + $0x50] sm:$0xff] }
 0xb17   : > { %2786 = vmatmul.f32.gmra.mxu2 %v2766_v54  ;;  %2809 = vmatmul.f32.gmra.mxu3 %v2766_v54 }
 0xb18   : > { %2832 = vmatmul.f32.gmra.mxu0 %v2766_v54  ;;  %v5088_v54 = vld [vmem:[%s5702_s19 + $0x40] sm:$0xff] }
 0xb8d   : > { %v6687_v59 = vpop.f32.mrf.mxu0 }
 0xb92   : > { %v2784_v58 = vpop.f32.mrf.mxu2  ;;  %v2807_v22 = vpop.f32.mrf.mxu3 }
 0xb93   : > { %2955 = vrot.lane.b32.xlu1 %v2807_v22, %s5493_s11  ;;  %3202 = vrot.lane.b32.xlu0 %v2807_v22, %s5492_s16 }
 0xb94   : > { %2951 = vrot.lane.b32.xlu2 %v2784_v58, %s5493_s11 }
 0xb95   : > { %v6692_v24 = vpop.f32.mrf.mxu0 }
 0xb96   : > { %4633 = vmatpush.msk.msrb.mxu2 %vm1071_vm1, %v6692_v24 }
 0xb98   : > { %2943 = vmatpush.msrb.mxu2 %v6687_v59 }
 0xb9a   : > { %v2810_v6 = vpop.f32.mrf.mxu3  ;;  %v2787_v60 = vpop.f32.mrf.mxu2 }
 0xb9b   : > { %3079 = vrot.lane.b32.xlu1 %v2807_v22, %s5494_s21  ;;  %2957 = vrot.lane.b32.xlu0 %v2810_v6, %s5493_s11 }
 0xb9c   : > { %3075 = vrot.lane.b32.xlu2 %v2784_v58, %s5494_s21  ;;  %4629 = vmatpush.xpose.msk.msrb.mxu1 %vm1198_vm9, %v2810_v6 }
 0xba0   : > { %4630 = vmatpush.xpose.msk.msrb.mxu1 %vm1198_vm9, %v2807_v22 }
 0xba3   : > { %3198 = vrot.lane.b32.xlu1 %v2784_v58, %s5492_s16  ;;  %4631 = vmatmul.msk.f32.vlgmr.msrb.gmra.mxu1 %vm1198_vm9, %v2784_v58 }
 0xba4   : > { %3204 = vrot.lane.b32.xlu2 %v2810_v6, %s5492_s16  ;;  %2953 = vrot.lane.b32.xlu0 %v2787_v60, %s5493_s11 }
 0xbab   : > { %3448 = vrot.lane.b32.xlu1 %v2807_v22, %s5496_s2  ;;  %4632 = vmatmul.msk.f32.gmra.mxu1 %vm1198_vm9, %v2787_v60 }
 0xbac   : > { %3325 = vrot.lane.b32.xlu2 %v2807_v22, %s5495_s9  ;;  %3081 = vrot.lane.b32.xlu0 %v2810_v6, %s5494_s21 }
 0xbb3   : > { %3327 = vrot.lane.b32.xlu1 %v2810_v6, %s5495_s9 }
 0xbb4   : > { %3200 = vrot.lane.b32.xlu2 %v2787_v60, %s5492_s16  ;;  %3321 = vrot.lane.b32.xlu0 %v2784_v58, %s5495_s9 }
 0xbbb   : > { %3323 = vrot.lane.b32.xlu1 %v2787_v60, %s5495_s9 }
 0xbbc   : > { %3444 = vrot.lane.b32.xlu2 %v2784_v58, %s5496_s2  ;;  %3077 = vrot.lane.b32.xlu0 %v2787_v60, %s5494_s21 }
 0xbc3   : > { %3567 = vrot.lane.b32.xlu1 %v2784_v58, %s5497_s15 }
 0xbc4   : > { %3573 = vrot.lane.b32.xlu2 %v2810_v6, %s5497_s15  ;;  %3450 = vrot.lane.b32.xlu0 %v2810_v6, %s5496_s2 }
 0xbcb   : > { %3696 = vrot.lane.b32.xlu1 %v2810_v6, %s5498_s5  ;;  %v5091_v6 = vld [vmem:[%s5708_s22 + $0x1c8] sm:$0xff] }
 0xbcc   : > { %3694 = vrot.lane.b32.xlu2 %v2807_v22, %s5498_s5  ;;  %3571 = vrot.lane.b32.xlu0 %v2807_v22, %s5497_s15  ;;  %v5090_v22 = vld [vmem:[%s5702_s19 + $0x38] sm:$0xff] }
 0xbd3   : > { %3162 = vrot.lane.b32.xlu1 %v6687_v59, %s5494_s21 }
 0xbd4   : > { %3569 = vrot.lane.b32.xlu2 %v2787_v60, %s5497_s15  ;;  %3446 = vrot.lane.b32.xlu0 %v2787_v60, %s5496_s2 }
 0xbdb   : > { %3285 = vrot.lane.b32.xlu1 %v6687_v59, %s5492_s16 }
 0xbdc   : > { %3039 = vrot.lane.b32.xlu2 %v6687_v59, %s5493_s11  ;;  %3690 = vrot.lane.b32.xlu0 %v2784_v58, %s5498_s5  ;;  %v5089_v58 = vld [vmem:[%s5708_s22 + $0x208] sm:$0xff] }
 0xbe3   : > { %3692 = vrot.lane.b32.xlu1 %v2787_v60, %s5498_s5  ;;  %v5092_v60 = vld [vmem:[%s5702_s19 + $0x30] sm:$0xff] }
 0xbe4   : > { %3287 = vrot.lane.b32.xlu2 %v6692_v24, %s5492_s16  ;;  %3041 = vrot.lane.b32.xlu0 %v6692_v24, %s5493_s11 }
 0xbec   : > { %3164 = vrot.lane.b32.xlu0 %v6692_v24, %s5494_s21 }
 0xbee   : > { %v2952_v50 = vpop.permute.xlu2 %2951 }
 0xbf4   : > { %3410 = vrot.lane.b32.xlu0 %v6692_v24, %s5495_s9 }
 0xbf6   : > { %v3076_v61 = vpop.permute.xlu2 %3075 }
 0xbfe   : > { %v3205_v40 = vpop.permute.xlu2 %3204 }
 0xc05   : > { %v2956_v33 = vpop.permute.xlu1 %2955  ;;  %v3203_v53 = vpop.permute.xlu0 %3202 }
 0xc06   : > { %v3326_v62 = vpop.permute.xlu2 %3325 }
 0xc0d   : > { %v3080_v52 = vpop.permute.xlu1 %3079  ;;  %v2958_v21 = vpop.permute.xlu0 %2957 }
 0xc0e   : > { %4636 = vmatpush.xpose.msk.msra.mxu3 %vm1198_vm9, %v2958_v21  ;;  %v3201_v63 = vpop.permute.xlu2 %3200 }
 0xc12   : > { %4637 = vmatpush.xpose.msk.msra.mxu3 %vm1198_vm9, %v2956_v33  ;;  %v5094_v33 = vld [vmem:[%s5702_s19 + $0x28] sm:$0xff] }
 0xc15   : > { %v3199_v39 = vpop.permute.xlu1 %3198  ;;  %4638 = vmatmul.msk.f32.vlgmr.msra.gmra.mxu3 %vm1198_vm9, %v2952_v50  ;;  %v5093_v50 = vld [vmem:[%s5708_s22 + $0x188] sm:$0xff] }
 0xc16   : > { %4650 = vmatpush.xpose.msk.msrb.mxu3 %vm1198_vm9, %v3205_v40  ;;  %v2954_v11 = vpop.permute.xlu0 %2953  ;;  %v3445_v9 = vpop.permute.xlu2 %3444 }
 0xc1a   : > { %4651 = vmatpush.xpose.msk.msrb.mxu3 %vm1198_vm9, %v3203_v53  ;;  %v5095_v53 = vld [vmem:[%s5708_s22 + $0x148] sm:$0xff] }
 0xc1d   : > { %v3449_v42 = vpop.permute.xlu1 %3448  ;;  %4639 = vmatmul.msk.f32.gmra.mxu3 %vm1198_vm9, %v2954_v11  ;;  %v5100_v11 = vld [vmem:[%s5702_s19 + $0x10] sm:$0xff] }
 0xc1e   : > { %v3082_v17 = vpop.permute.xlu0 %3081  ;;  %v3574_v13 = vpop.permute.xlu2 %3573 }
 0xc1f   : > { %4643 = vmatpush.xpose.msk.msra.mxu1 %vm1198_vm9, %v3082_v17 }
 0xc20   : > { %v6747_v1 = vpop.f32.mrf.mxu1 }
 0xc21   : > { %v2871_v55 = vsel %vm1234_vm10, %v6747_v1, -inf }
 0xc22   : > { %2872 = vmax.xlane.f32.xlu0 %v2871_v55  ;;  %v5103_v55 = vld [vmem:[%s5708_s22 + $0x48] sm:$0xff] }
 0xc23   : > { %4644 = vmatpush.xpose.msk.msra.mxu1 %vm1198_vm9, %v3080_v52  ;;  %v5097_v52 = vld [vmem:[%s5708_s22 + $0x108] sm:$0xff] }
 0xc25   : > { %v3328_v5 = vpop.permute.xlu1 %3327  ;;  %4652 = vmatmul.msk.f32.vlgmr.msrb.gmra.mxu3 %vm1198_vm9, %v3199_v39  ;;  %v5098_v39 = vld [vmem:[%s5702_s19 + $0x18] sm:$0xff] }
 0xc26   : > { %4645 = vmatmul.msk.f32.vlgmr.msra.gmra.mxu1 %vm1198_vm9, %v3076_v61  ;;  %v3322_v0 = vpop.permute.xlu0 %3321  ;;  %v3695_v20 = vpop.permute.xlu2 %3694 }
 0xc27   : > { %4657 = vmatpush.xpose.msk.msrb.mxu1 %vm1198_vm9, %v3328_v5  ;;  %v5104_v5 = vld [vmem:[%s5702_s19] sm:$0xff] }
 0xc28   : > { %v6755_v4 = vpop.f32.mrf.mxu1 }
 0xc29   : > { %v2874_v29 = vsel %vm1238_vm11, %v6755_v4, -inf }
 0xc2a   : > { %2875 = vmax.xlane.f32.xlu1 %v2874_v29  ;;  %v5107_v29 = vld [vmem:[%s5708_s22 + $0x398] sm:$0xff] }
 0xc2b   : > { %4658 = vmatpush.xpose.msk.msrb.mxu1 %vm1198_vm9, %v3326_v62  ;;  %v5096_v62 = vld [vmem:[%s5702_s19 + $0x20] sm:$0xff] }
 0xc2d   : > { %v3324_v28 = vpop.permute.xlu1 %3323  ;;  %4653 = vmatmul.msk.f32.gmra.mxu3 %vm1198_vm9, %v3201_v63  ;;  %v5099_v63 = vld [vmem:[%s5708_s22 + $0xc8] sm:$0xff] }
 0xc2e   : > { %v3078_v18 = vpop.permute.xlu0 %3077  ;;  %v3570_v56 = vpop.permute.xlu2 %3569 }
 0xc2f   : > { %4671 = vmatpush.xpose.msk.msra.mxu1 %vm1198_vm9, %v3574_v13  ;;  %v5106_v13 = vld [vmem:[%s5708_s22 + $0x8] sm:$0xff] }
 0xc30   : > { %4646 = vmatmul.msk.f32.gmra.mxu1 %vm1198_vm9, %v3078_v18  ;;  %v5109_v18 = vld [vmem:[%s5708_s22 + $0x358] sm:$0xff] }
 0xc35   : > { %v3568_v49 = vpop.permute.xlu1 %3567 }
 0xc36   : > { %v3451_v16 = vpop.permute.xlu0 %3450  ;;  %v3040_v12 = vpop.permute.xlu2 %3039 }
 0xc37   : > { %4664 = vmatpush.xpose.msk.msra.mxu3 %vm1198_vm9, %v3451_v16  ;;  %v5111_v16 = vld [vmem:[%s5708_s22 + $0x318] sm:$0xff] }
 0xc38   : > { %4659 = vmatmul.msk.f32.vlgmr.msrb.gmra.mxu1 %vm1198_vm9, %v3322_v0  ;;  %v5105_v0 = vld [vmem:[%s5708_s22 + $0x3d8] sm:$0xff] }
 0xc3b   : > { %4665 = vmatpush.xpose.msk.msra.mxu3 %vm1198_vm9, %v3449_v42  ;;  %v5101_v42 = vld [vmem:[%s5708_s22 + $0x88] sm:$0xff] }
 0xc3d   : > { %v3697_v3 = vpop.permute.xlu1 %3696 }
 0xc3e   : > { %4666 = vmatmul.msk.f32.vlgmr.msra.gmra.mxu3 %vm1198_vm9, %v3445_v9  ;;  %v3572_v26 = vpop.permute.xlu0 %3571  ;;  %v3288_v21 = vpop.permute.xlu2 %3287  ;;  %v5102_v9 = vld [vmem:[%s5702_s19 + $0x8] sm:$0xff] }
 0xc3f   : > { %4678 = vmatpush.xpose.msk.msrb.mxu3 %vm1198_vm9, %v3697_v3  ;;  %4672 = vmatpush.xpose.msk.msra.mxu1 %vm1198_vm9, %v3572_v26  ;;  %v5113_v3 = vld [vmem:[%s5708_s22 + $0x2d8] sm:$0xff]  ;;  %v5114_v26 = vld [vmem:[%s5708_s22 + $0x328] sm:$0xff] }
 0xc40   : > { %4660 = vmatmul.msk.f32.gmra.mxu1 %vm1198_vm9, %v3324_v28  ;;  %v5108_v28 = vld [vmem:[%s5708_s22 + $0x3e8] sm:$0xff] }
 0xc43   : > { %4679 = vmatpush.xpose.msk.msrb.mxu3 %vm1198_vm9, %v3695_v20  ;;  %3883 = vmatpush.msrb.mxu1 %v5074_v27  ;;  %v5112_v20 = vld [vmem:[%s5708_s22 + $0x368] sm:$0xff]  ;;  %v5115_v27 = vld [vmem:[%s5708_s22 + $0x298] sm:$0xff] }
 0xc44   : > { %3533 = vrot.lane.b32.xlu1 %v6692_v24, %s5496_s2 }
 0xc45   : > { %3884 = vmatpush.msrb.mxu1 %v5076_v7  ;;  %v6776_v31 = vpop.permute.xlu1 %3162  ;;  %v5117_v7 = vld [vmem:[%s5708_s22 + $0x258] sm:$0xff] }
 0xc46   : > { %v3447_v38 = vpop.permute.xlu0 %3446 }
 0xc47   : > { %3979 = vmatpush.msra.mxu3 %v5075_v10  ;;  %3885 = vmatpush.msrb.mxu1 %v5078_v8  ;;  %v5116_v10 = vld [vmem:[%s5708_s22 + $0x2e8] sm:$0xff]  ;;  %v5121_v8 = vld [vmem:[%s5708_s22 + $0x1d8] sm:$0xff] }
 0xc48   : > { %4667 = vmatmul.msk.f32.gmra.mxu3 %vm1198_vm9, %v3447_v38  ;;  %4673 = vmatmul.msk.f32.vlgmr.msra.gmra.mxu1 %vm1198_vm9, %v3568_v49  ;;  %v5110_v49 = vld [vmem:[%s5708_s22 + $0x3a8] sm:$0xff] }
 0xc49   : > { %3980 = vmatpush.msra.mxu3 %v5077_v32  ;;  %3886 = vmatpush.msrb.mxu1 %v5080_v35  ;;  %v5119_v32 = vld [vmem:[%s5708_s22 + $0x218] sm:$0xff]  ;;  %v5122_v38 = vld [vmem:[%s5708_s22 + $0x228] sm:$0xff] }
 0xc4a   : > { %v5124_v35 = vld [vmem:[%s5708_s22 + $0x1e8] sm:$0xff] }
 0xc4b   : > { %3981 = vmatpush.msra.mxu3 %v5079_v43  ;;  %3887 = vmatpush.msrb.mxu1 %v5082_v46  ;;  %v5123_v43 = vld [vmem:[%s5708_s22 + $0x198] sm:$0xff]  ;;  %v5126_v46 = vld [vmem:[%s5708_s22 + $0x1a8] sm:$0xff] }
 0xc4d   : > { %3982 = vmatpush.msra.mxu3 %v5081_v34  ;;  %v3286_v14 = vpop.permute.xlu1 %3285  ;;  %3888 = vmatpush.msrb.mxu1 %v5084_v47  ;;  %v5125_v34 = vld [vmem:[%s5708_s22 + $0x158] sm:$0xff] }
 0xc4e   : > { %v3691_v23 = vpop.permute.xlu0 %3690  ;;  %v5129_v47 = vld [vmem:[%s5708_s22 + $0xd8] sm:$0xff] }
 0xc4f   : > { %3983 = vmatpush.msra.mxu3 %v5083_v44  ;;  %3889 = vmatpush.msrb.mxu1 %v5086_v51  ;;  %v5127_v44 = vld [vmem:[%s5708_s22 + $0x118] sm:$0xff]  ;;  %v5132_v51 = vld [vmem:[%s5708_s22 + $0xe8] sm:$0xff] }
 0xc50   : > { %4674 = vmatmul.msk.f32.gmra.mxu1 %vm1198_vm9, %v3570_v56  ;;  %4680 = vmatmul.msk.f32.vlgmr.msrb.gmra.mxu3 %vm1198_vm9, %v3691_v23  ;;  %v5120_v56 = vld [vmem:[%s5708_s22 + $0x268] sm:$0xff]  ;;  %v5131_v23 = vld [vmem:[%s5708_s22 + $0x98] sm:$0xff] }
 0xc51   : > { %3984 = vmatpush.msra.mxu3 %v5085_v30  ;;  %3890 = vmatpush.msrb.mxu1 %v5088_v54  ;;  %v5130_v30 = vld [vmem:[%s5708_s22 + $0x128] sm:$0xff]  ;;  %v5135_v54 = vld [vmem:[%s5708_s22 + $0x18] sm:$0xff] }
 0xc53   : > { %3985 = vmatpush.msra.mxu3 %v5087_v25  ;;  %3891 = vmatpush.msrb.mxu1 %v5090_v22  ;;  %v5133_v25 = vld [vmem:[%s5708_s22 + $0x58] sm:$0xff]  ;;  %v5137_v22 = vld [vmem:[%s5708_s22 + $0x28] sm:$0xff] }
 0xc55   : > { %3986 = vmatpush.msra.mxu3 %v5089_v58  ;;  %3892 = vmatpush.msrb.mxu1 %v5092_v60  ;;  %v3693_v61 = vpop.permute.xlu1 %3692  ;;  %v5136_v58 = vld [vmem:[%s5708_s22 + $0x68] sm:$0xff] }
 0xc56   : > { %v3042_v40 = vpop.permute.xlu0 %3041 }
 0xc57   : > { %3987 = vmatpush.msra.mxu3 %v5091_v6  ;;  %3893 = vmatpush.msrb.mxu1 %v5094_v33 }
 0xc58   : > { %4640 = vmatpush.msk.msrb.mxu0 %vm1071_vm1, %v3042_v40  ;;  %4681 = vmatmul.msk.f32.gmra.mxu3 %vm1198_vm9, %v3693_v61 }
 0xc59   : > { %3988 = vmatpush.msra.mxu3 %v5093_v50  ;;  %3894 = vmatpush.msrb.mxu1 %v5096_v62 }
 0xc5a   : > { %3067 = vmatpush.msrb.mxu0 %v3040_v12  ;;  %v5134_v12 = vld [vmem:[%s5708_s22 + $0xa8] sm:$0xff] }
 0xc5b   : > { %3989 = vmatpush.msra.mxu3 %v5095_v53  ;;  %3895 = vmatpush.msrb.mxu1 %v5098_v39 }
 0xc5c   : > { %4654 = vmatpush.msk.msra.mxu0 %vm1071_vm1, %v3288_v21 }
 0xc5d   : > { %3990 = vmatpush.msra.mxu3 %v5097_v52  ;;  %3896 = vmatpush.msrb.mxu1 %v5100_v11 }
 0xc5e   : > { %3313 = vmatpush.msra.mxu0 %v3286_v14  ;;  %v3165_v17 = vpop.permute.xlu0 %3164  ;;  %v5128_v14 = vld [vmem:[%s5708_s22 + $0x168] sm:$0xff] }
 0xc5f   : > { %3991 = vmatpush.msra.mxu3 %v5099_v63  ;;  %3897 = vmatpush.msrb.mxu1 %v5102_v9 }
 0xc60   : > { %4647 = vmatpush.msk.msra.mxu2 %vm1071_vm1, %v3165_v17 }
 0xc61   : > { %3992 = vmatpush.msra.mxu3 %v5101_v42  ;;  %3898 = vmatpush.msrb.mxu1 %v5104_v5 }
 0xc62   : > { %3190 = vmatpush.msra.mxu2 %v6776_v31  ;;  %v5118_v31 = vld [vmem:[%s5708_s22 + $0x2a8] sm:$0xff] }
 0xc63   : > { %3993 = vmatpush.msra.mxu3 %v5103_v55  ;;  %4025 = vmatpush.msra.mxu1 %v5105_v0 }
 0xc65   : > { %3994 = vmatpush.msra.mxu3 %v5106_v13  ;;  %4026 = vmatpush.msra.mxu1 %v5107_v29 }
 0xc66   : > { %v6848_v6 = vpop.permute.xlu0 %3410 }
 0xc67   : > { %4071 = vmatpush.msrb.mxu3 %v5108_v28  ;;  %4027 = vmatpush.msra.mxu1 %v5109_v18 }
 0xc69   : > { %4072 = vmatpush.msrb.mxu3 %v5110_v49  ;;  %4028 = vmatpush.msra.mxu1 %v5111_v16 }
 0xc6b   : > { %4073 = vmatpush.msrb.mxu3 %v5112_v20  ;;  %4029 = vmatpush.msra.mxu1 %v5113_v3 }
 0xc6d   : > { %4074 = vmatpush.msrb.mxu3 %v5114_v26  ;;  %4030 = vmatpush.msra.mxu1 %v5115_v27 }
 0xc6f   : > { %4075 = vmatpush.msrb.mxu3 %v5116_v10  ;;  %4031 = vmatpush.msra.mxu1 %v5117_v7 }
 0xc71   : > { %4076 = vmatpush.msrb.mxu3 %v5118_v31  ;;  %4032 = vmatpush.msra.mxu1 %v5119_v32 }
 0xc73   : > { %4077 = vmatpush.msrb.mxu3 %v5120_v56  ;;  %4033 = vmatpush.msra.mxu1 %v5121_v8 }
 0xc75   : > { %4078 = vmatpush.msrb.mxu3 %v5122_v38  ;;  %4034 = vmatpush.msra.mxu1 %v5123_v43 }
 0xc77   : > { %4079 = vmatpush.msrb.mxu3 %v5124_v35  ;;  %4035 = vmatpush.msra.mxu1 %v5125_v34 }
 0xc79   : > { %4080 = vmatpush.msrb.mxu3 %v5126_v46  ;;  %4036 = vmatpush.msra.mxu1 %v5127_v44 }
 0xc7b   : > { %4081 = vmatpush.msrb.mxu3 %v5128_v14  ;;  %4037 = vmatpush.msra.mxu1 %v5129_v47 }
 0xc7d   : > { %4082 = vmatpush.msrb.mxu3 %v5130_v30  ;;  %4038 = vmatpush.msra.mxu1 %v5131_v23 }
 0xc7f   : > { %4083 = vmatpush.msrb.mxu3 %v5132_v51  ;;  %4039 = vmatpush.msra.mxu1 %v5133_v25 }
 0xc81   : > { %4084 = vmatpush.msrb.mxu3 %v5134_v12  ;;  %4040 = vmatpush.msra.mxu1 %v5135_v54 }
 0xc83   : > { %4085 = vmatpush.msrb.mxu3 %v5136_v58 }
 0xc85   : > { %4086 = vmatpush.msrb.mxu3 %v5137_v22 }
 0xc95   : > { %v2873_v60 = vpop.xlane.xlu0 %2872 }
 0xc96   : > { %v2877_v40 = vsub.f32 %v6747_v1, %v2873_v60 }
 0xc98   : > { %v2984_v50 = vpop.f32.mrf.mxu3  ;;  %v2879_v33 = vmul.f32 1.442695, %v2877_v40 }
 0xc99   : > { %v2990_v61 = vsel %vm1234_vm10, %v2984_v50, -inf }
 0xc9a   : > { %2991 = vmax.xlane.f32.xlu2 %v2990_v61  ;;  %4938 = vpow2.f32 %v2879_v33 }
 0xc9d   : > { %v2876_v39 = vpop.xlane.xlu1 %2875 }
 0xc9e   : > { %v2878_v63 = vsub.f32 %v6755_v4, %v2876_v39 }
 0xca0   : > { %v6853_v52 = vpop.f32.mrf.mxu3  ;;  %v6855_v21 = vpop.eup %4938  ;;  %v2881_v9 = vmul.f32 1.442695, %v2878_v63 }
 0xca1   : > { %v2883_v42 = vsel %vm1234_vm10, %v6855_v21, 0.0  ;;  %v2993_v4 = vsel %vm1238_vm11, %v6853_v52, -inf }
 0xca2   : > { %4940 = vpow2.f32 %v2881_v9 }
 0xca3   : > { %v3108_v53 = vpop.f32.mrf.mxu1 }
 0xca4   : > { %v3114_v62 = vsel %vm1234_vm10, %v3108_v53, -inf }
 0xca5   : > { %3115 = vmax.xlane.f32.xlu0 %v3114_v62 }
 0xca8   : > { %v6861_v17 = vpop.f32.mrf.mxu3  ;;  %v6871_v13 = vpop.eup %4940 }
 0xca9   : > { %v2886_v28 = vsel %vm1238_vm11, %v6871_v13, 0.0  ;;  %v3237_v16 = vsel %vm1234_vm10, %v6861_v17, -inf }
 0xcad   : > { %v3111_v11 = vpop.f32.mrf.mxu1  ;;  %2884 = vadd.xlane.f32.xlu0 %v2883_v42 }
 0xcae   : > { %v3117_v1 = vsel %vm1238_vm11, %v3111_v11, -inf }
 0xcaf   : > { %3118 = vmax.xlane.f32.xlu2 %v3117_v1 }
 0xcb0   : > { %v6869_v0 = vpop.f32.mrf.mxu3 }
 0xcb1   : > { %v3240_v20 = vsel %vm1238_vm11, %v6869_v0, -inf }
 0xcb5   : > { %v6863_v55 = vpop.f32.mrf.mxu1 }
 0xcb6   : > { %v3360_v5 = vsel %vm1234_vm10, %v6863_v55, -inf  ;;  %v6913_v25 = vpop.permute.xlu1 %3533 }
 0xcb7   : > { %3361 = vmax.xlane.f32.xlu1 %v3360_v5  ;;  %2994 = vmax.xlane.f32.xlu2 %v2993_v4 }
 0xcbd   : > { %v6873_v29 = vpop.f32.mrf.mxu1 }
 0xcbe   : > { %v3363_v18 = vsel %vm1238_vm11, %v6873_v29, -inf }
 0xcbf   : > { %2887 = vadd.xlane.f32.xlu1 %v2886_v28  ;;  %3364 = vmax.xlane.f32.xlu0 %v3363_v18 }
 0xcc1   : > { %v6879_v49 = vpop.f32.mrf.mxu3 }
 0xcc2   : > { %v3483_v32 = vsel %vm1234_vm10, %v6879_v49, -inf }
 0xcc5   : > { %v6895_v7 = vpop.f32.mrf.mxu1 }
 0xcc6   : > { %v3606_v31 = vsel %vm1234_vm10, %v6895_v7, -inf }
 0xcc7   : > { %3238 = vmax.xlane.f32.xlu1 %v3237_v16  ;;  %3241 = vmax.xlane.f32.xlu0 %v3240_v20 }
 0xccb   : > { %v6885_v3 = vpop.f32.mrf.mxu3 }
 0xccc   : > { %v3486_v26 = vsel %vm1238_vm11, %v6885_v3, -inf }
 0xccd   : > { %v6901_v56 = vpop.f32.mrf.mxu1 }
 0xcce   : > { %v3609_v8 = vsel %vm1238_vm11, %v6901_v56, -inf }
 0xccf   : > { %3408 = vrot.lane.b32.xlu2 %v6687_v59, %s5495_s9  ;;  %3487 = vmax.xlane.f32.xlu1 %v3486_v26 }
 0xcd3   : > { %v6891_v27 = vpop.f32.mrf.mxu3 }
 0xcd4   : > { %v3729_v10 = vsel %vm1234_vm10, %v6891_v27, -inf }
 0xcd7   : > { %3730 = vmax.xlane.f32.xlu1 %v3729_v10 }
 0xcdb   : > { %v6905_v38 = vpop.f32.mrf.mxu3 }
 0xcdc   : > { %v3732_v35 = vsel %vm1238_vm11, %v6905_v38, -inf }
 0xcf8   : > { %3607 = vmax.xlane.f32.xlu2 %v3606_v31 }
 0xd00   : > { %3484 = vmax.xlane.f32.xlu2 %v3483_v32 }
 0xd08   : > { %3610 = vmax.xlane.f32.xlu2 %v3609_v8 }
 0xd0d   : > { %v2992_v43 = vpop.xlane.xlu2 %2991 }
 0xd0e   : > { %v2996_v34 = vsub.f32 %v2984_v50, %v2992_v43 }
 0xd10   : > { %3733 = vmax.xlane.f32.xlu2 %v3732_v35  ;;  %v2998_v46 = vmul.f32 1.442695, %v2996_v34 }
 0xd12   : > { %4942 = vpow2.f32 %v2998_v46 }
 0xd18   : > { %v3116_v44 = vpop.xlane.xlu0 %3115  ;;  %v6909_v14 = vpop.eup %4942 }
 0xd19   : > { %v3120_v47 = vsub.f32 %v3108_v53, %v3116_v44  ;;  %v3002_v30 = vsel %vm1234_vm10, %v6909_v14, 0.0 }
 0xd1a   : > { %3003 = vadd.xlane.f32.xlu0 %v3002_v30 }
 0xd1b   : > { %v3122_v23 = vmul.f32 1.442695, %v3120_v47 }
 0xd1d   : > { %4944 = vpow2.f32 %v3122_v23 }
 0xd20   : > { %v2885_v51 = vpop.xlane.xlu0 %2884 }
 0xd21   : > { %4946 = vrcp.f32 %v2885_v51  ;;  %v2898_v63 = vand.u32 2147483647, %v2885_v51  ;;  %v2900_v42 = vand.u32 2147483648, %v2885_v51  ;;  %vm2894_vm8 = vweird.f32 %v2885_v51 }
 0xd22   : > { %v3119_v12 = vpop.xlane.xlu2 %3118 }
 0xd23   : > { %v3121_v54 = vsub.f32 %v3111_v11, %v3119_v12  ;;  %v6915_v58 = vpop.eup %4944  ;;  %v2901_v18 = vor.u32 1.1754944e-38, %v2900_v42  ;;  %vm2899_vm13 = vcmp.eq.f32.partialorder %v2898_v63, 8.507059e+37 }
 0xd24   : > { %v3126_v60 = vsel %vm1234_vm10, %v6915_v58, 0.0 }
 0xd25   : > { %v3124_v22 = vmul.f32 1.442695, %v3121_v54  ;;  %3127 = vadd.xlane.f32.xlu1 %v3126_v60 }
 0xd27   : > { %4948 = vpow2.f32 %v3124_v22  ;;  %v4947_v50 = vpop.eup %4946 }
 0xd28   : > { %v2890_v61 = vmul.f32 %v4947_v50, %v2885_v51  ;;  %vm2895_vm7 = vweird.f32 %v4947_v50 }
 0xd29   : > { %vm2896_vm12 = vmor %vm2894_vm8, %vm2895_vm7 }
 0xd2a   : > { %v3362_v40 = vpop.xlane.xlu1 %3361  ;;  %v2995_v33 = vpop.xlane.xlu2 %2994  ;;  %v2891_v53 = vsub.f32 1.0, %v2890_v61 }
 0xd2b   : > { %v3366_v62 = vsub.f32 %v6863_v55, %v3362_v40  ;;  %v2997_v39 = vsub.f32 %v6853_v52, %v2995_v33 }
 0xd2c   : > { %v2892_v1 = vmul.f32 %v4947_v50, %v2891_v53 }
 0xd2d   : > { %v6921_v11 = vpop.eup %4948  ;;  %v3368_v9 = vmul.f32 1.442695, %v3366_v62  ;;  %v3000_v5 = vmul.f32 1.442695, %v2997_v39 }
 0xd2e   : > { %v3129_v4 = vsel %vm1238_vm11, %v6921_v11, 0.0  ;;  %v2893_v28 = vadd.f32 %v4947_v50, %v2892_v1 }
 0xd2f   : > { %4950 = vpow2.f32 %v3368_v9  ;;  %3130 = vadd.xlane.f32.xlu1 %v3129_v4 }
 0xd30   : > { %4952 = vpow2.f32 %v3000_v5  ;;  %v2897_v55 = vsel %vm2896_vm12, %v4947_v50, %v2893_v28 }
 0xd31   : > { %v2902_v52 = vsel %vm2899_vm13, %v2901_v18, %v2897_v55 }
 0xd32   : > { %v2888_v16 = vpop.xlane.xlu1 %2887  ;;  %v3365_v20 = vpop.xlane.xlu0 %3364  ;;  %v2903_v26 = vmul.f32 %v6855_v21, %v2902_v52 }
 0xd33   : > { %4954 = vrcp.f32 %v2888_v16  ;;  %v3409_v8 = vpop.permute.xlu2 %3408  ;;  %v3367_v23 = vsub.f32 %v6873_v29, %v3365_v20  ;;  %v2913_v22 = vand.u32 2147483647, %v2888_v16  ;;  %vm2909_vm15 = vweird.f32 %v2888_v16 }
 0xd34   : > { %4634 = vmatmul.msk.f32.vlgmr.msrb.gmra.mxu2 %vm1234_vm10, %v2903_v26 }
 0xd35   : > { %v6926_v10 = vpop.eup %4950  ;;  %4661 = vmatpush.msk.msrb.mxu2 %vm1071_vm1, %v6848_v6  ;;  %v2915_v6 = vand.u32 2147483648, %v2888_v16  ;;  %v3370_v61 = vmul.f32 1.442695, %v3367_v23  ;;  %vm2914_vm8 = vcmp.eq.f32.partialorder %v2913_v22, 8.507059e+37 }
 0xd36   : > { %v6929_v31 = vpop.eup %4952  ;;  %v3372_v32 = vsel %vm1234_vm10, %v6926_v10, 0.0 }
 0xd37   : > { %v3005_v43 = vsel %vm1238_vm11, %v6929_v31, 0.0  ;;  %3373 = vadd.xlane.f32.xlu1 %v3372_v32  ;;  %3436 = vmatpush.msrb.mxu2 %v3409_v8  ;;  %v2916_v50 = vor.u32 1.1754944e-38, %v2915_v6 }
 0xd38   : > { %3006 = vadd.xlane.f32.xlu0 %v3005_v43 }
 0xd39   : > { %v4955_v21 = vpop.eup %4954 }
 0xd3a   : > { %v2905_v35 = vmul.f32 %v4955_v21, %v2888_v16  ;;  %v3239_v34 = vpop.xlane.xlu1 %3238  ;;  %v3242_v44 = vpop.xlane.xlu0 %3241  ;;  %vm2910_vm14 = vweird.f32 %v4955_v21 }
 0xd3b   : > { %v3243_v46 = vsub.f32 %v6861_v17, %v3239_v34  ;;  %v3244_v30 = vsub.f32 %v6869_v0, %v3242_v44  ;;  %vm2911_vm7 = vmor %vm2909_vm15, %vm2910_vm14 }
 0xd3c   : > { %v2906_v47 = vsub.f32 1.0, %v2905_v35 }
 0xd3d   : > { %v3245_v51 = vmul.f32 1.442695, %v3243_v46  ;;  %v3247_v54 = vmul.f32 1.442695, %v3244_v30 }
 0xd3e   : > { %v2907_v12 = vmul.f32 %v4955_v21, %v2906_v47 }
 0xd3f   : > { %4956 = vpow2.f32 %v3245_v51 }
 0xd40   : > { %4958 = vpow2.f32 %v3247_v54  ;;  %v2908_v60 = vadd.f32 %v4955_v21, %v2907_v12 }
 0xd41   : > { %4960 = vpow2.f32 %v3370_v61 }
 0xd42   : > { %v3488_v17 = vpop.xlane.xlu1 %3487  ;;  %v2912_v40 = vsel %vm2911_vm7, %v4955_v21, %v2908_v60 }
 0xd43   : > { %v3490_v0 = vsub.f32 %v6885_v3, %v3488_v17  ;;  %v2917_v33 = vsel %vm2914_vm8, %v2916_v50, %v2912_v40 }
 0xd44   : > { %v2918_v29 = vmul.f32 %v6871_v13, %v2917_v33 }
 0xd45   : > { %v6942_v53 = vpop.eup %4956  ;;  %v3493_v62 = vmul.f32 1.442695, %v3490_v0 }
 0xd46   : > { %v6944_v39 = vpop.eup %4958  ;;  %4635 = vmatmul.msk.f32.gmra.mxu2 %vm1234_vm10, %v2918_v29  ;;  %v3249_v63 = vsel %vm1234_vm10, %v6942_v53, 0.0 }
 0xd47   : > { %4962 = vpow2.f32 %v3493_v62  ;;  %3250 = vadd.xlane.f32.xlu2 %v3249_v63  ;;  %v3252_v42 = vsel %vm1238_vm11, %v6944_v39, 0.0  ;;  %v6951_v3 = vpop.eup %4960 }
 0xd48   : > { %3253 = vadd.xlane.f32.xlu1 %v3252_v42  ;;  %v3375_v1 = vsel %vm1238_vm11, %v6951_v3, 0.0 }
 0xd4a   : > { %v3731_v18 = vpop.xlane.xlu1 %3730 }
 0xd4b   : > { %v3735_v20 = vsub.f32 %v6891_v27, %v3731_v18 }
 0xd4d   : > { %v6953_v13 = vpop.eup %4962  ;;  %v3737_v8 = vmul.f32 1.442695, %v3735_v20 }
 0xd4e   : > { %v3498_v9 = vsel %vm1238_vm11, %v6953_v13, 0.0 }
 0xd4f   : > { %3376 = vadd.xlane.f32.xlu2 %v3375_v1 }
 0xd50   : > { %3499 = vadd.xlane.f32.xlu1 %v3498_v9 }
 0xd69   : > { %3531 = vrot.lane.b32.xlu1 %v6687_v59, %s5496_s2 }
 0xd6b   : > { %v3608_v5 = vpop.xlane.xlu2 %3607 }
 0xd6c   : > { %v3612_v4 = vsub.f32 %v6895_v7, %v3608_v5 }
 0xd6e   : > { %v3614_v28 = vmul.f32 1.442695, %v3612_v4 }
 0xd70   : > { %4964 = vpow2.f32 %v3614_v28 }
 0xd73   : > { %v3485_v55 = vpop.xlane.xlu2 %3484 }
 0xd74   : > { %v3489_v52 = vsub.f32 %v6879_v49, %v3485_v55 }
 0xd76   : > { %v6963_v16 = vpop.eup %4964  ;;  %v3491_v26 = vmul.f32 1.442695, %v3489_v52 }
 0xd77   : > { %v3618_v32 = vsel %vm1234_vm10, %v6963_v16, 0.0 }
 0xd78   : > { %4966 = vpow2.f32 %v3491_v26  ;;  %3619 = vadd.xlane.f32.xlu0 %v3618_v32 }
 0xd79   : > { %4968 = vpow2.f32 %v3737_v8 }
 0xd7b   : > { %v3611_v43 = vpop.xlane.xlu2 %3610 }
 0xd7c   : > { %v3613_v7 = vsub.f32 %v6901_v56, %v3611_v43 }
 0xd7e   : > { %v6969_v21 = vpop.eup %4966  ;;  %v3616_v35 = vmul.f32 1.442695, %v3613_v7 }
 0xd7f   : > { %v3495_v49 = vsel %vm1234_vm10, %v6969_v21, 0.0  ;;  %v6973_v34 = vpop.eup %4968 }
 0xd80   : > { %4970 = vpow2.f32 %v3616_v35  ;;  %3496 = vadd.xlane.f32.xlu0 %v3495_v49  ;;  %v3741_v56 = vsel %vm1234_vm10, %v6973_v34, 0.0 }
 0xd83   : > { %v3734_v27 = vpop.xlane.xlu2 %3733 }
 0xd84   : > { %v3736_v46 = vsub.f32 %v6905_v38, %v3734_v27 }
 0xd86   : > { %v6976_v44 = vpop.eup %4970  ;;  %v3739_v47 = vmul.f32 1.442695, %v3736_v46 }
 0xd87   : > { %v3621_v30 = vsel %vm1238_vm11, %v6976_v44, 0.0 }
 0xd88   : > { %3742 = vadd.xlane.f32.xlu0 %v3741_v56  ;;  %3622 = vadd.xlane.f32.xlu2 %v3621_v30  ;;  %4972 = vpow2.f32 %v3739_v47 }
 0xd8d   : > { %v3004_v23 = vpop.xlane.xlu0 %3003 }
 0xd8e   : > { %v6982_v6 = vpop.eup %4972  ;;  %4974 = vrcp.f32 %v3004_v23  ;;  %v3019_v60 = vand.u32 2147483648, %v3004_v23  ;;  %v3017_v61 = vand.u32 2147483647, %v3004_v23  ;;  %vm3013_vm13 = vweird.f32 %v3004_v23 }
 0xd8f   : > { %v3744_v51 = vsel %vm1238_vm11, %v6982_v6, 0.0 }
 0xd90   : > { %v3020_v40 = vor.u32 1.1754944e-38, %v3019_v60  ;;  %vm3018_vm15 = vcmp.eq.f32.partialorder %v3017_v61, 8.507059e+37 }
 0xd93   : > { %3745 = vadd.xlane.f32.xlu1 %v3744_v51 }
 0xd94   : > { %v4975_v38 = vpop.eup %4974 }
 0xd95   : > { %v3009_v12 = vmul.f32 %v4975_v38, %v3004_v23  ;;  %vm3014_vm12 = vweird.f32 %v4975_v38 }
 0xd96   : > { %vm3015_vm14 = vmor %vm3013_vm13, %vm3014_vm12 }
 0xd97   : > { %v3010_v54 = vsub.f32 1.0, %v3009_v12 }
 0xd98   : > { %v3128_v22 = vpop.xlane.xlu1 %3127 }
 0xd99   : > { %4976 = vrcp.f32 %v3128_v22  ;;  %v3011_v50 = vmul.f32 %v4975_v38, %v3010_v54  ;;  %v3143_v9 = vand.u32 2147483648, %v3128_v22  ;;  %v3141_v4 = vand.u32 2147483647, %v3128_v22 }
 0xd9a   : > { %vm3137_vm7 = vweird.f32 %v3128_v22 }
 0xd9b   : > { %v3012_v17 = vadd.f32 %v4975_v38, %v3011_v50  ;;  %v3144_v18 = vor.u32 1.1754944e-38, %v3143_v9  ;;  %vm3142_vm12 = vcmp.eq.f32.partialorder %v3141_v4, 8.507059e+37 }
 0xd9c   : > { %3656 = vrot.lane.b32.xlu0 %v6692_v24, %s5497_s15 }
 0xd9d   : > { %v3016_v0 = vsel %vm3015_vm14, %v4975_v38, %v3012_v17 }
 0xd9e   : > { %v3021_v29 = vsel %vm3018_vm15, %v3020_v40, %v3016_v0 }
 0xd9f   : > { %v4977_v33 = vpop.eup %4976  ;;  %v3022_v63 = vmul.f32 %v6909_v14, %v3021_v29 }
 0xda0   : > { %3654 = vrot.lane.b32.xlu2 %v6687_v59, %s5497_s15  ;;  %v3133_v62 = vmul.f32 %v4977_v33, %v3128_v22  ;;  %vm3138_vm11 = vweird.f32 %v4977_v33 }
 0xda1   : > { %4641 = vmatmul.msk.f32.vlgmr.msrb.gmra.mxu0 %vm1234_vm10, %v3022_v63  ;;  %vm3139_vm8 = vmor %vm3137_vm7, %vm3138_vm11 }
 0xda2   : > { %v3131_v42 = vpop.xlane.xlu1 %3130  ;;  %v3134_v1 = vsub.f32 1.0, %v3133_v62  ;;  %4668 = vmatpush.msk.msrb.mxu0 %vm1071_vm1, %v6913_v25 }
 0xda3   : > { %4978 = vrcp.f32 %v3131_v42  ;;  %v3156_v7 = vand.u32 2147483647, %v3131_v42  ;;  %vm3152_vm14 = vweird.f32 %v3131_v42 }
 0xda4   : > { %3779 = vrot.lane.b32.xlu0 %v6692_v24, %s5498_s5  ;;  %v3135_v5 = vmul.f32 %v4977_v33, %v3134_v1  ;;  %v3158_v24 = vand.u32 2147483648, %v3131_v42 }
 0xda5   : > { %vm3157_vm11 = vcmp.eq.f32.partialorder %v3156_v7, 8.507059e+37 }
 0xda6   : > { %v3136_v28 = vadd.f32 %v4977_v33, %v3135_v5  ;;  %v3159_v27 = vor.u32 1.1754944e-38, %v3158_v24 }
 0xda8   : > { %v3140_v55 = vsel %vm3139_vm8, %v4977_v33, %v3136_v28 }
 0xda9   : > { %v4979_v14 = vpop.eup %4978  ;;  %v3145_v52 = vsel %vm3142_vm12, %v3144_v18, %v3140_v55 }
 0xdaa   : > { %v3148_v20 = vmul.f32 %v4979_v14, %v3131_v42  ;;  %v3374_v26 = vpop.xlane.xlu1 %3373  ;;  %v3146_v25 = vmul.f32 %v6915_v58, %v3145_v52  ;;  %vm3153_vm13 = vweird.f32 %v4979_v14 }
 0xdab   : > { %4980 = vrcp.f32 %v3374_v26  ;;  %v3007_v32 = vpop.xlane.xlu0 %3006  ;;  %vm3154_vm15 = vmor %vm3152_vm14, %vm3153_vm13  ;;  %v3389_v58 = vand.u32 2147483648, %v3374_v26  ;;  %v3387_v54 = vand.u32 2147483647, %v3374_v26  ;;  %vm3383_vm8 = vweird.f32 %v3374_v26 }
 0xdac   : > { %v3149_v8 = vsub.f32 1.0, %v3148_v20  ;;  %4982 = vrcp.f32 %v3007_v32  ;;  %3777 = vrot.lane.b32.xlu0 %v6687_v59, %s5498_s5  ;;  %4648 = vmatmul.msk.f32.vlgmr.msra.gmra.mxu2 %vm1234_vm10, %v3146_v25  ;;  %v3034_v50 = vand.u32 2147483648, %v3007_v32  ;;  %v3032_v40 = vand.u32 2147483647, %v3007_v32 }
 0xdad   : > { %v3390_v61 = vor.u32 1.1754944e-38, %v3389_v58  ;;  %vm3388_vm14 = vcmp.eq.f32.partialorder %v3387_v54, 8.507059e+37 }
 0xdae   : > { %v3150_v43 = vmul.f32 %v4979_v14, %v3149_v8  ;;  %v3035_v62 = vor.u32 1.1754944e-38, %v3034_v50  ;;  %vm3033_vm6 = vcmp.eq.f32.partialorder %v3032_v40, 8.507059e+37 }
 0xdb0   : > { %v3151_v35 = vadd.f32 %v4979_v14, %v3150_v43 }
 0xdb1   : > { %v4981_v49 = vpop.eup %4980 }
 0xdb2   : > { %v4983_v46 = vpop.eup %4982  ;;  %v3379_v47 = vmul.f32 %v4981_v49, %v3374_v26  ;;  %v3155_v56 = vsel %vm3154_vm15, %v4979_v14, %v3151_v35  ;;  %vm3384_vm7 = vweird.f32 %v4981_v49  ;;  %vm3028_vm15 = vweird.f32 %v3007_v32 }
 0xdb3   : > { %v3024_v30 = vmul.f32 %v4983_v46, %v3007_v32  ;;  %v3160_v23 = vsel %vm3157_vm11, %v3159_v27, %v3155_v56  ;;  %vm3385_vm12 = vmor %vm3383_vm8, %vm3384_vm7  ;;  %vm3029_vm13 = vweird.f32 %v4983_v46 }
 0xdb4   : > { %v3380_v59 = vsub.f32 1.0, %v3379_v47  ;;  %v3161_v51 = vmul.f32 %v6921_v11, %v3160_v23  ;;  %vm3030_vm11 = vmor %vm3028_vm15, %vm3029_vm13 }
 0xdb5   : > { %v3025_v38 = vsub.f32 1.0, %v3024_v30 }
 0xdb6   : > { %v3381_v12 = vmul.f32 %v4981_v49, %v3380_v59  ;;  %4649 = vmatmul.msk.f32.gmra.mxu2 %vm1234_vm10, %v3161_v51 }
 0xdb7   : > { %v3026_v22 = vmul.f32 %v4983_v46, %v3025_v38 }
 0xdb8   : > { %v3382_v60 = vadd.f32 %v4981_v49, %v3381_v12 }
 0xdb9   : > { %v3027_v17 = vadd.f32 %v4983_v46, %v3026_v22 }
 0xdba   : > { %v3386_v0 = vsel %vm3385_vm12, %v4981_v49, %v3382_v60  ;;  %v3251_v33 = vpop.xlane.xlu2 %3250 }
 0xdbb   : > { %v3391_v11 = vsel %vm3388_vm14, %v3390_v61, %v3386_v0  ;;  %4984 = vrcp.f32 %v3251_v33  ;;  %v3254_v29 = vpop.xlane.xlu1 %3253  ;;  %v3031_v63 = vsel %vm3030_vm11, %v4983_v46, %v3027_v17  ;;  %v3264_v52 = vand.u32 2147483647, %v3251_v33 }
 0xdbc   : > { %4986 = vrcp.f32 %v3254_v29  ;;  %v3392_v42 = vmul.f32 %v6926_v10, %v3391_v11  ;;  %v3036_v1 = vsel %vm3033_vm6, %v3035_v62, %v3031_v63  ;;  %v3266_v20 = vand.u32 2147483648, %v3251_v33 }
 0xdbd   : > { %v3037_v9 = vmul.f32 %v6929_v31, %v3036_v1  ;;  %vm3260_vm6 = vweird.f32 %v3251_v33  ;;  %vm3265_vm12 = vcmp.eq.f32.partialorder %v3264_v52, 8.507059e+37  ;;  %v3281_v49 = vand.u32 2147483648, %v3254_v29 }
 0xdbe   : > { %4662 = vmatmul.msk.f32.vlgmr.msrb.gmra.mxu2 %vm1234_vm10, %v3392_v42  ;;  %v3267_v24 = vor.u32 1.1754944e-38, %v3266_v20  ;;  %vm3275_vm14 = vweird.f32 %v3254_v29  ;;  %v3279_v47 = vand.u32 2147483647, %v3254_v29 }
 0xdbf   : > { %4642 = vmatmul.msk.f32.gmra.mxu0 %vm1234_vm10, %v3037_v9  ;;  %v3282_v51 = vor.u32 1.1754944e-38, %v3281_v49 }
 0xdc1   : > { %v4985_v5 = vpop.eup %4984 }
 0xdc2   : > { %v4987_v4 = vpop.eup %4986  ;;  %v3256_v28 = vmul.f32 %v4985_v5, %v3251_v33  ;;  %v3377_v18 = vpop.xlane.xlu2 %3376  ;;  %vm3261_vm7 = vweird.f32 %v4985_v5 }
 0xdc3   : > { %v3271_v14 = vmul.f32 %v4987_v4, %v3254_v29  ;;  %4988 = vrcp.f32 %v3377_v18  ;;  %vm3262_vm8 = vmor %vm3260_vm6, %vm3261_vm7  ;;  %vm3276_vm13 = vweird.f32 %v4987_v4  ;;  %v3404_v56 = vand.u32 2147483648, %v3377_v18  ;;  %v3500_v22 = vpop.xlane.xlu1 %3499 }
 0xdc4   : > { %v3257_v55 = vsub.f32 1.0, %v3256_v28  ;;  %vm3277_vm15 = vmor %vm3275_vm14, %vm3276_vm13  ;;  %v3402_v59 = vand.u32 2147483647, %v3377_v18  ;;  %vm3398_vm7 = vweird.f32 %v3377_v18  ;;  %vm3280_vm6 = vcmp.eq.f32.partialorder %v3279_v47, 8.507059e+37 }
 0xdc5   : > { %v3272_v26 = vsub.f32 1.0, %v3271_v14  ;;  %v3405_v38 = vor.u32 1.1754944e-38, %v3404_v56  ;;  %4990 = vrcp.f32 %v3500_v22 }
 0xdc6   : > { %v3258_v32 = vmul.f32 %v4985_v5, %v3257_v55 }
 0xdc7   : > { %v3273_v10 = vmul.f32 %v4987_v4, %v3272_v26 }
 0xdc8   : > { %v3259_v8 = vadd.f32 %v4985_v5, %v3258_v32 }
 0xdc9   : > { %v4989_v31 = vpop.eup %4988  ;;  %v3274_v7 = vadd.f32 %v4987_v4, %v3273_v10 }
 0xdca   : > { %v3263_v25 = vsel %vm3262_vm8, %v4985_v5, %v3259_v8  ;;  %v3394_v43 = vmul.f32 %v4989_v31, %v3377_v18  ;;  %vm3399_vm11 = vweird.f32 %v4989_v31  ;;  %v3527_v8 = vand.u32 2147483648, %v3500_v22 }
 0xdcb   : > { %v3268_v35 = vsel %vm3265_vm12, %v3267_v24, %v3263_v25  ;;  %v3278_v23 = vsel %vm3277_vm15, %v4987_v4, %v3274_v7  ;;  %vm3400_vm8 = vmor %vm3398_vm7, %vm3399_vm11  ;;  %vm3403_vm12 = vcmp.eq.f32.partialorder %v3402_v59, 8.507059e+37  ;;  %v4991_v40 = vpop.eup %4990 }
 0xdcc   : > { %v3395_v27 = vsub.f32 1.0, %v3394_v43  ;;  %v3269_v46 = vmul.f32 %v6942_v53, %v3268_v35  ;;  %v3283_v12 = vsel %vm3280_vm6, %v3282_v51, %v3278_v23  ;;  %v3517_v33 = vmul.f32 %v4991_v40, %v3500_v22 }
 0xdcd   : > { %v3284_v60 = vmul.f32 %v6944_v39, %v3283_v12  ;;  %vm3522_vm11 = vweird.f32 %v4991_v40  ;;  %vm3521_vm6 = vweird.f32 %v3500_v22  ;;  %v3525_v43 = vand.u32 2147483647, %v3500_v22 }
 0xdce   : > { %v3396_v30 = vmul.f32 %v4989_v31, %v3395_v27  ;;  %4655 = vmatmul.msk.f32.vlgmr.msra.gmra.mxu0 %vm1234_vm10, %v3269_v46  ;;  %v3518_v62 = vsub.f32 1.0, %v3517_v33  ;;  %v3528_v47 = vor.u32 1.1754944e-38, %v3527_v8  ;;  %v5144_v8 = vld [vmem:[%s5708_s22 + $0x240] sm:$0xff] }
 0xdd0   : > { %v3397_v58 = vadd.f32 %v4989_v31, %v3396_v30  ;;  %v3519_v9 = vmul.f32 %v4991_v40, %v3518_v62 }
 0xdd2   : > { %v3401_v54 = vsel %vm3400_vm8, %v4989_v31, %v3397_v58  ;;  %v3520_v10 = vadd.f32 %v4991_v40, %v3519_v9  ;;  %v5140_v9 = vld [vmem:[%s5708_s22 + $0x340] sm:$0xff] }
 0xdd3   : > { %v3406_v53 = vsel %vm3403_vm12, %v3405_v38, %v3401_v54  ;;  %vm3523_vm12 = vmor %vm3521_vm6, %vm3522_vm11 }
 0xdd4   : > { %v3407_v50 = vmul.f32 %v6951_v3, %v3406_v53  ;;  %v3524_v46 = vsel %vm3523_vm12, %v4991_v40, %v3520_v10 }
 0xdd6   : > { %4656 = vmatmul.msk.f32.gmra.mxu0 %vm1234_vm10, %v3284_v60  ;;  %4663 = vmatmul.msk.f32.gmra.mxu2 %vm1234_vm10, %v3407_v50 }
 0xddb   : > { %v3532_v61 = vpop.permute.xlu1 %3531 }
 0xddc   : > { %3559 = vmatpush.msrb.mxu0 %v3532_v61 }
 0xdeb   : > { %v3620_v17 = vpop.xlane.xlu0 %3619 }
 0xdec   : > { %4992 = vrcp.f32 %v3620_v17  ;;  %v3635_v27 = vand.u32 2147483648, %v3620_v17  ;;  %v3633_v56 = vand.u32 2147483647, %v3620_v17 }
 0xdee   : > { %v3636_v51 = vor.u32 1.1754944e-38, %v3635_v27  ;;  %vm3634_vm11 = vcmp.eq.f32.partialorder %v3633_v56, 8.507059e+37  ;;  %v5149_v27 = vld [vmem:[%s5708_s22 + $0x350] sm:$0xff] }
 0xdef   : > { %v5151_v56 = vld [vmem:[%s5708_s22 + $0x310] sm:$0xff] }
 0xdf2   : > { %v4993_v11 = vpop.eup %4992 }
 0xdf3   : > { %v3497_v0 = vpop.xlane.xlu0 %3496  ;;  %v3625_v63 = vmul.f32 %v4993_v11, %v3620_v17  ;;  %vm3630_vm8 = vweird.f32 %v4993_v11 }
 0xdf4   : > { %4994 = vrcp.f32 %v3497_v0  ;;  %v3512_v4 = vand.u32 2147483648, %v3497_v0  ;;  %v3510_v18 = vand.u32 2147483647, %v3497_v0  ;;  %vm3506_vm14 = vweird.f32 %v3497_v0 }
 0xdf5   : > { %v3626_v5 = vsub.f32 1.0, %v3625_v63 }
 0xdf6   : > { %v3513_v20 = vor.u32 1.1754944e-38, %v3512_v4  ;;  %vm3511_vm7 = vcmp.eq.f32.partialorder %v3510_v18, 8.507059e+37 }
 0xdf7   : > { %v3627_v52 = vmul.f32 %v4993_v11, %v3626_v5 }
 0xdf9   : > { %v3628_v7 = vadd.f32 %v4993_v11, %v3627_v52 }
 0xdfa   : > { %v4995_v29 = vpop.eup %4994 }
 0xdfb   : > { %v3502_v39 = vmul.f32 %v4995_v29, %v3497_v0  ;;  %v7012_v42 = vpop.xlane.xlu2 %3622  ;;  %v7015_v3 = vpop.xlane.xlu0 %3742  ;;  %vm3507_vm13 = vweird.f32 %v4995_v29 }
 0xdfc   : > { %4996 = vrcp.f32 %v7012_v42  ;;  %vm3508_vm15 = vmor %vm3506_vm14, %vm3507_vm13  ;;  %vm3629_vm13 = vweird.f32 %v3620_v17  ;;  %vm3644_vm6 = vweird.f32 %v7012_v42  ;;  %v3650_v60 = vand.u32 2147483648, %v7012_v42 }
 0xdfd   : > { %v3503_v1 = vsub.f32 1.0, %v3502_v39  ;;  %4998 = vrcp.f32 %v7015_v3  ;;  %vm3631_vm14 = vmor %vm3629_vm13, %vm3630_vm8  ;;  %v3648_v61 = vand.u32 2147483647, %v7012_v42  ;;  %v3758_v62 = vand.u32 2147483648, %v7015_v3  ;;  %v5139_v39 = vld [vmem:[%s5708_s22 + $0x380] sm:$0xff] }
 0xdfe   : > { %v3632_v30 = vsel %vm3631_vm14, %v4993_v11, %v3628_v7  ;;  %v3651_v33 = vor.u32 1.1754944e-38, %v3650_v60  ;;  %v5138_v11 = vld [vmem:[%s5708_s22 + $0x3c0] sm:$0xff]  ;;  %vm3752_vm14 = vweird.f32 %v7015_v3 }
 0xdff   : > { %v3504_v28 = vmul.f32 %v4995_v29, %v3503_v1  ;;  %v3637_v12 = vsel %vm3634_vm11, %v3636_v51, %v3632_v30  ;;  %vm3649_vm12 = vcmp.eq.f32.partialorder %v3648_v61, 8.507059e+37  ;;  %v3759_v18 = vor.u32 1.1754944e-38, %v3758_v62  ;;  %v5153_v30 = vld [vmem:[%s5708_s22 + $0x2d0] sm:$0xff]  ;;  %v5171_v62 = vld [vmem:[%s5708_s22 + $0x2e0] sm:$0xff] }
 0xe00   : > { %v3638_v50 = vmul.f32 %v6963_v16, %v3637_v12  ;;  %v5155_v51 = vld [vmem:[%s5708_s22 + $0x290] sm:$0xff] }
 0xe01   : > { %v3505_v14 = vadd.f32 %v4995_v29, %v3504_v28  ;;  %v5159_v12 = vld [vmem:[%s5708_s22 + $0x210] sm:$0xff] }
 0xe02   : > { %v7018_v55 = vpop.eup %4996  ;;  %v5164_v61 = vld [vmem:[%s5708_s22 + $0x190] sm:$0xff] }
 0xe03   : > { %v3509_v26 = vsel %vm3508_vm15, %v4995_v29, %v3505_v14  ;;  %v3640_v32 = vmul.f32 %v7018_v55, %v7012_v42  ;;  %v7022_v24 = vpop.eup %4998  ;;  %vm3526_vm15 = vcmp.eq.f32.partialorder %v3525_v43, 8.507059e+37  ;;  %v3655_v17 = vpop.permute.xlu2 %3654  ;;  %v3756_v42 = vand.u32 2147483647, %v7015_v3  ;;  %v5141_v14 = vld [vmem:[%s5708_s22 + $0x300] sm:$0xff] }
 0xe04   : > { %v3514_v31 = vsel %vm3511_vm7, %v3513_v20, %v3509_v26  ;;  %v3529_v59 = vsel %vm3526_vm15, %v3528_v47, %v3524_v46  ;;  %vm3645_vm7 = vweird.f32 %v7018_v55  ;;  %vm3753_vm13 = vweird.f32 %v7022_v24  ;;  %v5143_v26 = vld [vmem:[%s5708_s22 + $0x280] sm:$0xff]  ;;  %v7076_v43 = vpop.f32.mrf.mxu2 }
 0xe05   : > { %v3515_v25 = vmul.f32 %v6969_v21, %v3514_v31  ;;  %v3641_v35 = vsub.f32 1.0, %v3640_v32  ;;  %v3748_v21 = vmul.f32 %v7022_v24, %v7015_v3  ;;  %v3530_v54 = vmul.f32 %v6953_v13, %v3529_v59  ;;  %vm3646_vm8 = vmor %vm3644_vm6, %vm3645_vm7  ;;  %v5150_v46 = vld [vmem:[%s5708_s22 + $0x180] sm:$0xff] }
 0xe06   : > { %v7025_v49 = vpop.xlane.xlu1 %3745  ;;  %vm3754_vm15 = vmor %vm3752_vm14, %vm3753_vm13  ;;  %vm3757_vm11 = vcmp.eq.f32.partialorder %v3756_v42, 8.507059e+37  ;;  %v5173_v42 = vld [vmem:[%s5708_s22 + $0x2a0] sm:$0xff] }
 0xe07   : > { %5000 = vrcp.f32 %v7025_v49  ;;  %4669 = vmatmul.msk.f32.vlgmr.msrb.gmra.mxu0 %vm1234_vm10, %v3515_v25  ;;  %v3642_v23 = vmul.f32 %v7018_v55, %v3641_v35  ;;  %v3749_v58 = vsub.f32 1.0, %v3748_v21  ;;  %v3773_v20 = vand.u32 2147483648, %v7025_v49  ;;  %v5145_v25 = vld [vmem:[%s5708_s22 + $0x3d0] sm:$0xff]  ;;  %v5152_v21 = vld [vmem:[%s5708_s22 + $0x140] sm:$0xff] }
 0xe08   : > { %vm3767_vm6 = vweird.f32 %v7025_v49  ;;  %v3771_v32 = vand.u32 2147483647, %v7025_v49  ;;  %v5147_v35 = vld [vmem:[%s5708_s22 + $0x390] sm:$0xff] }
 0xe09   : > { %v3643_v22 = vadd.f32 %v7018_v55, %v3642_v23  ;;  %v3750_v13 = vmul.f32 %v7022_v24, %v3749_v58  ;;  %v5154_v23 = vld [vmem:[%s5708_s22 + $0x100] sm:$0xff]  ;;  %v5157_v58 = vld [vmem:[%s5708_s22 + $0x250] sm:$0xff] }
 0xe0b   : > { %v3647_v0 = vsel %vm3646_vm8, %v7018_v55, %v3643_v22  ;;  %v3751_v16 = vadd.f32 %v7022_v24, %v3750_v13  ;;  %v5142_v55 = vld [vmem:[%s5708_s22 + $0x2c0] sm:$0xff]  ;;  %v5161_v22 = vld [vmem:[%s5708_s22 + $0x1d0] sm:$0xff] }
 0xe0c   : > { %v3652_v63 = vsel %vm3649_vm12, %v3651_v33, %v3647_v0  ;;  %vm3772_vm12 = vcmp.eq.f32.partialorder %v3771_v32, 8.507059e+37  ;;  %v7088_v59 = vpop.f32.mrf.mxu2  ;;  %v5165_v13 = vld [vmem:[%s5708_s22 + $0x3a0] sm:$0xff]  ;;  %v5168_v33 = vld [vmem:[%s5708_s22 + $0x110] sm:$0xff] }
 0xe0d   : > { %v7033_v38 = vpop.eup %5000  ;;  %v3755_v5 = vsel %vm3754_vm15, %v7022_v24, %v3751_v16  ;;  %v3653_v28 = vmul.f32 %v6976_v44, %v3652_v63  ;;  %v3774_v24 = vor.u32 1.1754944e-38, %v3773_v20  ;;  %v5167_v0 = vld [vmem:[%s5708_s22 + $0x360] sm:$0xff]  ;;  %v5170_v16 = vld [vmem:[%s5708_s22 + $0xd0] sm:$0xff] }
 0xe0e   : > { %v3657_v53 = vpop.permute.xlu0 %3656  ;;  %v3763_v40 = vmul.f32 %v7033_v38, %v7025_v49  ;;  %v3760_v3 = vsel %vm3757_vm11, %v3759_v18, %v3755_v5  ;;  %vm3768_vm7 = vweird.f32 %v7033_v38  ;;  %v5148_v49 = vld [vmem:[%s5708_s22 + $0x1c0] sm:$0xff]  ;;  %v5177_v18 = vld [vmem:[%s5708_s22 + $0x3f0] sm:$0xff] }
 0xe0f   : > { %4670 = vmatmul.msk.f32.gmra.mxu0 %vm1234_vm10, %v3530_v54  ;;  %4675 = vmatpush.msk.msra.mxu2 %vm1071_vm1, %v3657_v53  ;;  %v3761_v44 = vmul.f32 %v6973_v34, %v3760_v3  ;;  %vm3769_vm8 = vmor %vm3767_vm6, %vm3768_vm7  ;;  %v5146_v34 = vld [vmem:[%s5708_s22 + $0x200] sm:$0xff]  ;;  %v5179_v3 = vld [vmem:[%s5708_s22 + $0x3b0] sm:$0xff] }
 0xe10   : > { %v3764_v29 = vsub.f32 1.0, %v3763_v40  ;;  %v5160_v54 = vld [vmem:[%s5708_s22 + $0x40] sm:$0xff]  ;;  %v5185_v32 = vld [vmem:[%s5708_s22 + $0x2f0] sm:$0xff] }
 0xe11   : > { %3682 = vmatpush.msra.mxu2 %v3655_v17  ;;  %v5162_v53 = vld [vmem:[%s5708_s22] sm:$0xff]  ;;  %v5166_v17 = vld [vmem:[%s5708_s22 + $0x150] sm:$0xff] }
 0xe12   : > { %4676 = vmatmul.msk.f32.vlgmr.msra.gmra.mxu2 %vm1234_vm10, %v3638_v50  ;;  %v3765_v4 = vmul.f32 %v7033_v38, %v3764_v29  ;;  %v5163_v50 = vld [vmem:[%s5708_s22 + $0x3e0] sm:$0xff] }
 0xe13   : > { %3956 = vmatpush.msrb.mxu2 %v5138_v11  ;;  %v5169_v11 = vld [vmem:[%s5708_s22 + $0x320] sm:$0xff] }
 0xe14   : > { %v3766_v52 = vadd.f32 %v7033_v38, %v3765_v4  ;;  %v5175_v5 = vld [vmem:[%s5708_s22 + $0x260] sm:$0xff] }
 0xe15   : > { %3957 = vmatpush.msrb.mxu2 %v5139_v39  ;;  %v5172_v39 = vld [vmem:[%s5708_s22 + $0x90] sm:$0xff]  ;;  %v5182_v20 = vld [vmem:[%s5708_s22 + $0x1a0] sm:$0xff] }
 0xe16   : > { %v3780_v1 = vpop.permute.xlu0 %3779  ;;  %v3770_v31 = vsel %vm3769_vm8, %v7033_v38, %v3766_v52  ;;  %v5158_v38 = vld [vmem:[%s5708_s22 + $0x80] sm:$0xff]  ;;  %v5181_v52 = vld [vmem:[%s5708_s22 + $0x370] sm:$0xff] }
 0xe17   : > { %4682 = vmatpush.msk.msra.mxu0 %vm1071_vm1, %v3780_v1  ;;  %3958 = vmatpush.msrb.mxu2 %v5140_v9  ;;  %v3775_v7 = vsel %vm3772_vm12, %v3774_v24, %v3770_v31  ;;  %v5174_v1 = vld [vmem:[%s5708_s22 + $0x50] sm:$0xff]  ;;  %v5188_v31 = vld [vmem:[%s5708_s22 + $0xe0] sm:$0xff] }
 0xe18   : > { %v3776_v47 = vmul.f32 %v6982_v6, %v3775_v7  ;;  %v5156_v6 = vld [vmem:[%s5708_s22 + $0xc0] sm:$0xff]  ;;  %v5191_v7 = vld [vmem:[%s5708_s22 + $0x230] sm:$0xff] }
 0xe19   : > { %3959 = vmatpush.msrb.mxu2 %v5141_v14  ;;  %v5178_v14 = vld [vmem:[%s5708_s22 + $0x220] sm:$0xff] }
 0xe1a   : > { %4677 = vmatmul.msk.f32.gmra.mxu2 %vm1234_vm10, %v3653_v28  ;;  %v5176_v28 = vld [vmem:[%s5708_s22 + $0x10] sm:$0xff] }
 0xe1b   : > { %3960 = vmatpush.msrb.mxu2 %v5142_v55  ;;  %v5180_v55 = vld [vmem:[%s5708_s22 + $0x1e0] sm:$0xff] }
 0xe1d   : > { %3961 = vmatpush.msrb.mxu2 %v5143_v26  ;;  %v5183_v26 = vld [vmem:[%s5708_s22 + $0x330] sm:$0xff] }
 0xe1e   : > { %v3778_v10 = vpop.permute.xlu0 %3777  ;;  %v3069_v40 = vpop.f32.mrf.mxu0 }
 0xe1f   : > { %3805 = vmatpush.msra.mxu0 %v3778_v10  ;;  %3962 = vmatpush.msrb.mxu2 %v5144_v8  ;;  %v5186_v10 = vld [vmem:[%s5708_s22 + $0x120] sm:$0xff]  ;;  %v5187_v8 = vld [vmem:[%s5708_s22 + $0x2b0] sm:$0xff] }
 0xe20   : > { %4683 = vmatmul.msk.f32.vlgmr.msra.gmra.mxu0 %vm1234_vm10, %v3761_v44  ;;  %v5184_v44 = vld [vmem:[%s5708_s22 + $0x160] sm:$0xff] }
 0xe21   : > { %4002 = vmatpush.msrb.mxu0 %v5145_v25  ;;  %3963 = vmatpush.msrb.mxu2 %v5146_v34  ;;  %v5189_v25 = vld [vmem:[%s5708_s22 + $0x270] sm:$0xff]  ;;  %v5190_v34 = vld [vmem:[%s5708_s22 + $0xa0] sm:$0xff] }
 0xe23   : > { %4003 = vmatpush.msrb.mxu0 %v5147_v35  ;;  %3964 = vmatpush.msrb.mxu2 %v5148_v49  ;;  %v5192_v35 = vld [vmem:[%s5708_s22 + $0x60] sm:$0xff]  ;;  %v5193_v49 = vld [vmem:[%s5708_s22 + $0x1f0] sm:$0xff] }
 0xe25   : > { %4004 = vmatpush.msrb.mxu0 %v5149_v27  ;;  %3965 = vmatpush.msrb.mxu2 %v5150_v46  ;;  %v5194_v27 = vld [vmem:[%s5708_s22 + $0x20] sm:$0xff] }
 0xe27   : > { %4005 = vmatpush.msrb.mxu0 %v5151_v56  ;;  %3966 = vmatpush.msrb.mxu2 %v5152_v21 }
 0xe28   : > { %4684 = vmatmul.msk.f32.gmra.mxu0 %vm1234_vm10, %v3776_v47  ;;  %v5195_v47 = vld [vmem:[%s5708_s22 + $0x1b0] sm:$0xff]  ;;  %vm7453_vm10 = vcmask 916480  }
 0xe29   : > { %4006 = vmatpush.msrb.mxu0 %v5153_v30  ;;  %3967 = vmatpush.msrb.mxu2 %v5154_v23  ;;  %v5196_v30 = vld [vmem:[%s5708_s22 + $0x170] sm:$0xff] }
 0xe2a   : > { %v5197_v23 = vld [vmem:[%s5708_s22 + $0x130] sm:$0xff] }
 0xe2b   : > { %4007 = vmatpush.msrb.mxu0 %v5155_v51  ;;  %3968 = vmatpush.msrb.mxu2 %v5156_v6  ;;  %v5198_v51 = vld [vmem:[%s5708_s22 + $0xf0] sm:$0xff] }
 0xe2d   : > { %4008 = vmatpush.msrb.mxu0 %v5157_v58  ;;  %3969 = vmatpush.msrb.mxu2 %v5158_v38  ;;  %v5199_v38 = vld [vmem:[%s5708_s22 + $0xb0] sm:$0xff] }
 0xe2f   : > { %4009 = vmatpush.msrb.mxu0 %v5159_v12  ;;  %3970 = vmatpush.msrb.mxu2 %v5160_v54  ;;  %v3192_v60 = vpop.f32.mrf.mxu2  ;;  %v5200_v12 = vld [vmem:[%s5708_s22 + $0x70] sm:$0xff] }
 0xe30   : > { %v5201_v54 = vld [vmem:[%s5708_s22 + $0x30] sm:$0xff] }
 0xe31   : > { %4010 = vmatpush.msrb.mxu0 %v5161_v22  ;;  %3971 = vmatpush.msrb.mxu2 %v5162_v53 }
 0xe33   : > { %4048 = vmatpush.msra.mxu2 %v5163_v50  ;;  %4011 = vmatpush.msrb.mxu0 %v5164_v61 }
 0xe35   : > { %4049 = vmatpush.msra.mxu2 %v5165_v13  ;;  %4012 = vmatpush.msrb.mxu0 %v5166_v17 }
 0xe37   : > { %4050 = vmatpush.msra.mxu2 %v5167_v0  ;;  %4013 = vmatpush.msrb.mxu0 %v5168_v33 }
 0xe39   : > { %4051 = vmatpush.msra.mxu2 %v5169_v11  ;;  %4014 = vmatpush.msrb.mxu0 %v5170_v16  ;;  %v3195_v29 = vpop.f32.mrf.mxu2 }
 0xe3a   : > { %v4823_v63 = vpack.i.bf16 %v3195_v29, %v3192_v60 }
 0xe3b   : > { %4052 = vmatpush.msra.mxu2 %v5171_v62  ;;  %4015 = vmatpush.msrb.mxu0 %v5172_v39 }
 0xe3c   : > { %4824 = vrot.lane.b32.xlu1 %v4823_v63, %s5497_s15  ;;  %v3072_v9 = vpop.f32.mrf.mxu0 }
 0xe3d   : > { %4053 = vmatpush.msra.mxu2 %v5173_v42  ;;  %4016 = vmatpush.msrb.mxu0 %v5174_v1  ;;  %v4818_v4 = vpack.i.bf16 %v3072_v9, %v3069_v40 }
 0xe3f   : > { %4054 = vmatpush.msra.mxu2 %v5175_v5  ;;  %4017 = vmatpush.msrb.mxu0 %v5176_v28 }
 0xe40   : > { %4819 = vrot.lane.b32.xlu2 %v4818_v4, %s5498_s5 }
 0xe41   : > { %4094 = vmatpush.msra.mxu0 %v5177_v18  ;;  %4055 = vmatpush.msra.mxu2 %v5178_v14  ;;  %v3438_v46 = vpop.f32.mrf.mxu2 }
 0xe43   : > { %4095 = vmatpush.msra.mxu0 %v5179_v3  ;;  %4056 = vmatpush.msra.mxu2 %v5180_v55 }
 0xe45   : > { %4096 = vmatpush.msra.mxu0 %v5181_v52  ;;  %4057 = vmatpush.msra.mxu2 %v5182_v20 }
 0xe47   : > { %4097 = vmatpush.msra.mxu0 %v5183_v26  ;;  %4058 = vmatpush.msra.mxu2 %v5184_v44  ;;  %v5202_v26 = vld [vmem:[%s5708_s22 + $0x3f8] sm:$0xff] }
 0xe49   : > { %4098 = vmatpush.msra.mxu0 %v5185_v32  ;;  %4059 = vmatpush.msra.mxu2 %v5186_v10 }
 0xe4b   : > { %4099 = vmatpush.msra.mxu0 %v5187_v8  ;;  %4060 = vmatpush.msra.mxu2 %v5188_v31  ;;  %v3315_v24 = vpop.f32.mrf.mxu0  ;;  %v5203_v8 = vld [vmem:[%s5708_s22 + $0x3b8] sm:$0xff] }
 0xe4d   : > { %4100 = vmatpush.msra.mxu0 %v5189_v25  ;;  %4061 = vmatpush.msra.mxu2 %v5190_v34 }
 0xe4f   : > { %4101 = vmatpush.msra.mxu0 %v5191_v7  ;;  %4062 = vmatpush.msra.mxu2 %v5192_v35  ;;  %v5205_v35 = vld [vmem:[%s5708_s22 + $0x338] sm:$0xff] }
 0xe51   : > { %4102 = vmatpush.msra.mxu0 %v5193_v49  ;;  %4063 = vmatpush.msra.mxu2 %v5194_v27  ;;  %v5206_v27 = vld [vmem:[%s5708_s22 + $0x2f8] sm:$0xff] }
 0xe53   : > { %4103 = vmatpush.msra.mxu0 %v5195_v47  ;;  %v3318_v56 = vpop.f32.mrf.mxu0  ;;  %v5208_v47 = vld [vmem:[%s5708_s22 + $0x278] sm:$0xff] }
 0xe54   : > { %v4828_v21 = vpack.i.bf16 %v3318_v56, %v3315_v24  ;;  %v5204_v24 = vld [vmem:[%s5708_s22 + $0x378] sm:$0xff] }
 0xe55   : > { %4104 = vmatpush.msra.mxu0 %v5196_v30  ;;  %v5209_v56 = vld [vmem:[%s5708_s22 + $0x238] sm:$0xff] }
 0xe56   : > { %4829 = vrot.lane.b32.xlu0 %v4828_v21, %s5496_s2  ;;  %v5210_v21 = vld [vmem:[%s5708_s22 + $0x1f8] sm:$0xff] }
 0xe57   : > { %4105 = vmatpush.msra.mxu0 %v5197_v23  ;;  %v5211_v30 = vld [vmem:[%s5708_s22 + $0x1b8] sm:$0xff] }
 0xe58   : > { %v5212_v23 = vld [vmem:[%s5708_s22 + $0x178] sm:$0xff] }
 0xe59   : > { %4106 = vmatpush.msra.mxu0 %v5198_v51  ;;  %v3441_v6 = vpop.f32.mrf.mxu2  ;;  %v5213_v51 = vld [vmem:[%s5708_s22 + $0x138] sm:$0xff] }
 0xe5a   : > { %v4833_v58 = vpack.i.bf16 %v3441_v6, %v3438_v46  ;;  %v5207_v46 = vld [vmem:[%s5708_s22 + $0x2b8] sm:$0xff] }
 0xe5b   : > { %4107 = vmatpush.msra.mxu0 %v5199_v38  ;;  %v5214_v6 = vld [vmem:[%s5708_s22 + $0xf8] sm:$0xff] }
 0xe5c   : > { %4834 = vrot.lane.b32.xlu2 %v4833_v58, %s5495_s9  ;;  %v5215_v58 = vld [vmem:[%s5708_s22 + $0xb8] sm:$0xff] }
 0xe5d   : > { %4108 = vmatpush.msra.mxu0 %v5200_v12  ;;  %v5216_v38 = vld [vmem:[%s5708_s22 + $0x78] sm:$0xff] }
 0xe5e   : > { %v5217_v12 = vld [vmem:[%s5708_s22 + $0x38] sm:$0xff] }
 0xe5f   : > { %4109 = vmatpush.msra.mxu0 %v5201_v54 }
 0xe84   : > { %v3561_v22 = vpop.f32.mrf.mxu0 }
 0xe85   : > { %3847 = vrot.lane.b32.xlu0 %v3561_v22, %s5492_s16  ;;  %v5218_v22 = vld [vmem:[%s5760_s13 + $0x10] sm:$0xff] }
 0xe8c   : > { %v3564_v53 = vpop.f32.mrf.mxu0 }
 0xe95   : > { %v3684_v60 = vpop.f32.mrf.mxu2 }
 0xe96   : > { %3855 = vrot.lane.b32.xlu2 %v3684_v60, %s5494_s21  ;;  %v5219_v60 = vld [vmem:[%s5732_s27] ss:$0 sm:$0xff] }
 0xe9a   : > { %v4820_v17 = vpop.permute.xlu2 %4819 }
 0xe9b   : > { %v4821_v33 = vunpack.i.l.bf16 %v4820_v17  ;;  %v4822_v28 = vunpack.i.h.bf16 %v4820_v17 }
 0xe9d   : > { %v3807_v50 = vpop.f32.mrf.mxu0  ;;  %v3687_v61 = vpop.f32.mrf.mxu2  ;;  %v3869_v62 = vsel %vm1198_vm9, %v7076_v43, %v4821_v33  ;;  %v3870_v52 = vsel %vm1198_vm9, %v7088_v59, %v4822_v28  ;;  %vm7454_vm9 = vmmov %vm7453_vm10 }
 0xe9e   : > { %3849 = vrot.lane.b32.xlu2 %v3564_v53, %s5492_s16  ;;  %3863 = vrot.lane.b32.xlu0 %v3807_v50, %s5493_s11 }
 0xea5   : > { %v3810_v13 = vpop.f32.mrf.mxu0 }
 0xea6   : > { %3857 = vrot.lane.b32.xlu0 %v3687_v61, %s5494_s21  ;;  %3865 = vrot.lane.b32.xlu1 %v3810_v13, %s5493_s11  ;;  %v5220_v13 = vld [vmem:[%s5760_s13 + $0x18] sm:$0x1] }
 0xeae   : > { %v4825_v0 = vpop.permute.xlu1 %4824 }
 0xeaf   : > { %v4826_v16 = vunpack.i.l.bf16 %v4825_v0  ;;  %v4827_v18 = vunpack.i.h.bf16 %v4825_v0 }
 0xeb1   : > { %v3871_v63 = vsel %vm2236_vm0, %v3869_v62, %v4826_v16  ;;  %v3872_v20 = vsel %vm2236_vm0, %v3870_v52, %v4827_v18 }
 0xeb6   : > { %v4835_v11 = vpop.permute.xlu2 %4834 }
 0xeb7   : > { %v4836_v1 = vunpack.i.l.bf16 %v4835_v11  ;;  %v4837_v32 = vunpack.i.h.bf16 %v4835_v11 }
 0xec8   : > { %v4830_v40 = vpop.permute.xlu0 %4829 }
 0xec9   : > { %v4831_v29 = vunpack.i.l.bf16 %v4830_v40  ;;  %v4832_v14 = vunpack.i.h.bf16 %v4830_v40 }
 0xecb   : > { %v3873_v42 = vsel %vm2239_vm2, %v3871_v63, %v4831_v29  ;;  %v3874_v44 = vsel %vm2239_vm2, %v3872_v20, %v4832_v14 }
 0xecc   : > { %v3875_v5 = vsel %vm2242_vm3, %v3873_v42, %v4836_v1  ;;  %v3876_v31 = vsel %vm2242_vm3, %v3874_v44, %v4837_v32 }
 0xef0   : > { %v3856_v9 = vpop.permute.xlu2 %3855 }
 0xef7   : > { %v3848_v39 = vpop.permute.xlu0 %3847 }
 0xef8   : > { %v3877_v4 = vsel %vm2245_vm4, %v3875_v5, %v3848_v39  ;;  %v3850_v10 = vpop.permute.xlu2 %3849 }
 0xef9   : > { %v3879_v43 = vsel %vm2248_vm5, %v3877_v4, %v3856_v9  ;;  %v3878_v59 = vsel %vm2245_vm4, %v3876_v31, %v3850_v10  ;;  %v5221_v31 = vld [vmem:[%s5740_s0] ss:$0 sm:$0xff] }
 0xf10   : > { %v3864_v3 = vpop.permute.xlu0 %3863 }
 0xf11   : > { %v3881_v55 = vsel %vm7453_vm10, %v3879_v43, %v3864_v3 }
 0xf12   : > { %3899 = vmatmul.f32.vlgmr.msrb.gmra.mxu1 %v3881_v55 }
 0xf13   : > { %4117 = vmatpush.msrb.mxu1 %v5202_v26 }
 0xf15   : > { %4118 = vmatpush.msrb.mxu1 %v5203_v8 }
 0xf17   : > { %4119 = vmatpush.msrb.mxu1 %v5204_v24 }
 0xf18   : > { %v3866_v25 = vpop.permute.xlu1 %3865  ;;  %v3858_v34 = vpop.permute.xlu0 %3857 }
 0xf19   : > { %v3880_v7 = vsel %vm2248_vm5, %v3878_v59, %v3858_v34  ;;  %4120 = vmatpush.msrb.mxu1 %v5205_v35 }
 0xf1a   : > { %v3882_v49 = vsel %vm7454_vm9, %v3880_v7, %v3866_v25 }
 0xf1b   : > { %3902 = vmatmul.f32.gmra.mxu1 %v3882_v49  ;;  %v5223_v49 = vld [vmem:[%s5710_s24 + $0x178] sm:$0xff] }
 0xf1c   : > { %4121 = vmatpush.msrb.mxu1 %v5206_v27  ;;  %v5224_v27 = vld [vmem:[%s5710_s24 + $0x1f8] sm:$0xff] }
 0xf1e   : > { %4122 = vmatpush.msrb.mxu1 %v5207_v46  ;;  %v5225_v46 = vld [vmem:[%s5710_s24 + $0x78] sm:$0xff] }
 0xf20   : > { %4123 = vmatpush.msrb.mxu1 %v5208_v47  ;;  %v5226_v47 = vld [vmem:[%s5710_s24 + $0xf8] sm:$0xff] }
 0xf22   : > { %4124 = vmatpush.msrb.mxu1 %v5209_v56 }
 0xf24   : > { %4125 = vmatpush.msrb.mxu1 %v5210_v21  ;;  %v5227_v21 = vld [vmem:[%s5710_s24 + $0x170] sm:$0xff] }
 0xf26   : > { %4126 = vmatpush.msrb.mxu1 %v5211_v30  ;;  %v5228_v30 = vld [vmem:[%s5710_s24 + $0x1f0] sm:$0xff] }
 0xf28   : > { %4127 = vmatpush.msrb.mxu1 %v5212_v23 }
 0xf2a   : > { %4128 = vmatpush.msrb.mxu1 %v5213_v51  ;;  %v5229_v51 = vld [vmem:[%s5710_s24 + $0x70] sm:$0xff] }
 0xf2c   : > { %4129 = vmatpush.msrb.mxu1 %v5214_v6  ;;  %v5230_v6 = vld [vmem:[%s5710_s24 + $0xf0] sm:$0xff] }
 0xf2e   : > { %4130 = vmatpush.msrb.mxu1 %v5215_v58  ;;  %v5231_v58 = vld [vmem:[%s5710_s24 + $0x168] sm:$0xff] }
 0xf30   : > { %4131 = vmatpush.msrb.mxu1 %v5216_v38  ;;  %v5232_v38 = vld [vmem:[%s5710_s24 + $0x1e8] sm:$0xff] }
 0xf32   : > { %4132 = vmatpush.msrb.mxu1 %v5217_v12 }
 0xf8f   : > { %v3900_v54 = vpop.f32.mrf.mxu1 }
 0xf90   : > { %v3906_v53 = vadd.f32 %v5218_v22, %v3900_v54  ;;  %v5233_v54 = vld [vmem:[%s5710_s24 + $0x68] sm:$0xff] }
 0xf91   : > { %v5234_v22 = vld [vmem:[%s5710_s24 + $0xe8] sm:$0xff] }
 0xf92   : > { %v7181_v50 = vadd.f32 %v5219_v60, %v3906_v53  ;;  %v5235_v53 = vld [vmem:[%s5710_s24 + $0x160] sm:$0xff] }
 0xf94   : > { %3910 = vadd.xlane.f32.xlu2 %v7181_v50 }
 0xf98   : > { %v3903_v61 = vpop.f32.mrf.mxu1 }
 0xf99   : > { %v3907_v17 = vadd.f32 %v5220_v13, %v3903_v61  ;;  %v5237_v13 = vld [vmem:[%s5710_s24 + $0x60] sm:$0xff] }
 0xf9b   : > { %v7185_v40 = vadd.f32 %v5219_v60, %v3907_v17  ;;  %v5236_v60 = vld [vmem:[%s5710_s24 + $0x1e0] sm:$0xff] }
 0xf9c   : > { %v5238_v17 = vld [vmem:[%s5710_s24 + $0xe0] sm:$0xff] }
 0xf9d   : > { %v3912_v0 = vsel %vm1071_vm1, %v7185_v40, 0.0 }
 0xf9e   : > { %3913 = vadd.xlane.f32.xlu0 %v3912_v0  ;;  %v5239_v0 = vld [vmem:[%s5710_s24 + $0x158] sm:$0xff] }
0x1007   : > { %v3911_v33 = vpop.xlane.xlu2 %3910 }
0x1008   : > { %v3915_v11 = vmul.f32 %v3911_v33, %v5779_v41  ;;  %v5240_v33 = vld [vmem:[%s5710_s24 + $0x1d8] sm:$0xff] }
0x100a   : > { %v3917_v16 = vsub.f32 %v7181_v50, %v3915_v11  ;;  %v5241_v11 = vld [vmem:[%s5710_s24 + $0x150] sm:$0xff] }
0x100c   : > { %v3919_v29 = vmul.f32 %v3917_v16, %v3917_v16 }
0x100e   : > { %3921 = vadd.xlane.f32.xlu1 %v3919_v29  ;;  %v5243_v29 = vld [vmem:[%s5710_s24 + $0x58] sm:$0xff] }
0x1011   : > { %v3914_v62 = vpop.xlane.xlu0 %3913 }
0x1012   : > { %v3916_v63 = vmul.f32 %v3914_v62, %v5779_v41  ;;  %v5244_v62 = vld [vmem:[%s5710_s24 + $0xd8] sm:$0xff] }
0x1014   : > { %v3918_v39 = vsub.f32 %v7185_v40, %v3916_v63  ;;  %v5245_v63 = vld [vmem:[%s5710_s24 + $0x148] sm:$0xff] }
0x1016   : > { %v3920_v42 = vmul.f32 %v3918_v39, %v3918_v39 }
0x1018   : > { %v3923_v1 = vsel %vm1071_vm1, %v3920_v42, 0.0  ;;  %v5247_v42 = vld [vmem:[%s5710_s24 + $0x50] sm:$0xff] }
0x1019   : > { %3924 = vadd.xlane.f32.xlu2 %v3923_v1  ;;  %v5248_v1 = vld [vmem:[%s5710_s24 + $0xd0] sm:$0xff] }
0x1081   : > { %v3922_v9 = vpop.xlane.xlu1 %3921 }
0x1082   : > { %v3926_v5 = vmul.f32 %v3922_v9, %v5779_v41  ;;  %v5249_v9 = vld [vmem:[%s5710_s24 + $0x140] sm:$0xff] }
0x1084   : > { %v3928_v4 = vadd.f32 1e-05, %v3926_v5  ;;  %v5250_v5 = vld [vmem:[%s5710_s24 + $0x1c0] sm:$0xff] }
0x1086   : > { %5002 = vrsqrt.f32 %v3928_v4  ;;  %vm3936_vm1 = vweird.f32 %v3928_v4 }
0x108c   : > { %v5003_v28 = vpop.eup %5002  ;;  %v3925_v18 = vpop.xlane.xlu2 %3924 }
0x108d   : > { %v3931_v14 = vmul.f32 %v5003_v28, %v3928_v4  ;;  %v3927_v3 = vmul.f32 %v3925_v18, %v5779_v41  ;;  %vm3937_vm0 = vweird.f32 %v5003_v28  ;;  %v5222_v41 = vld [vmem:[%s5745_s14] ss:$0 sm:$0xff]  ;;  %v5251_v4 = vld [vmem:[%s5710_s24 + $0x48] sm:$0xff]  ;;  %v5253_v18 = vld [vmem:[%s5710_s24 + $0x138] sm:$0xff] }
0x108e   : > { %vm3938_vm2 = vmor %vm3936_vm1, %vm3937_vm0 }
0x108f   : > { %v3932_v43 = vmul.f32 %v5003_v28, %v3931_v14  ;;  %v3929_v55 = vadd.f32 1e-05, %v3927_v3  ;;  %v5254_v14 = vld [vmem:[%s5710_s24 + $0x1b8] sm:$0xff]  ;;  %v5255_v3 = vld [vmem:[%s5710_s24 + $0x40] sm:$0xff] }
0x1091   : > { %v3933_v52 = vmul.f32 0.5, %v3932_v43  ;;  %5004 = vrsqrt.f32 %v3929_v55  ;;  %vm3946_vm4 = vweird.f32 %v3929_v55  ;;  %v5256_v43 = vld [vmem:[%s5710_s24 + $0xc0] sm:$0xff] }
0x1093   : > { %v3934_v20 = vsub.f32 1.5, %v3933_v52  ;;  %v5258_v52 = vld [vmem:[%s5710_s24 + $0x1b0] sm:$0xff] }
0x1095   : > { %v3935_v26 = vmul.f32 %v5003_v28, %v3934_v20  ;;  %v5259_v20 = vld [vmem:[%s5710_s24 + $0x38] sm:$0xff] }
0x1097   : > { %v5005_v44 = vpop.eup %5004  ;;  %v3939_v32 = vsel %vm3938_vm2, %v5003_v28, %v3935_v26  ;;  %v5252_v28 = vld [vmem:[%s5710_s24 + $0xc8] sm:$0xff]  ;;  %v5260_v26 = vld [vmem:[%s5710_s24 + $0xb8] sm:$0xff] }
0x1098   : > { %v3950_v10 = vmul.f32 %v3939_v32, %v3917_v16  ;;  %v3941_v8 = vmul.f32 %v5005_v44, %v3929_v55  ;;  %vm3947_vm3 = vweird.f32 %v5005_v44  ;;  %v5242_v16 = vld [vmem:[%s5710_s24 + $0x1d0] sm:$0xff]  ;;  %v5262_v32 = vld [vmem:[%s5710_s24 + $0x1a8] sm:$0xff] }
0x1099   : > { %vm3948_vm5 = vmor %vm3946_vm4, %vm3947_vm3  ;;  %v5257_v55 = vld [vmem:[%s5710_s24 + $0x130] sm:$0xff] }
0x109a   : > { %v3952_v24 = vmul.f32 %v5221_v31, %v3950_v10  ;;  %v3942_v59 = vmul.f32 %v5005_v44, %v3941_v8  ;;  %v5263_v10 = vld [vmem:[%s5710_s24 + $0x30] sm:$0xff] }
0x109b   : > { %v5264_v8 = vld [vmem:[%s5710_s24 + $0xb0] sm:$0xff] }
0x109c   : > { %v7198_v25 = vadd.f32 %v5222_v41, %v3952_v24  ;;  %v3943_v34 = vmul.f32 0.5, %v3942_v59  ;;  %v5266_v24 = vld [vmem:[%s5710_s24 + $0x1a0] sm:$0xff]  ;;  %v5267_v59 = vld [vmem:[%s5710_s24 + $0x28] sm:$0xff] }
0x109e   : > { %v3944_v7 = vsub.f32 1.5, %v3943_v34  ;;  %3972 = vmatmul.f32.vlgmr.msrb.gmra.mxu2 %v7198_v25  ;;  %3995 = vmatmul.f32.vlgmr.msra.gmra.mxu3 %v7198_v25  ;;  %v5270_v34 = vld [vmem:[%s5710_s24 + $0x198] sm:$0xff] }
0x109f   : > { %4018 = vmatmul.f32.vlgmr.msrb.gmra.mxu0 %v7198_v25  ;;  %4041 = vmatmul.f32.vlgmr.msra.gmra.mxu1 %v7198_v25 }
0x10a0   : > { %v3945_v35 = vmul.f32 %v5005_v44, %v3944_v7  ;;  %4266 = vmatpush.msrb.mxu0 %v5223_v49  ;;  %4289 = vmatpush.msra.mxu1 %v5224_v27  ;;  %v5271_v7 = vld [vmem:[%s5710_s24 + $0x20] sm:$0xff]  ;;  %v5273_v49 = vld [vmem:[%s5710_s24 + $0x110] sm:$0xff] }
0x10a1   : > { %4220 = vmatpush.msrb.mxu2 %v5225_v46  ;;  %4243 = vmatpush.msra.mxu3 %v5226_v47  ;;  %v5274_v27 = vld [vmem:[%s5710_s24 + $0x190] sm:$0xff]  ;;  %v5275_v46 = vld [vmem:[%s5710_s24 + $0x18] sm:$0xff] }
0x10a2   : > { %v3949_v56 = vsel %vm3948_vm5, %v5005_v44, %v3945_v35  ;;  %4267 = vmatpush.msrb.mxu0 %v5227_v21  ;;  %4290 = vmatpush.msra.mxu1 %v5228_v30  ;;  %v5261_v44 = vld [vmem:[%s5710_s24 + $0x128] sm:$0xff]  ;;  %v5272_v35 = vld [vmem:[%s5710_s24 + $0xa0] sm:$0xff]  ;;  %v5276_v47 = vld [vmem:[%s5710_s24 + $0x98] sm:$0xff] }
0x10a3   : > { %v3951_v23 = vmul.f32 %v3949_v56, %v3918_v39  ;;  %4221 = vmatpush.msrb.mxu2 %v5229_v51  ;;  %4244 = vmatpush.msra.mxu3 %v5230_v6  ;;  %v5246_v39 = vld [vmem:[%s5710_s24 + $0x1c8] sm:$0xff]  ;;  %v5279_v30 = vld [vmem:[%s5710_s24 + $0x10] sm:$0xff]  ;;  %v5281_v51 = vld [vmem:[%s5710_s24 + $0x100] sm:$0xff] }
0x10a4   : > { %4268 = vmatpush.msrb.mxu0 %v5231_v58  ;;  %4291 = vmatpush.msra.mxu1 %v5232_v38  ;;  %v5277_v56 = vld [vmem:[%s5710_s24 + $0x108] sm:$0xff]  ;;  %v5282_v6 = vld [vmem:[%s5710_s24 + $0x180] sm:$0xff] }
0x10a5   : > { %v3953_v12 = vmul.f32 %v5221_v31, %v3951_v23  ;;  %4222 = vmatpush.msrb.mxu2 %v5233_v54  ;;  %4245 = vmatpush.msra.mxu3 %v5234_v22  ;;  %v5265_v31 = vld [vmem:[%s5710_s24 + $0x120] sm:$0xff]  ;;  %v5278_v21 = vld [vmem:[%s5710_s24 + $0x188] sm:$0xff]  ;;  %v5280_v23 = vld [vmem:[%s5710_s24 + $0x90] sm:$0xff] }
0x10a6   : > { %4269 = vmatpush.msrb.mxu0 %v5235_v53  ;;  %4292 = vmatpush.msra.mxu1 %v5236_v60  ;;  %v5283_v58 = vld [vmem:[%s5710_s24 + $0x8] sm:$0xff]  ;;  %v5286_v54 = vld [vmem:[%s5710_s24 + $0x80] sm:$0xff] }
0x10a7   : > { %v7218_v61 = vadd.f32 %v5222_v41, %v3953_v12  ;;  %4223 = vmatpush.msrb.mxu2 %v5237_v13  ;;  %4246 = vmatpush.msra.mxu3 %v5238_v17  ;;  %v5268_v41 = vld [vmem:[%s5710_s24 + $0xa8] sm:$0xff]  ;;  %v5285_v12 = vld [vmem:[%s5710_s24] sm:$0xff] }
0x10a8   : > { %4270 = vmatpush.msrb.mxu0 %v5239_v0  ;;  %4293 = vmatpush.msra.mxu1 %v5240_v33  ;;  %v5284_v38 = vld [vmem:[%s5710_s24 + $0x88] sm:$0xff] }
0x10a9   : > { %3975 = vmatmul.f32.gmra.mxu2 %v7218_v61  ;;  %3998 = vmatmul.f32.gmra.mxu3 %v7218_v61 }
0x10aa   : > { %4021 = vmatmul.f32.gmra.mxu0 %v7218_v61  ;;  %4044 = vmatmul.f32.gmra.mxu1 %v7218_v61 }
0x10ab   : > { %4271 = vmatpush.msrb.mxu0 %v5241_v11  ;;  %4294 = vmatpush.msra.mxu1 %v5242_v16 }
0x10ac   : > { %4224 = vmatpush.msrb.mxu2 %v5243_v29  ;;  %4247 = vmatpush.msra.mxu3 %v5244_v62 }
0x10ad   : > { %4272 = vmatpush.msrb.mxu0 %v5245_v63  ;;  %4295 = vmatpush.msra.mxu1 %v5246_v39 }
0x10ae   : > { %4225 = vmatpush.msrb.mxu2 %v5247_v42  ;;  %4248 = vmatpush.msra.mxu3 %v5248_v1 }
0x10af   : > { %4273 = vmatpush.msrb.mxu0 %v5249_v9  ;;  %4296 = vmatpush.msra.mxu1 %v5250_v5 }
0x10b0   : > { %4226 = vmatpush.msrb.mxu2 %v5251_v4  ;;  %4249 = vmatpush.msra.mxu3 %v5252_v28 }
0x10b1   : > { %4064 = vmatmul.f32.vlgmr.msra.gmra.mxu2 %v7198_v25  ;;  %4087 = vmatmul.f32.vlgmr.msrb.gmra.mxu3 %v7198_v25 }
0x10b2   : > { %4110 = vmatmul.f32.vlgmr.msra.gmra.mxu0 %v7198_v25  ;;  %4133 = vmatmul.f32.vlgmr.msrb.gmra.mxu1 %v7198_v25  ;;  %v5269_v25 = vld [vmem:[%s5710_s24 + $0x118] sm:$0xff] }
0x10b3   : > { %4274 = vmatpush.msrb.mxu0 %v5253_v18  ;;  %4297 = vmatpush.msra.mxu1 %v5254_v14 }
0x10b4   : > { %4227 = vmatpush.msrb.mxu2 %v5255_v3  ;;  %4250 = vmatpush.msra.mxu3 %v5256_v43 }
0x10b5   : > { %4275 = vmatpush.msrb.mxu0 %v5257_v55  ;;  %4298 = vmatpush.msra.mxu1 %v5258_v52 }
0x10b6   : > { %4228 = vmatpush.msrb.mxu2 %v5259_v20  ;;  %4251 = vmatpush.msra.mxu3 %v5260_v26 }
0x10b7   : > { %4276 = vmatpush.msrb.mxu0 %v5261_v44  ;;  %4299 = vmatpush.msra.mxu1 %v5262_v32 }
0x10b8   : > { %4229 = vmatpush.msrb.mxu2 %v5263_v10  ;;  %4252 = vmatpush.msra.mxu3 %v5264_v8 }
0x10b9   : > { %4067 = vmatmul.f32.gmra.mxu2 %v7218_v61  ;;  %4090 = vmatmul.f32.gmra.mxu3 %v7218_v61 }
0x10ba   : > { %4113 = vmatmul.f32.gmra.mxu0 %v7218_v61  ;;  %4136 = vmatmul.f32.gmra.mxu1 %v7218_v61 }
0x10bb   : > { %4277 = vmatpush.msrb.mxu0 %v5265_v31  ;;  %4300 = vmatpush.msra.mxu1 %v5266_v24 }
0x10bc   : > { %4230 = vmatpush.msrb.mxu2 %v5267_v59  ;;  %4253 = vmatpush.msra.mxu3 %v5268_v41 }
0x10bd   : > { %4278 = vmatpush.msrb.mxu0 %v5269_v25  ;;  %4301 = vmatpush.msra.mxu1 %v5270_v34 }
0x10be   : > { %4231 = vmatpush.msrb.mxu2 %v5271_v7  ;;  %4254 = vmatpush.msra.mxu3 %v5272_v35 }
0x10bf   : > { %4279 = vmatpush.msrb.mxu0 %v5273_v49  ;;  %4302 = vmatpush.msra.mxu1 %v5274_v27 }
0x10c0   : > { %4232 = vmatpush.msrb.mxu2 %v5275_v46  ;;  %4255 = vmatpush.msra.mxu3 %v5276_v47 }
0x10c1   : > { %4280 = vmatpush.msrb.mxu0 %v5277_v56  ;;  %4303 = vmatpush.msra.mxu1 %v5278_v21 }
0x10c2   : > { %4233 = vmatpush.msrb.mxu2 %v5279_v30  ;;  %4256 = vmatpush.msra.mxu3 %v5280_v23 }
0x10c3   : > { %4281 = vmatpush.msrb.mxu0 %v5281_v51  ;;  %4304 = vmatpush.msra.mxu1 %v5282_v6 }
0x10c4   : > { %4234 = vmatpush.msrb.mxu2 %v5283_v58  ;;  %4257 = vmatpush.msra.mxu3 %v5284_v38 }
0x10c6   : > { %4235 = vmatpush.msrb.mxu2 %v5285_v12  ;;  %4258 = vmatpush.msra.mxu3 %v5286_v54 }
0x111c   : > { %v7282_v22 = vpop.f32.mrf.mxu0  ;;  %v7284_v53 = vpop.f32.mrf.mxu1 }
0x1121   : > { %v7286_v60 = vpop.f32.mrf.mxu2  ;;  %v7288_v61 = vpop.f32.mrf.mxu3 }
0x1127   : > { %v7290_v13 = vpop.f32.mrf.mxu0  ;;  %v7292_v17 = vpop.f32.mrf.mxu1 }
0x112c   : > { %v7294_v0 = vpop.f32.mrf.mxu2  ;;  %v7296_v33 = vpop.f32.mrf.mxu3 }
0x112f   : > { %v4111_v11 = vpop.f32.mrf.mxu0  ;;  %v4134_v16 = vpop.f32.mrf.mxu1 }
0x1130   : > { %v4112_v29 = vadd.f32 %v4111_v11, %v6519_v15  ;;  %v4135_v62 = vadd.f32 %v4134_v16, %v6522_v57 }
0x1132   : > { %v4150_v63 = vmul.f32 0.044715, %v4112_v29  ;;  %v4151_v39 = vmul.f32 0.044715, %v4135_v62  ;;  %v4142_v16 = vmul.f32 0.5, %v4112_v29 }
0x1134   : > { %v4158_v42 = vmul.f32 %v4150_v63, %v4112_v29  ;;  %v4159_v1 = vmul.f32 %v4151_v39, %v4135_v62  ;;  %v4065_v9 = vpop.f32.mrf.mxu2  ;;  %v4088_v5 = vpop.f32.mrf.mxu3  ;;  %v4143_v39 = vmul.f32 0.5, %v4135_v62 }
0x1135   : > { %v4066_v4 = vadd.f32 %v4065_v9, %v6536_v36  ;;  %v7302_v28 = vadd.f32 %v4088_v5, %v6539_v37 }
0x1136   : > { %v4166_v18 = vmul.f32 %v4158_v42, %v4112_v29  ;;  %v4167_v14 = vmul.f32 %v4159_v1, %v4135_v62 }
0x1137   : > { %v4148_v3 = vmul.f32 0.044715, %v4066_v4  ;;  %v4149_v43 = vmul.f32 0.044715, %v7302_v28  ;;  %v4114_v55 = vpop.f32.mrf.mxu0  ;;  %v4137_v52 = vpop.f32.mrf.mxu1 }
0x1138   : > { %v4174_v20 = vadd.f32 %v4166_v18, %v4112_v29  ;;  %v4175_v26 = vadd.f32 %v4167_v14, %v4135_v62  ;;  %v7306_v44 = vadd.f32 %v4114_v55, %v6519_v15  ;;  %v7309_v32 = vadd.f32 %v4137_v52, %v6522_v57 }
0x1139   : > { %v4156_v10 = vmul.f32 %v4148_v3, %v4066_v4  ;;  %v4157_v8 = vmul.f32 %v4149_v43, %v7302_v28  ;;  %v4020_v18 = vadd.f32 %v7282_v22, %v6604_v2  ;;  %v4043_v3 = vadd.f32 %v7284_v53, %v6618_v48 }
0x113a   : > { %v4182_v31 = vmul.f32 0.7978846, %v4174_v20  ;;  %v4183_v24 = vmul.f32 0.7978846, %v4175_v26  ;;  %v4154_v59 = vmul.f32 0.044715, %v7306_v44  ;;  %v3974_v53 = vadd.f32 %v7286_v60, %v6632_v45 }
0x113b   : > { %v4164_v41 = vmul.f32 %v4156_v10, %v4066_v4  ;;  %v4165_v25 = vmul.f32 %v4157_v8, %v7302_v28  ;;  %v4155_v34 = vmul.f32 0.044715, %v7309_v32  ;;  %v4140_v52 = vmul.f32 0.5, %v4066_v4 }
0x113c   : > { %5006 = vtanh.f32 %v4182_v31  ;;  %v4162_v7 = vmul.f32 %v4154_v59, %v7306_v44  ;;  %v4068_v15 = vpop.f32.mrf.mxu2  ;;  %v4091_v35 = vpop.f32.mrf.mxu3  ;;  %v4141_v22 = vmul.f32 0.5, %v7302_v28 }
0x113d   : > { %5008 = vtanh.f32 %v4183_v24  ;;  %v4172_v57 = vadd.f32 %v4164_v41, %v4066_v4  ;;  %v4173_v49 = vadd.f32 %v4165_v25, %v7302_v28  ;;  %v4163_v27 = vmul.f32 %v4155_v34, %v7309_v32 }
0x113e   : > { %v7319_v46 = vadd.f32 %v4068_v15, %v6536_v36  ;;  %v7322_v47 = vadd.f32 %v4091_v35, %v6539_v37  ;;  %v4170_v56 = vmul.f32 %v4162_v7, %v7306_v44  ;;  %v3997_v25 = vadd.f32 %v7288_v61, %v6635_v19 }
0x113f   : > { %v4180_v21 = vmul.f32 0.7978846, %v4172_v57  ;;  %v4181_v30 = vmul.f32 0.7978846, %v4173_v49  ;;  %v4171_v23 = vmul.f32 %v4163_v27, %v7309_v32  ;;  %v4146_v15 = vmul.f32 0.5, %v7306_v44 }
0x1140   : > { %v4152_v51 = vmul.f32 0.044715, %v7319_v46  ;;  %v4153_v6 = vmul.f32 0.044715, %v7322_v47  ;;  %v4178_v58 = vadd.f32 %v4170_v56, %v7306_v44  ;;  %v4147_v28 = vmul.f32 0.5, %v7309_v32 }
0x1141   : > { %5010 = vtanh.f32 %v4180_v21  ;;  %v4179_v38 = vadd.f32 %v4171_v23, %v7309_v32  ;;  %v4023_v27 = vadd.f32 %v7290_v13, %v6604_v2  ;;  %v4046_v61 = vadd.f32 %v7292_v17, %v6618_v48 }
0x1142   : > { %v5007_v36 = vpop.eup %5006  ;;  %5012 = vtanh.f32 %v4181_v30  ;;  %v4160_v37 = vmul.f32 %v4152_v51, %v7319_v46  ;;  %v4161_v12 = vmul.f32 %v4153_v6, %v7322_v47  ;;  %v4186_v54 = vmul.f32 0.7978846, %v4178_v58 }
0x1143   : > { %v5009_v11 = vpop.eup %5008  ;;  %v4198_v63 = vadd.f32 1.0, %v5007_v36  ;;  %v4187_v42 = vmul.f32 0.7978846, %v4179_v38  ;;  %v4144_v6 = vmul.f32 0.5, %v7319_v46  ;;  %v4145_v58 = vmul.f32 0.5, %v7322_v47 }
0x1144   : > { %v4199_v1 = vadd.f32 1.0, %v5009_v11  ;;  %5014 = vtanh.f32 %v4186_v54  ;;  %v4168_v9 = vmul.f32 %v4160_v37, %v7319_v46  ;;  %v4169_v5 = vmul.f32 %v4161_v12, %v7322_v47 }
0x1145   : > { %v4206_v14 = vmul.f32 %v4198_v63, %v4142_v16  ;;  %5016 = vtanh.f32 %v4187_v42  ;;  %v3977_v13 = vadd.f32 %v7294_v0, %v6632_v45  ;;  %v4000_v48 = vadd.f32 %v7296_v33, %v6635_v19 }
0x1146   : > { %v4207_v43 = vmul.f32 %v4199_v1, %v4143_v39  ;;  %v4176_v29 = vadd.f32 %v4168_v9, %v7319_v46  ;;  %v4177_v62 = vadd.f32 %v4169_v5, %v7322_v47  ;;  %v5287_v39 = vld [vmem:[%s5755_s28] ss:$0 sm:$0xff] }
0x1147   : > { %v5011_v55 = vpop.eup %5010  ;;  %v4214_v20 = vmul.f32 %v4206_v14, %v4020_v18 }
0x1148   : > { %v5013_v26 = vpop.eup %5012  ;;  %v4196_v10 = vadd.f32 1.0, %v5011_v55  ;;  %v4215_v8 = vmul.f32 %v4207_v43, %v4043_v3  ;;  %v4184_v31 = vmul.f32 0.7978846, %v4176_v29  ;;  %v4185_v24 = vmul.f32 0.7978846, %v4177_v62 }
0x1149   : > { %v4197_v59 = vadd.f32 1.0, %v5013_v26  ;;  %4282 = vmatmul.f32.vlgmr.msrb.gmra.mxu0 %v4214_v20 }
0x114a   : > { %v5015_v41 = vpop.eup %5014  ;;  %4305 = vmatmul.f32.vlgmr.msra.gmra.mxu1 %v4215_v8  ;;  %v4204_v34 = vmul.f32 %v4196_v10, %v4140_v52  ;;  %5018 = vtanh.f32 %v4184_v31 }
0x114b   : > { %v5017_v4 = vpop.eup %5016  ;;  %v4205_v7 = vmul.f32 %v4197_v59, %v4141_v22  ;;  %v4202_v35 = vadd.f32 1.0, %v5015_v41  ;;  %5020 = vtanh.f32 %v4185_v24 }
0x114c   : > { %v4212_v57 = vmul.f32 %v4204_v34, %v3974_v53  ;;  %v4203_v49 = vadd.f32 1.0, %v5017_v4 }
0x114d   : > { %v4213_v60 = vmul.f32 %v4205_v7, %v3997_v25  ;;  %v4210_v56 = vmul.f32 %v4202_v35, %v4146_v15 }
0x114e   : > { %4236 = vmatmul.f32.vlgmr.msrb.gmra.mxu2 %v4212_v57  ;;  %v4211_v21 = vmul.f32 %v4203_v49, %v4147_v28 }
0x114f   : > { %4259 = vmatmul.f32.vlgmr.msra.gmra.mxu3 %v4213_v60  ;;  %v4218_v30 = vmul.f32 %v4210_v56, %v4023_v27 }
0x1150   : > { %v5019_v23 = vpop.eup %5018  ;;  %v4219_v44 = vmul.f32 %v4211_v21, %v4046_v61 }
0x1151   : > { %v5021_v51 = vpop.eup %5020  ;;  %4285 = vmatmul.f32.gmra.mxu0 %v4218_v30  ;;  %v4200_v32 = vadd.f32 1.0, %v5019_v23 }
0x1152   : > { %4308 = vmatmul.f32.gmra.mxu1 %v4219_v44  ;;  %v4201_v2 = vadd.f32 1.0, %v5021_v51 }
0x1153   : > { %v4208_v38 = vmul.f32 %v4200_v32, %v4144_v6 }
0x1154   : > { %v4209_v17 = vmul.f32 %v4201_v2, %v4145_v58 }
0x1155   : > { %v4216_v36 = vmul.f32 %v4208_v38, %v3977_v13 }
0x1156   : > { %v4217_v37 = vmul.f32 %v4209_v17, %v4000_v48 }
0x1157   : > { %4239 = vmatmul.f32.gmra.mxu2 %v4216_v36 }
0x1158   : > { %4262 = vmatmul.f32.gmra.mxu3 %v4217_v37 }
0x11c6   : > { %v4283_v54 = vpop.f32.mrf.mxu0 }
0x11c7   : > { %v4306_v47 = vpop.f32.mrf.mxu1 }
0x11ce   : > { %v4286_v1 = vpop.f32.mrf.mxu0 }
0x11cf   : > { %v4309_v5 = vpop.f32.mrf.mxu1 }
0x11d1   : > { %v4237_v46 = vpop.f32.mrf.mxu2 }
0x11d2   : > { %v4260_v12 = vpop.f32.mrf.mxu3 }
0x11d3   : > { %v4261_v11 = vadd.f32 %v4260_v12, %v4237_v46 }
0x11d5   : > { %v4284_v16 = vadd.f32 %v4283_v54, %v4261_v11 }
0x11d7   : > { %v4307_v63 = vadd.f32 %v4306_v47, %v4284_v16 }
0x11d9   : > { %v4312_v45 = vadd.f32 %v4307_v63, %v7181_v50 }
0x11da   : > { %v4240_v0 = vpop.f32.mrf.mxu2 }
0x11db   : > { %v4314_v42 = vadd.f32 %v5287_v39, %v4312_v45  ;;  %v4263_v19 = vpop.f32.mrf.mxu3 }
0x11dc   : > { %v4264_v33 = vadd.f32 %v4263_v19, %v4240_v0 }
0x11dd   : > { %4685 = vst [vmem:[%s5760_s13 + $0x10] sm:$0xff] %v4314_v42 }
0x11de   : > { %v4287_v9 = vadd.f32 %v4286_v1, %v4264_v33 }
0x11e0   : > { %v4310_v18 = vadd.f32 %v4309_v5, %v4287_v9 }
0x11e2   : > { %v4313_v14 = vadd.f32 %v4310_v18, %v7185_v40 }
0x11e4   : > { %v4315_v3 = vadd.f32 %v5287_v39, %v4313_v14 }
0x11e6   : > { %4686 = vst [vmem:[%s5760_s13 + $0x18] sm:$0x1] %v4315_v3 }
0x11e7 PF: > { %s33_s20 = sadd.s32 1, %s5482_s20   ;;  %s7455_s29 = sld [smem:[#allocation12_spill]] }
0x11e8   : > { %p30_p3 = scmp.ge.s32.totalorder %s33_s20, 6   ;;  %s7456_s30 = sld [smem:[#allocation13_spill]] }
0x11e9   : > { %s7457_s15 = sld [smem:[#allocation18_spill]] }
0x11ea   : > { %s7458_s16 = sld [smem:[#allocation14_spill]]  ;;  %32 = sbr.rel (!%p30_p3) target bundleno = 25 (0x19), region = 184 }
0x11eb   : > { %s7459_s17 = sld [smem:[#allocation15_spill]] }
0x11ec   : > { %s7460_s18 = sld [smem:[#allocation16_spill]] }
0x11ed   : > { %s7461_s19 = sld [smem:[#allocation17_spill]] }
0x11ef   :  { %4342 = vsyncpa [#allocation3], 1 }
0x11f0   :  { %4344 = vsyncpa [#allocation3 + $0x1], 1 }
0x11f1   :  { %4345 = vsyncpa [#allocation5], 1 }
0x11f2   :  { %4347 = vsyncpa [#allocation5 + $0x1], 1 }
0x11f3   :  { %4348 = vsyncpa [#allocation8], 1 }
0x11f4   :  { %4350 = vsyncpa [#allocation8 + $0x1], 1 }

</bundles_post_ra>
